<compile_context>
chip_gen: v6e
topology: v6e:2x2x1
jax: 0.10.0
libtpu: 0.0.40
codegen_flags: <defaults>
</compile_context>

<pallas_src>
import math

import jax
import jax.numpy as jnp
from jax.experimental import pallas as pl
from jax.experimental.pallas import tpu as pltpu


# ----------------------------- Pallas kernel -------------------------------

def _ffn_kernel(x_ref, w1_ref, b1_ref, w2_ref, b2_ref, o_ref):
    """One (tm, D) row tile of: relu(x @ W1 + b1) @ W2 + b2.

    Grid axis 0: row tiles (parallel).  Grid axis 1: d_ff tiles (reduction,
    arbitrary, last).  The (tm, tf) hidden-activation chunk stays in vregs.
    The f32 output block is resident across axis 1 and acts as accumulator.
    """
    j = pl.program_id(1)

    # First matmul chunk on the MXU: (tm, D) @ (D, tf) -> f32, bias + ReLU.
    h = jnp.dot(x_ref[...], w1_ref[...], preferred_element_type=jnp.float32)
    h = jnp.maximum(h + b1_ref[...], 0.0)
    # TODO(synk): nn.Dropout is stochastic; treated as identity (eval mode).

    # Second matmul chunk: (tm, tf) @ (tf, D) -> (tm, D) partial sum.
    part = jnp.dot(h.astype(jnp.bfloat16), w2_ref[...],
                   preferred_element_type=jnp.float32)

    @pl.when(j == 0)
    def _():
        o_ref[...] = b2_ref[...] + part          # fold bias into the init

    @pl.when(j > 0)
    def _():
        o_ref[...] += part


# ------------------------------- wrapper ------------------------------------

def _pick_tile(dim, candidates, min_tiles=1):
    """Largest candidate dividing `dim`, preferring >= min_tiles tiles."""
    for c in candidates:
        if dim % c == 0 and dim // c >= min_tiles:
            return c
    for c in candidates:
        if dim % c == 0:
            return c
    return dim  # full extent (always legal: block == full array dim)


def ffn(x, w1, b1, w2, b2, *, tm=None, tf=None):
    """FFN forward.  x: (..., D), w1: (D, F), b1: (F,), w2: (F, D), b2: (D,)."""
    orig_shape = x.shape
    D, F = w1.shape
    assert w2.shape == (F, D)
    M = int(x.size) // D
    x2 = x.reshape(M, D)

    # Row tile: big, but prefer >=2 tiles so the parallel axis can shard across
    # v7x's two TensorCores.
    tm = tm or _pick_tile(M, (512, 256, 128, 64, 32, 16, 8), min_tiles=2)
    # d_ff tile: fewer reduction steps (less per-step overhead) while keeping
    # double-buffered weight tiles a few MiB.
    tf = tf or _pick_tile(F, (1024, 512, 256, 128))

    # bf16 inputs halve HBM/VMEM traffic and double MXU rate; accumulate f32.
    xb = x2.astype(jnp.bfloat16)
    w1b = w1.astype(jnp.bfloat16)
    w2b = w2.astype(jnp.bfloat16)
    b1r = b1.reshape(1, F).astype(jnp.float32)
    b2r = b2.reshape(1, D).astype(jnp.float32)

    out = pl.pallas_call(
        _ffn_kernel,
        out_shape=jax.ShapeDtypeStruct((M, D), jnp.float32),
        grid=(M // tm, F // tf),
        in_specs=[
            pl.BlockSpec((tm, D), lambda i, j: (i, 0)),   # x row tile (resident over j)
            pl.BlockSpec((D, tf), lambda i, j: (0, j)),   # W1 column tile
            pl.BlockSpec((1, tf), lambda i, j: (0, j)),   # b1 tile
            pl.BlockSpec((tf, D), lambda i, j: (j, 0)),   # W2 row tile
            pl.BlockSpec((1, D), lambda i, j: (0, 0)),    # b2
        ],
        out_specs=pl.BlockSpec((tm, D), lambda i, j: (i, 0)),  # resident accumulator
        compiler_params=pltpu.CompilerParams(
            dimension_semantics=("parallel", "arbitrary")),
    )(xb, w1b, b1r, w2b, b2r)
    return out.reshape(orig_shape)


# ---------------------------------- main ------------------------------------

if __name__ == "__main__":
    # TransformerConfig defaults for the feature dims (lane-dense / 128-aligned),
    # small batch/seq.
    B, L = 2, 128
    D_MODEL, D_FF = 512, 2048

    key = jax.random.PRNGKey(0)
    kx, k1, k2, k3, k4 = jax.random.split(key, 5)

    x = jax.random.normal(kx, (B, L, D_MODEL), dtype=jnp.float32)

    # nn.Linear default init: U(-1/sqrt(fan_in), 1/sqrt(fan_in)); weights kept
    # pre-transposed as (in_features, out_features).
    bound1 = 1.0 / math.sqrt(D_MODEL)
    w1 = jax.random.uniform(k1, (D_MODEL, D_FF), minval=-bound1, maxval=bound1,
                            dtype=jnp.float32)
    b1 = jax.random.uniform(k2, (D_FF,), minval=-bound1, maxval=bound1,
                            dtype=jnp.float32)
    bound2 = 1.0 / math.sqrt(D_FF)
    w2 = jax.random.uniform(k3, (D_FF, D_MODEL), minval=-bound2, maxval=bound2,
                            dtype=jnp.float32)
    b2 = jax.random.uniform(k4, (D_MODEL,), minval=-bound2, maxval=bound2,
                            dtype=jnp.float32)

    out = ffn(x, w1, b1, w2, b2)
    out = jax.block_until_ready(out)

    # Pure-JAX reference (f32); kernel uses bf16 matmul inputs with f32 acc.
    ref = (jnp.maximum(x.reshape(-1, D_MODEL) @ w1 + b1, 0.0) @ w2 + b2)
    ref = ref.reshape(B, L, D_MODEL)
    rel_err = float(jnp.max(jnp.abs(out - ref)) / (jnp.max(jnp.abs(ref)) + 1e-6))

    assert out.shape == (B, L, D_MODEL) and out.dtype == jnp.float32
    assert bool(jnp.all(jnp.isfinite(out)))
    assert rel_err < 7.5e-2, rel_err
    print("KERNEL_OK")
</pallas_src>

<mosaic_0001>
module attributes {stable_mosaic.version = 11 : i64} {
  func.func @_ffn_kernel(%arg0: i32, %arg1: i32, %arg2: memref<128x512xbf16, #tpu.memory_space<vmem>>, %arg3: memref<512x1024xbf16, #tpu.memory_space<vmem>>, %arg4: memref<1x1024xf32, #tpu.memory_space<vmem>>, %arg5: memref<1024x512xbf16, #tpu.memory_space<vmem>>, %arg6: memref<1x512xf32, #tpu.memory_space<vmem>>, %arg7: memref<128x512xf32, #tpu.memory_space<vmem>>) attributes {dimension_semantics = [#tpu.dimension_semantics<parallel>, #tpu.dimension_semantics<arbitrary>], iteration_bounds = array<i64: 2, 2>, scalar_prefetch = 0 : i64, scratch_operands = 0 : i64, tpu.core_type = #tpu.core_type<tc>, window_params = [{transform_indices = @transform_0, window_bounds = array<i64: 128, 512>}, {transform_indices = @transform_1, window_bounds = array<i64: 512, 1024>}, {transform_indices = @transform_2, window_bounds = array<i64: 1, 1024>}, {transform_indices = @transform_3, window_bounds = array<i64: 1024, 512>}, {pipeline_mode = #tpu.pipeline_mode<synchronous>, transform_indices = @transform_4, window_bounds = array<i64: 1, 512>}, {transform_indices = @transform_5, window_bounds = array<i64: 128, 512>}]} {
    %c0 = arith.constant 0 : index
    %c0_0 = arith.constant 0 : index
    %0 = vector.load %arg2[%c0, %c0_0] : memref<128x512xbf16, #tpu.memory_space<vmem>>, vector<128x512xbf16>
    %c0_1 = arith.constant 0 : index
    %c0_2 = arith.constant 0 : index
    %1 = vector.load %arg3[%c0_1, %c0_2] : memref<512x1024xbf16, #tpu.memory_space<vmem>>, vector<512x1024xbf16>
    %cst = arith.constant dense<0.000000e+00> : vector<128x1024xf32>
    %2 = tpu.matmul %0, %1, %cst {dimension_numbers = #tpu.dot_dimension_numbers<[1], [0], [0], [1], [0, 0, 1, 1], [], []>} : vector<128x512xbf16>, vector<512x1024xbf16>, vector<128x1024xf32> -> vector<128x1024xf32>
    %c0_3 = arith.constant 0 : index
    %c0_4 = arith.constant 0 : index
    %3 = vector.load %arg4[%c0_3, %c0_4] : memref<1x1024xf32, #tpu.memory_space<vmem>>, vector<1x1024xf32>
    %4 = vector.broadcast %3 : vector<1x1024xf32> to vector<128x1024xf32>
    %5 = arith.addf %2, %4 : vector<128x1024xf32>
    %cst_5 = arith.constant 0.000000e+00 : f32
    %6 = vector.broadcast %cst_5 : f32 to vector<128x1024xf32>
    %7 = arith.maximumf %5, %6 : vector<128x1024xf32>
    %8 = arith.truncf %7 : vector<128x1024xf32> to vector<128x1024xbf16>
    %c0_6 = arith.constant 0 : index
    %c0_7 = arith.constant 0 : index
    %9 = vector.load %arg5[%c0_6, %c0_7] : memref<1024x512xbf16, #tpu.memory_space<vmem>>, vector<1024x512xbf16>
    %cst_8 = arith.constant dense<0.000000e+00> : vector<128x512xf32>
    %10 = tpu.matmul %8, %9, %cst_8 {dimension_numbers = #tpu.dot_dimension_numbers<[1], [0], [0], [1], [0, 0, 1, 1], [], []>} : vector<128x1024xbf16>, vector<1024x512xbf16>, vector<128x512xf32> -> vector<128x512xf32>
    %c0_i32 = arith.constant 0 : i32
    %11 = arith.cmpi eq, %arg1, %c0_i32 : i32
    %12 = arith.extui %11 : i1 to i32
    %c0_i32_9 = arith.constant 0 : i32
    %13 = arith.cmpi ne, %12, %c0_i32_9 : i32
    scf.if %13 {
      %c0_12 = arith.constant 0 : index
      %c0_13 = arith.constant 0 : index
      %17 = vector.load %arg6[%c0_12, %c0_13] : memref<1x512xf32, #tpu.memory_space<vmem>>, vector<1x512xf32>
      %18 = vector.broadcast %17 : vector<1x512xf32> to vector<128x512xf32>
      %19 = arith.addf %18, %10 : vector<128x512xf32>
      %c0_14 = arith.constant 0 : index
      %c0_15 = arith.constant 0 : index
      %20 = vector.load %arg7[%c0_14, %c0_15] : memref<128x512xf32, #tpu.memory_space<vmem>>, vector<128x512xf32>
      tpu.vector_store %arg7[%c0_14, %c0_15], %19 {strides = array<i32>} : memref<128x512xf32, #tpu.memory_space<vmem>>, vector<128x512xf32>,
    } else {
    }
    %c0_i32_10 = arith.constant 0 : i32
    %14 = arith.cmpi sgt, %arg1, %c0_i32_10 : i32
    %15 = arith.extui %14 : i1 to i32
    %c0_i32_11 = arith.constant 0 : i32
    %16 = arith.cmpi ne, %15, %c0_i32_11 : i32
    scf.if %16 {
      %c0_12 = arith.constant 0 : index
      %c0_13 = arith.constant 0 : index
      %17 = vector.load %arg7[%c0_12, %c0_13] : memref<128x512xf32, #tpu.memory_space<vmem>>, vector<128x512xf32>
      %18 = arith.addf %17, %10 : vector<128x512xf32>
      %c0_14 = arith.constant 0 : index
      %c0_15 = arith.constant 0 : index
      %19 = vector.load %arg7[%c0_14, %c0_15] : memref<128x512xf32, #tpu.memory_space<vmem>>, vector<128x512xf32>
      tpu.vector_store %arg7[%c0_14, %c0_15], %18 {strides = array<i32>} : memref<128x512xf32, #tpu.memory_space<vmem>>, vector<128x512xf32>,
    } else {
    }
    return
  }
  func.func @transform_0(%arg0: i32, %arg1: i32) -> (i32, i32) {
    %c0_i32 = arith.constant 0 : i32
    %c0_i32_0 = arith.constant 0 : i32
    return %arg0, %c0_i32 : i32, i32
  }
  func.func @transform_1(%arg0: i32, %arg1: i32) -> (i32, i32) {
    %c0_i32 = arith.constant 0 : i32
    %c0_i32_0 = arith.constant 0 : i32
    return %c0_i32, %arg1 : i32, i32
  }
  func.func @transform_2(%arg0: i32, %arg1: i32) -> (i32, i32) {
    %c0_i32 = arith.constant 0 : i32
    %c0_i32_0 = arith.constant 0 : i32
    return %c0_i32, %arg1 : i32, i32
  }
  func.func @transform_3(%arg0: i32, %arg1: i32) -> (i32, i32) {
    %c0_i32 = arith.constant 0 : i32
    %c0_i32_0 = arith.constant 0 : i32
    return %arg1, %c0_i32 : i32, i32
  }
  func.func @transform_4(%arg0: i32, %arg1: i32) -> (i32, i32) {
    %c0_i32 = arith.constant 0 : i32
    %c0_i32_0 = arith.constant 0 : i32
    %c0_i32_1 = arith.constant 0 : i32
    return %c0_i32, %c0_i32_0 : i32, i32
  }
  func.func @transform_5(%arg0: i32, %arg1: i32) -> (i32, i32) {
    %c0_i32 = arith.constant 0 : i32
    %c0_i32_0 = arith.constant 0 : i32
    return %arg0, %c0_i32 : i32, i32
  }
}

</mosaic_0001>

<bundles_post_ra>
// kernel: tpu_custom_call.1
= control target key start
LH: loop header
LB: loop body
LE: loop exit
PB: predicated region body
PF: predicated region fallthrough
CT: control target
= control target key end

     0   :  { %s10463_s0 = inlined_call_operand.hbm [shape: bf16[256,512], index: 0, kind: input, shape index: {}]   ;;  %s10464_s1 = inlined_call_operand.hbm [shape: bf16[512,2048], index: 1, kind: input, shape index: {}]   ;;  %s10465_s2 = inlined_call_operand.hbm [shape: f32[1,2048], index: 2, kind: input, shape index: {}]   ;;  %s10466_s3 = inlined_call_operand.hbm [shape: bf16[2048,512], index: 3, kind: input, shape index: {}]   ;;  %s10467_s4 = inlined_call_operand.hbm [shape: f32[1,512], index: 4, kind: input, shape index: {}]   ;;  %s10468_s5 = inlined_call_operand.hbm [shape: f32[256,512], index: 5, kind: output, shape index: {}]  }
   0x1   :  { %10502 = sst [smem:[#allocation58_spill]] %s10463_s0 }
   0x2   :  { %10503 = sst [smem:[#allocation59_spill]] %s10464_s1 }
   0x3   :  { %10504 = sst [smem:[#allocation60_spill]] %s10467_s4 }
   0x4   :  { %10505 = sst [smem:[#allocation61_spill]] %s10468_s5 }
   0x5   :  { %10 = vsyncpa [#allocation3], 0 }
   0x6   :  { %12 = vsyncpa [#allocation3 + $0x1], 0 }
   0x7   :  { %13 = vsyncpa [#allocation6], 0 }
   0x8   :  { %15 = vsyncpa [#allocation6 + $0x1], 0 }
   0x9   :  { %16 = vsyncpa [#allocation9], 0 }
   0xa   :  { %18 = vsyncpa [#allocation9 + $0x1], 0 }
   0xb   :  { %19 = vsyncpa [#allocation4], 0 }
   0xc   :  { %21 = vsyncpa [#allocation4 + $0x1], 0  ;;  %s7720_s18 = smov 0   ;;  %s7722_s19 = smov 0  }
   0xd   :  { %s7724_s20 = smov 0   ;;  %s7726_s21 = smov 0  }
   0xe   :  { %s7728_s22 = smov 0   ;;  %s7730_s23 = smov 0  }
   0xf   :  { %s7732_s24 = smov 0   ;;  %s7734_s25 = smov 0  }
  0x10   :  { %s7736_s26 = smov 0   ;;  %s7738_s27 = smov 0  }
  0x11   :  { %s7740_s28 = smov 0  }
  0x12 LB: > { %10506 = sst [smem:[#allocation17_spill]] %s7639_s19  ;;  %s7774_s29 = sadd.s32 4294967295, %s7675_s28   ;;  %s7675_s28 = sphi %s7740_s28, %s27_s28   ;;  %s7671_s27 = sphi %s7738_s27, %s10692_s27   ;;  %s7667_s26 = sphi %s7736_s26, %s10699_s26   ;;  %s7663_s25 = sphi %s7734_s25, %s10690_s25   ;;  %s7659_s24 = sphi %s7732_s24, %s10698_s24   ;;  %s7655_s23 = sphi %s7730_s23, %s10697_s23   ;;  %s7651_s22 = sphi %s7728_s22, %s10696_s22   ;;  %s7647_s21 = sphi %s7726_s21, %s10695_s21   ;;  %s7643_s20 = sphi %s7724_s20, %s10694_s20   ;;  %s7639_s19 = sphi %s7722_s19, %s10693_s19   ;;  %s7635_s18 = sphi %s7720_s18, %s10688_s18  }
  0x13   : > { %10507 = sst [smem:[#allocation18_spill]] %s7647_s21  ;;  %s6220_s30 = sadd.s32 4294967294, %s7675_s28  }
  0x14   : > { %10508 = sst [smem:[#allocation19_spill]] %s7659_s24  ;;  %p53_p0 = scmp.ne.s32.totalorder %s7655_s23, %s7651_s22 }
  0x15   : > { %10509 = sst [smem:[#allocation20_spill]] %s7663_s25  ;;  %p54_p1 = scmp.eq.s32.totalorder %s7675_s28, 0 }
  0x16   : > { %10510 = sst [smem:[#allocation21_spill]] %s7671_s27  ;;  %p59_p2 = scmp.ne.s32.totalorder %s7651_s22, %s7647_s21 }
  0x17   : > { %p60_p3 = scmp.eq.s32.totalorder %s7774_s29, 0  ;;  %p7788_p4 = por %p54_p1, %p53_p0 }
  0x18   : > { %p79_p5 = scmp.ne.s32.totalorder %s7643_s20, %s7639_s19  ;;  %p85_p7 = scmp.ne.s32.totalorder %s7639_s19, %s7635_s18 }
  0x19   : > { %s10511_s8 = scalar_select %p7788_p4, 1, 0 }
  0x1a   : > { %p7799_p6 = por %p60_p3, %p59_p2  ;;  %p7804_p8 = por %p79_p5, %p54_p1 }
  0x1b   : > { %p182_p9 = scmp.eq.s32.totalorder %s7774_s29, 3  ;;  %p7811_p10 = por %p85_p7, %p60_p3 }
  0x1c   : > { %s10512_s9 = scalar_select %p7799_p6, 1, 0 }
  0x1d   : > { %s10514_s11 = scalar_select %p7811_p10, 1, 0 }
  0x1e   : > { %p188_p11 = scmp.eq.s32.totalorder %s6220_s30, 3  ;;  %p7818_p12 = por %p182_p9, %p53_p0 }
  0x1f   : > { %10515 = sst [smem:[#allocation22_spill]] %s10514_s11  ;;  %p6221_p13 = scmp.ge.s32.totalorder %s7675_s28, 1 }
  0x20   : > { %s10516_s12 = scalar_select %p7818_p12, 1, 0 }
  0x21   : > { %p7826_p1 = por %p188_p11, %p59_p2  ;;  %p195_p5 = scmp.lt.s32.totalorder %s7675_s28, 5 }
  0x22   : > { %10517 = sst [smem:[#allocation23_spill]] %s10516_s12  ;;  %s7677_s15 = smov [#allocation10]  }
  0x23   : > { %s10518_s13 = scalar_select %p7826_p1, 1, 0 }
  0x24   : > { %p7831_p6 = pnand %p6221_p13, %p195_p5  ;;  %s208_s16 = sshll.u32 %s7677_s15, 4  ;;  %s209_s16 = int_to_ptr.vmem [resolvable:$true] %s208_s16 }
  0x25   : > { %10519 = sst [smem:[#allocation24_spill]] %s10518_s13  ;;  %p6841_p7 = scmp.lt.s32.totalorder %s7675_s28, 4 }
  0x26   : > { %s10520_s14 = scalar_select %p7831_p6, 1, 0 }
  0x27   : > { %p6819_p0 = pneg %p7831_p6  ;;  %p7845_p2 = pnand %p6841_p7, %p7804_p8 }
  0x28   : > { %s7416_s30 = scalar_lea.vmem %s209_s16, 64  ;;  %p7424_p12 = scmp.lt.s32.totalorder %s209_s16, %s209_s16 }
  0x29   : > { %p6820_p9 = pnand %p6819_p0, %p60_p3  ;;  %p7417_p13 = scmp.ne.s32.totalorder %s209_s16, %s7416_s30 }
  0x2a   : > { %p7425_p10 = scmp.lt.s32.totalorder %s7416_s30, %s7416_s30 }
  0x2b   : > { %p7407_p11 = pneg %p6820_p9 }
  0x2c   : > { %p7426_p4 = por %p7425_p10, %p7424_p12 }
  0x2d   : > { %p7419_p5 = pnand %p7417_p13, %p7407_p11 }
  0x2f   : > { %p7420_p1 = pneg %p7419_p5 }
  0x31   : > { %p7427_p6 = pnand %p7426_p4, %p7420_p1 }
  0x33   : > { %7430 = shalt.err (!%p7427_p6)
}
  0x34   : > { %s10522_s4 = sld [smem:[#allocation60_spill]]  ;;  %s10478_s10 = sand.u32 1, %s7643_s20  }
  0x35   : > { %s6799_s7 = sshll.u32 %s7667_s26, 9  ;;  %s7856_s17 = sshll.u32 %s10478_s10, 11 }
  0x36   : > { %s10523_s1 = sld [smem:[#allocation59_spill]]  ;;  %s245_s5 = scalar_lea.vmem [#allocation5], %s7856_s17 }
  0x37   : > { %s252_s12 = sshll.u32 %s245_s5, 4  ;;  %s10524_s6 = sand.u32 1, %s7675_s28   ;;  %s253_s12 = int_to_ptr.vmem [resolvable:$true] %s252_s12 }
  0x38   : > { %s7864_s15 = scalar_lea.sflag [#allocation6], %s10524_s6  ;;  %p7433_p4 = pneg %p7845_p2 }
  0x39   : > { %s7444_s25 = scalar_lea.vmem %s253_s12, 32768 }
  0x3a   : > { %6822 = dma.hbm_to_vmem [thread:$0]  (!%p6820_p9), %s10522_s4, 64, %s209_s16, [#allocation9]  }
  0x3b   : > { %p7445_p6 = scmp.ne.s32.totalorder %s253_s12, %s7444_s25  ;;  %s7678_s16 = smov [#allocation5]  }
  0x3c   : > { %s251_s21 = scalar_lea.hbm %s10523_s1, %s6799_s7  ;;  %s7449_s10 = sshll.u32 %s7678_s16, 4  ;;  %s7450_s10 = int_to_ptr.vmem [resolvable:$false] %s7449_s10 }
  0x3d   : > { %p7447_p8 = pnand %p7445_p6, %p7433_p4  ;;  %s7451_s13 = scalar_lea.vmem %s7450_s10, 65536 }
  0x3e   : > { %p7452_p12 = scmp.lt.s32.totalorder %s253_s12, %s7450_s10  ;;  %p7453_p1 = scmp.lt.s32.totalorder %s7451_s13, %s7444_s25 }
  0x3f   : > { %p7448_p10 = pneg %p7447_p8 }
  0x40   : > { %p7454_p0 = por %p7453_p1, %p7452_p12 }
  0x42   : > { %p7455_p9 = pnand %p7454_p0, %p7448_p10 }
  0x44   : > { %7458 = shalt.err (!%p7455_p9)
}
  0x45   : > { %s7679_s5 = smov 1024   ;;  %s7680_s7 = smov 512  }
  0x46   : > { %s7681_s30 = smov 32   ;;  %s36_s25 = sadd.s32 1, %s7667_s26 }
  0x47   : > { %6829 = dma.hbm_to_vmem [thread:$0]  (!%p7845_p2), %s251_s21, 32768, %s253_s12, %s7864_s15, %s7679_s5, %s7680_s7, %s7681_s30  }
  0x48   : > { %p37_p11 = scmp.ge.s32.totalorder %s36_s25, 2  ;;  %s39_s10 = sadd.s32 1, %s7671_s27 }
  0x49   : > { %s219_s6 = sand.u32 1, %s7655_s23   ;;  %s6798_s1 = sshll.u32 %s7671_s27, 12 }
  0x4a   : > { %s10701_s25 = smov (%p37_p11, %s36_s25), 0  ;;  %s10703_s10 = smov (!%p37_p11, %s39_s10), %s7671_s27 }
  0x4b   : > { %10525 = sst [smem:[#allocation25_spill]] %s10701_s25  ;;  %s69_s16 = ssub.s32 %s7667_s26, %s10701_s25 }
  0x4c   : > { %p41_p13 = scmp.ge.s32.totalorder %s10703_s10, 2  ;;  %p70_p5 = scmp.eq.s32.totalorder %s69_s16, 0 }
  0x4d   : > { %s6224_s13 = sshll.u32 %s219_s6, 8  ;;  %s10527_s21 = sadd.s32 1, %s7643_s20 }
  0x4e   : > { %s10705_s10 = smov (%p41_p13, %s10703_s10), 0  ;;  %s10528_s0 = sld [smem:[#allocation58_spill]] }
  0x4f   : > { %10526 = sst [smem:[#allocation26_spill]] %s10705_s10  ;;  %s43_s5 = ssub.s32 %s7671_s27, %s10705_s10 }
  0x50   : > { %s7888_s12 = scalar_select %p70_p5, %s7643_s20, %s10527_s21  }
  0x51   : > { %p44_p6 = scmp.eq.s32.totalorder %s43_s5, 0  ;;  %s223_s24 = scalar_lea.vmem [#allocation2], %s6224_s13 }
  0x52   : > { %s231_s11 = sshll.u32 %s223_s24, 4  ;;  %p10529_p8 = scmp.ne.s32.totalorder %s10511_s8, 0  ;;  %s232_s11 = int_to_ptr.vmem [resolvable:$true] %s231_s11 }
  0x53   : > { %s10531_s25 = sadd.s32 1, %s7655_s23  ;;  %s220_s21 = scalar_lea.sflag [#allocation3], %s219_s6 }
  0x54   : > { %s230_s4 = scalar_lea.hbm %s10528_s0, %s6798_s1  ;;  %p7899_p10 = pnand %p6841_p7, %p10529_p8 }
  0x55   : > { %s7906_s19 = scalar_select %p44_p6, %s7655_s23, %s10531_s25  }
  0x56   : > { %p7461_p12 = pneg %p7899_p10  ;;  %s7472_s5 = scalar_lea.vmem %s232_s11, 4096 }
  0x57   : > { %p7473_p1 = scmp.ne.s32.totalorder %s232_s11, %s7472_s5  ;;  %s7682_s1 = smov [#allocation2]  }
  0x58   : > { %s7477_s24 = sshll.u32 %s7682_s1, 4  ;;  %s7478_s24 = int_to_ptr.vmem [resolvable:$false] %s7477_s24 }
  0x59   : > { %p7475_p0 = pnand %p7473_p1, %p7461_p12  ;;  %s7479_s8 = scalar_lea.vmem %s7478_s24, 8192 }
  0x5a   : > { %p7480_p7 = scmp.lt.s32.totalorder %s232_s11, %s7478_s24  ;;  %p7481_p11 = scmp.lt.s32.totalorder %s7479_s8, %s7472_s5 }
  0x5b   : > { %p7476_p9 = pneg %p7475_p0 }
  0x5c   : > { %p7482_p13 = por %p7481_p11, %p7480_p7 }
  0x5e   : > { %p7483_p5 = pnand %p7482_p13, %p7476_p9 }
  0x60   : > { %7486 = shalt.err (!%p7483_p5)
}
  0x61   : > { %s7683_s13 = smov 256   ;;  %s7684_s25 = smov 16  }
  0x62   : > { %6826 = dma.hbm_to_vmem [thread:$0]  (!%p7899_p10), %s230_s4, 4096, %s232_s11, %s220_s21, %s7683_s13, %s7683_s13, %s7684_s25  }
  0x63   : > { %s10532_s6 = sand.u32 1, %s7643_s20   ;;  %s6800_s30 = sshll.u32 %s7667_s26, 7 }
  0x64   : > { %s6231_s7 = sshll.u32 %s10532_s6, 3  ;;  %s272_s5 = scalar_lea.hbm %s10465_s2, %s6800_s30 }
  0x65   : > { %s266_s8 = scalar_lea.vmem [#allocation7], %s6231_s7  ;;  %s7685_s16 = smov [#allocation7]  }
  0x66   : > { %s274_s0 = sshll.u32 %s266_s8, 4  ;;  %s7505_s27 = sshll.u32 %s7685_s16, 4  ;;  %s275_s0 = int_to_ptr.vmem [resolvable:$true] %s274_s0  ;;  %s7506_s27 = int_to_ptr.vmem [resolvable:$false] %s7505_s27 }
  0x67   : > { %s7500_s10 = scalar_lea.vmem %s275_s0, 128  ;;  %s7507_s4 = scalar_lea.vmem %s7506_s27, 256 }
  0x68   : > { %p7501_p6 = scmp.ne.s32.totalorder %s275_s0, %s7500_s10  ;;  %p7508_p10 = scmp.lt.s32.totalorder %s275_s0, %s7506_s27 }
  0x69   : > { %p7509_p1 = scmp.lt.s32.totalorder %s7507_s4, %s7500_s10 }
  0x6a   : > { %p7503_p8 = pnand %p7501_p6, %p7433_p4 }
  0x6b   : > { %p7510_p0 = por %p7509_p1, %p7508_p10 }
  0x6c   : > { %p7504_p12 = pneg %p7503_p8 }
  0x6e   : > { %p7511_p9 = pnand %p7510_p0, %p7504_p12 }
  0x70   : > { %7514 = shalt.err (!%p7511_p9)
}
  0x71   : > { %6832 = dma.hbm_to_vmem [thread:$0]  (!%p7845_p2), %s272_s5, 128, %s275_s0, %s7864_s15  }
  0x72   : > { %s6802_s11 = sshll.u32 %s7667_s26, 15  ;;  %s285_s21 = scalar_lea.vmem [#allocation8], %s7856_s17 }
  0x73   : > { %s293_s6 = sshll.u32 %s285_s21, 4  ;;  %s292_s1 = scalar_lea.hbm %s10466_s3, %s6802_s11  ;;  %s294_s6 = int_to_ptr.vmem [resolvable:$true] %s293_s6 }
  0x74   : > { %s10533_s27 = sand.u32 1, %s7675_s28   ;;  %s7528_s24 = scalar_lea.vmem %s294_s6, 32768 }
  0x75   : > { %s282_s10 = scalar_lea.sflag [#allocation9], %s10533_s27  ;;  %p7529_p7 = scmp.ne.s32.totalorder %s294_s6, %s7528_s24 }
  0x76   : > { %s7686_s8 = smov [#allocation8]  }
  0x77   : > { %p7531_p11 = pnand %p7529_p7, %p7433_p4  ;;  %s7533_s16 = sshll.u32 %s7686_s8, 4  ;;  %s7534_s16 = int_to_ptr.vmem [resolvable:$false] %s7533_s16 }
  0x78   : > { %s7535_s0 = scalar_lea.vmem %s7534_s16, 65536  ;;  %p7536_p5 = scmp.lt.s32.totalorder %s294_s6, %s7534_s16 }
  0x79   : > { %p7532_p13 = pneg %p7531_p11  ;;  %p7537_p6 = scmp.lt.s32.totalorder %s7535_s0, %s7528_s24 }
  0x7b   : > { %p7538_p8 = por %p7537_p6, %p7536_p5 }
  0x7d   : > { %p7539_p12 = pnand %p7538_p8, %p7532_p13 }
  0x7f   : > { %7542 = shalt.err (!%p7539_p12)
}
  0x80   : > { %6835 = dma.hbm_to_vmem [thread:$0]  (!%p7845_p2), %s292_s1, 32768, %s294_s6, %s282_s10, %s7683_s13, %s7683_s13, %s7684_s25  }
  0x81   : > { %p10534_p10 = scmp.ne.s32.totalorder %s10520_s14, 0 }
  0x83   : > { %305 = sbr.rel (%p10534_p10) target bundleno = 1131 (0x46b), region = 40 }
  0x88   : > { %s7945_s17 = sand.u32 1, %s7651_s22   ;;  %p10535_p4 = scmp.ne.s32.totalorder %s10512_s9, 0 }
  0x89   : > { %s6239_s15 = sshll.u32 %s7945_s17, 8  ;;  %s308_s5 = scalar_lea.sflag [#allocation3], %s7945_s17 }
  0x8a   : > { %s7949_s4 = scalar_lea.vmem [#allocation2], %s6239_s15 }
  0x8b   : > { %7614 = dma.done.wait (%p10535_p4), %s308_s5, 4096  }
  0x8c   : > { %7616 = vsyncadd (%p10535_p4), %s308_s5, 4294963200  ;;  %s10536_s18 = sld [smem:[#allocation17_spill]]  ;;  %s316_s14 = sand.u32 1, %s7774_s29  }
  0x8d   : > { %s10537_s13 = sld [smem:[#allocation22_spill]]  ;;  %s317_s21 = scalar_lea.sflag [#allocation6], %s316_s14 }
  0x92   : > { %s318_s25 = sand.u32 1, %s10536_s18  }
  0x93   : > { %s6240_s11 = sshll.u32 %s318_s25, 11  ;;  %p10538_p2 = scmp.ne.s32.totalorder %s10537_s13, 0 }
  0x94   : > { %s7957_s6 = scalar_lea.vmem [#allocation5], %s6240_s11 }
  0x95   : > { %7618 = dma.done.wait (%p10538_p2), %s317_s21, 32896  }
  0x96   : > { %7620 = vsyncadd (%p10538_p2), %s317_s21, 4294934400  ;;  %s7963_s7 = sshll.u32 %s318_s25, 3  ;;  %s335_s30 = scalar_lea.sflag [#allocation9], %s316_s14 }
  0x97   : > { %s329_s9 = scalar_lea.vmem [#allocation7], %s7963_s7  ;;  %s7966_s1 = scalar_lea.vmem [#allocation8], %s6240_s11 }
  0x98   : > { %7622 = dma.done.wait (%p10538_p2), %s335_s30, 32768  }
  0x99   : > { %7624 = vsyncadd (%p10538_p2), %s335_s30, 4294934528 }
  0x9a   : > { %7626 = dma.done.wait (%p60_p3), [#allocation9], 64  }
  0x9b   : > { %7628 = vsyncadd (%p60_p3), [#allocation9], 4294967232  ;;  %s6244_s27 = sshll.u32 %s7945_s17, 9  ;;  %v477_v0 = vld [vmem:[%s7957_s6 + $0x1c0] sm:$0xff]  ;;  %v8013_v59 = vld [vmem:[%s7949_s4 + $0xc] ss:$16 sps:$4 sm:$0xff]  }
  0x9c   : > { %v481_v1 = vld [vmem:[%s7957_s6 + $0x1e0] sm:$0xff]  ;;  %2304 = vmatprep.mubr.bf16.mxu1 %v8013_v59  ;;  %s9990_s29 = scalar_lea.vmem [#allocation11], %s6244_s27  ;;  %s10614_s10 = sld [smem:[#allocation19_spill]] }
  0x9d   : > { %v605_v2 = vld [vmem:[%s7957_s6 + $0x5c0] sm:$0xff]  ;;  %v6334_v3 = vcombine.high %v477_v0, %v481_v1  ;;  %v6333_v5 = vcombine.low %v477_v0, %v481_v1 }
  0x9e   : > { %v609_v4 = vld [vmem:[%s7957_s6 + $0x5e0] sm:$0xff] }
  0x9f   : > { %v469_v6 = vld [vmem:[%s7957_s6 + $0x180] sm:$0xff]  ;;  %v6462_v8 = vcombine.high %v605_v2, %v609_v4  ;;  %v6461_v9 = vcombine.low %v605_v2, %v609_v4  ;;  %2159 = vmatprep.subr.bf16.mxu0 %v6334_v3 }
  0xa0   : > { %v473_v7 = vld [vmem:[%s7957_s6 + $0x1a0] sm:$0xff]  ;;  %2160 = vmatpush1.bf16.msra.mxu0 %v6333_v5 }
  0xa1   : > { %v6326_v10 = vcombine.high %v469_v6, %v473_v7  ;;  %v597_v11 = vld [vmem:[%s7957_s6 + $0x580] sm:$0xff]  ;;  %2272 = vmatprep.subr.bf16.mxu1 %v6462_v8  ;;  %v6325_v18 = vcombine.low %v469_v6, %v473_v7 }
  0xa2   : > { %v601_v12 = vld [vmem:[%s7957_s6 + $0x5a0] sm:$0xff]  ;;  %2273 = vmatpush1.bf16.msra.mxu1 %v6461_v9  ;;  %p6789_p3 = scmp.ne.s32.totalorder %s10614_s10, 0 }
  0xa3   : > { %v461_v13 = vld [vmem:[%s7957_s6 + $0x140] sm:$0xff]  ;;  %v6454_v14 = vcombine.high %v597_v11, %v601_v12  ;;  %2161 = vmatprep.subr.bf16.mxu0 %v6326_v10  ;;  %v6453_v19 = vcombine.low %v597_v11, %v601_v12 }
  0xa4   : > { %v465_v15 = vld [vmem:[%s7957_s6 + $0x160] sm:$0xff]  ;;  %2162 = vmatpush1.bf16.msra.mxu0 %v6325_v18 }
  0xa5   : > { %v589_v16 = vld [vmem:[%s7957_s6 + $0x540] sm:$0xff]  ;;  %v6318_v20 = vcombine.high %v461_v13, %v465_v15  ;;  %2274 = vmatprep.subr.bf16.mxu1 %v6454_v14  ;;  %v6317_v26 = vcombine.low %v461_v13, %v465_v15 }
  0xa6   : > { %v593_v17 = vld [vmem:[%s7957_s6 + $0x560] sm:$0xff]  ;;  %2275 = vmatpush1.bf16.msra.mxu1 %v6453_v19 }
  0xa7   : > { %v6446_v21 = vcombine.high %v589_v16, %v593_v17  ;;  %v453_v22 = vld [vmem:[%s7957_s6 + $0x100] sm:$0xff]  ;;  %2163 = vmatprep.subr.bf16.mxu0 %v6318_v20  ;;  %v6445_v27 = vcombine.low %v589_v16, %v593_v17 }
  0xa8   : > { %v457_v23 = vld [vmem:[%s7957_s6 + $0x120] sm:$0xff]  ;;  %2164 = vmatpush1.bf16.msra.mxu0 %v6317_v26 }
  0xa9   : > { %v581_v24 = vld [vmem:[%s7957_s6 + $0x500] sm:$0xff]  ;;  %v6310_v28 = vcombine.high %v453_v22, %v457_v23  ;;  %2276 = vmatprep.subr.bf16.mxu1 %v6446_v21  ;;  %v6309_v34 = vcombine.low %v453_v22, %v457_v23 }
  0xaa   : > { %v585_v25 = vld [vmem:[%s7957_s6 + $0x520] sm:$0xff]  ;;  %2277 = vmatpush1.bf16.msra.mxu1 %v6445_v27 }
  0xab   : > { %v6438_v29 = vcombine.high %v581_v24, %v585_v25  ;;  %v445_v30 = vld [vmem:[%s7957_s6 + $0xc0] sm:$0xff]  ;;  %2165 = vmatprep.subr.bf16.mxu0 %v6310_v28  ;;  %v6437_v35 = vcombine.low %v581_v24, %v585_v25 }
  0xac   : > { %v449_v31 = vld [vmem:[%s7957_s6 + $0xe0] sm:$0xff]  ;;  %2166 = vmatpush1.bf16.msra.mxu0 %v6309_v34 }
  0xad   : > { %v573_v32 = vld [vmem:[%s7957_s6 + $0x4c0] sm:$0xff]  ;;  %v6302_v36 = vcombine.high %v445_v30, %v449_v31  ;;  %2278 = vmatprep.subr.bf16.mxu1 %v6438_v29  ;;  %v6301_v42 = vcombine.low %v445_v30, %v449_v31 }
  0xae   : > { %v577_v33 = vld [vmem:[%s7957_s6 + $0x4e0] sm:$0xff]  ;;  %2279 = vmatpush1.bf16.msra.mxu1 %v6437_v35 }
  0xaf   : > { %v6430_v37 = vcombine.high %v573_v32, %v577_v33  ;;  %v437_v38 = vld [vmem:[%s7957_s6 + $0x80] sm:$0xff]  ;;  %2167 = vmatprep.subr.bf16.mxu0 %v6302_v36  ;;  %v6429_v43 = vcombine.low %v573_v32, %v577_v33 }
  0xb0   : > { %v441_v39 = vld [vmem:[%s7957_s6 + $0xa0] sm:$0xff]  ;;  %2168 = vmatpush1.bf16.msra.mxu0 %v6301_v42 }
  0xb1   : > { %v565_v40 = vld [vmem:[%s7957_s6 + $0x480] sm:$0xff]  ;;  %v6294_v44 = vcombine.high %v437_v38, %v441_v39  ;;  %2280 = vmatprep.subr.bf16.mxu1 %v6430_v37  ;;  %v6293_v50 = vcombine.low %v437_v38, %v441_v39 }
  0xb2   : > { %v569_v41 = vld [vmem:[%s7957_s6 + $0x4a0] sm:$0xff]  ;;  %2281 = vmatpush1.bf16.msra.mxu1 %v6429_v43 }
  0xb3   : > { %v6422_v45 = vcombine.high %v565_v40, %v569_v41  ;;  %v429_v46 = vld [vmem:[%s7957_s6 + $0x40] sm:$0xff]  ;;  %2169 = vmatprep.subr.bf16.mxu0 %v6294_v44  ;;  %v6421_v52 = vcombine.low %v565_v40, %v569_v41 }
  0xb4   : > { %v433_v47 = vld [vmem:[%s7957_s6 + $0x60] sm:$0xff]  ;;  %2170 = vmatpush1.bf16.msra.mxu0 %v6293_v50 }
  0xb5   : > { %v557_v48 = vld [vmem:[%s7957_s6 + $0x440] sm:$0xff]  ;;  %v6286_v53 = vcombine.high %v429_v46, %v433_v47  ;;  %2282 = vmatprep.subr.bf16.mxu1 %v6422_v45  ;;  %v6285_v60 = vcombine.low %v429_v46, %v433_v47 }
  0xb6   : > { %v561_v49 = vld [vmem:[%s7957_s6 + $0x460] sm:$0xff]  ;;  %2283 = vmatpush1.bf16.msra.mxu1 %v6421_v52 }
  0xb7   : > { %v421_v51 = vld [vmem:[%s7957_s6] sm:$0xff]  ;;  %v6414_v55 = vcombine.high %v557_v48, %v561_v49  ;;  %2171 = vmatprep.subr.bf16.mxu0 %v6286_v53  ;;  %v6413_v61 = vcombine.low %v557_v48, %v561_v49 }
  0xb8   : > { %v425_v54 = vld [vmem:[%s7957_s6 + $0x20] sm:$0xff]  ;;  %2172 = vmatpush1.bf16.msra.mxu0 %v6285_v60 }
  0xb9   : > { %v8008_v56 = vld [vmem:[%s7949_s4 + $0x4] ss:$16 sps:$4 sm:$0xff]   ;;  %v6278_v62 = vcombine.high %v421_v51, %v425_v54  ;;  %2284 = vmatprep.subr.bf16.mxu1 %v6414_v55  ;;  %v6277_v4 = vcombine.low %v421_v51, %v425_v54 }
  0xba   : > { %v549_v57 = vld [vmem:[%s7957_s6 + $0x400] sm:$0xff]  ;;  %2191 = vmatprep.mubr.bf16.mxu0 %v8008_v56  ;;  %2285 = vmatpush1.bf16.msra.mxu1 %v6413_v61 }
  0xbb   : > { %v553_v58 = vld [vmem:[%s7957_s6 + $0x420] sm:$0xff]  ;;  %2173 = vmatprep.subr.bf16.mxu0 %v6278_v62 }
  0xbc   : > { %v541_v63 = vld [vmem:[%s7957_s6 + $0x3c0] sm:$0xff]  ;;  %v6406_v0 = vcombine.high %v549_v57, %v553_v58  ;;  %v6405_v5 = vcombine.low %v549_v57, %v553_v58  ;;  %2174 = vmatpush1.bf16.msra.mxu0 %v6277_v4  ;;  %v606_v4 = vld [vmem:[%s7957_s6 + $0x5c8] sm:$0xff] }
  0xbd   : > { %v545_v1 = vld [vmem:[%s7957_s6 + $0x3e0] sm:$0xff] }
  0xbe   : > { %v669_v2 = vld [vmem:[%s7957_s6 + $0x7c0] sm:$0xff]  ;;  %v6398_v6 = vcombine.high %v541_v63, %v545_v1  ;;  %2286 = vmatprep.subr.bf16.mxu1 %v6406_v0  ;;  %v6397_v12 = vcombine.low %v541_v63, %v545_v1  ;;  %v478_v1 = vld [vmem:[%s7957_s6 + $0x1c8] sm:$0xff] }
  0xbf   : > { %v673_v3 = vld [vmem:[%s7957_s6 + $0x7e0] sm:$0xff]  ;;  %2287 = vmatpush1.bf16.msra.mxu1 %v6405_v5  ;;  %v610_v5 = vld [vmem:[%s7957_s6 + $0x5e8] sm:$0xff] }
  0xc0   : > { %v6526_v7 = vcombine.high %v669_v2, %v673_v3  ;;  %v533_v8 = vld [vmem:[%s7957_s6 + $0x380] sm:$0xff]  ;;  %2175 = vmatprep.subr.bf16.mxu0 %v6398_v6  ;;  %v6525_v13 = vcombine.low %v669_v2, %v673_v3  ;;  %v482_v3 = vld [vmem:[%s7957_s6 + $0x1e8] sm:$0xff] }
  0xc1   : > { %v537_v9 = vld [vmem:[%s7957_s6 + $0x3a0] sm:$0xff]  ;;  %2176 = vmatpush2.bf16.msra.mxu0 %v6397_v12 }
  0xc2   : > { %v661_v10 = vld [vmem:[%s7957_s6 + $0x780] sm:$0xff]  ;;  %v6390_v14 = vcombine.high %v533_v8, %v537_v9  ;;  %2288 = vmatprep.subr.bf16.mxu1 %v6526_v7  ;;  %v6389_v20 = vcombine.low %v533_v8, %v537_v9  ;;  %v6336_v8 = vcombine.high %v478_v1, %v482_v3  ;;  %v6464_v9 = vcombine.high %v606_v4, %v610_v5 }
  0xc3   : > { %v665_v11 = vld [vmem:[%s7957_s6 + $0x7a0] sm:$0xff]  ;;  %2289 = vmatpush2.bf16.msra.mxu1 %v6525_v13  ;;  %v598_v13 = vld [vmem:[%s7957_s6 + $0x588] sm:$0xff] }
  0xc4   : > { %v6518_v15 = vcombine.high %v661_v10, %v665_v11  ;;  %v525_v16 = vld [vmem:[%s7957_s6 + $0x340] sm:$0xff]  ;;  %2177 = vmatprep.subr.bf16.mxu0 %v6390_v14  ;;  %v6517_v21 = vcombine.low %v661_v10, %v665_v11  ;;  %v470_v10 = vld [vmem:[%s7957_s6 + $0x188] sm:$0xff] }
  0xc5   : > { %v529_v17 = vld [vmem:[%s7957_s6 + $0x360] sm:$0xff]  ;;  %2178 = vmatpush2.bf16.msra.mxu0 %v6389_v20  ;;  %v474_v11 = vld [vmem:[%s7957_s6 + $0x1a8] sm:$0xff] }
  0xc6   : > { %v653_v18 = vld [vmem:[%s7957_s6 + $0x740] sm:$0xff]  ;;  %v6382_v22 = vcombine.high %v525_v16, %v529_v17  ;;  %2290 = vmatprep.subr.bf16.mxu1 %v6518_v15  ;;  %v6381_v28 = vcombine.low %v525_v16, %v529_v17  ;;  %v602_v14 = vld [vmem:[%s7957_s6 + $0x5a8] sm:$0xff]  ;;  %v6335_v16 = vcombine.low %v478_v1, %v482_v3  ;;  %v6463_v17 = vcombine.low %v606_v4, %v610_v5 }
  0xc7   : > { %v657_v19 = vld [vmem:[%s7957_s6 + $0x760] sm:$0xff]  ;;  %2291 = vmatpush2.bf16.msra.mxu1 %v6517_v21  ;;  %v8061_v15 = vld [vmem:[%s7949_s4 + $0x8] ss:$16 sps:$4 sm:$0xff]   ;;  %v8118_v1 = vld [vmem:[%s7949_s4 + $0x6c] ss:$16 sps:$4 sm:$0xff]  }
  0xc8   : > { %v517_v23 = vld [vmem:[%s7957_s6 + $0x300] sm:$0xff]  ;;  %v6510_v24 = vcombine.high %v653_v18, %v657_v19  ;;  %2179 = vmatprep.subr.bf16.mxu0 %v6382_v22  ;;  %v6509_v29 = vcombine.low %v653_v18, %v657_v19  ;;  %v6328_v18 = vcombine.high %v470_v10, %v474_v11  ;;  %v6456_v19 = vcombine.high %v598_v13, %v602_v14  ;;  %v462_v21 = vld [vmem:[%s7957_s6 + $0x148] sm:$0xff] }
  0xc9   : > { %v521_v25 = vld [vmem:[%s7957_s6 + $0x320] sm:$0xff]  ;;  %2180 = vmatpush2.bf16.msra.mxu0 %v6381_v28  ;;  %v466_v22 = vld [vmem:[%s7957_s6 + $0x168] sm:$0xff] }
  0xca   : > { %v645_v26 = vld [vmem:[%s7957_s6 + $0x700] sm:$0xff]  ;;  %v6374_v30 = vcombine.high %v517_v23, %v521_v25  ;;  %2292 = vmatprep.subr.bf16.mxu1 %v6510_v24  ;;  %v6373_v36 = vcombine.low %v517_v23, %v521_v25  ;;  %v8070_v23 = vld [vmem:[%s7949_s4 + $0x2c] ss:$16 sps:$4 sm:$0xff]   ;;  %v6320_v28 = vcombine.high %v462_v21, %v466_v22 }
  0xcb   : > { %v649_v27 = vld [vmem:[%s7957_s6 + $0x720] sm:$0xff]  ;;  %2293 = vmatpush2.bf16.msra.mxu1 %v6509_v29  ;;  %v590_v24 = vld [vmem:[%s7957_s6 + $0x548] sm:$0xff] }
  0xcc   : > { %v509_v31 = vld [vmem:[%s7957_s6 + $0x2c0] sm:$0xff]  ;;  %v6502_v32 = vcombine.high %v645_v26, %v649_v27  ;;  %2181 = vmatprep.subr.bf16.mxu0 %v6374_v30  ;;  %v6501_v37 = vcombine.low %v645_v26, %v649_v27  ;;  %v594_v25 = vld [vmem:[%s7957_s6 + $0x568] sm:$0xff]  ;;  %v6327_v26 = vcombine.low %v470_v10, %v474_v11  ;;  %v6455_v27 = vcombine.low %v598_v13, %v602_v14 }
  0xcd   : > { %v513_v33 = vld [vmem:[%s7957_s6 + $0x2e0] sm:$0xff]  ;;  %2182 = vmatpush2.bf16.msra.mxu0 %v6373_v36  ;;  %v6448_v29 = vcombine.high %v590_v24, %v594_v25  ;;  %v454_v30 = vld [vmem:[%s7957_s6 + $0x108] sm:$0xff]  ;;  %v6319_v36 = vcombine.low %v462_v21, %v466_v22 }
  0xce   : > { %v637_v34 = vld [vmem:[%s7957_s6 + $0x6c0] sm:$0xff]  ;;  %v6366_v38 = vcombine.high %v509_v31, %v513_v33  ;;  %2294 = vmatprep.subr.bf16.mxu1 %v6502_v32  ;;  %v6365_v44 = vcombine.low %v509_v31, %v513_v33  ;;  %v458_v31 = vld [vmem:[%s7957_s6 + $0x128] sm:$0xff] }
  0xcf   : > { %v641_v35 = vld [vmem:[%s7957_s6 + $0x6e0] sm:$0xff]  ;;  %2295 = vmatpush2.bf16.msra.mxu1 %v6501_v37  ;;  %v582_v33 = vld [vmem:[%s7957_s6 + $0x508] sm:$0xff]  ;;  %v6447_v37 = vcombine.low %v590_v24, %v594_v25 }
  0xd0   : > { %v6494_v39 = vcombine.high %v637_v34, %v641_v35  ;;  %v501_v40 = vld [vmem:[%s7957_s6 + $0x280] sm:$0xff]  ;;  %2183 = vmatprep.subr.bf16.mxu0 %v6366_v38  ;;  %v6493_v45 = vcombine.low %v637_v34, %v641_v35  ;;  %v586_v34 = vld [vmem:[%s7957_s6 + $0x528] sm:$0xff]  ;;  %v6312_v38 = vcombine.high %v454_v30, %v458_v31 }
  0xd1   : > { %v505_v41 = vld [vmem:[%s7957_s6 + $0x2a0] sm:$0xff]  ;;  %2184 = vmatpush2.bf16.msra.mxu0 %v6365_v44  ;;  %v8085_v35 = vld [vmem:[%s7949_s4 + $0x28] ss:$16 sps:$4 sm:$0xff]   ;;  %v8142_v25 = vld [vmem:[%s7949_s4 + $0x8c] ss:$16 sps:$4 sm:$0xff]  }
  0xd2   : > { %v629_v42 = vld [vmem:[%s7957_s6 + $0x680] sm:$0xff]  ;;  %v6358_v46 = vcombine.high %v501_v40, %v505_v41  ;;  %2296 = vmatprep.subr.bf16.mxu1 %v6494_v39  ;;  %v6357_v52 = vcombine.low %v501_v40, %v505_v41  ;;  %v6440_v39 = vcombine.high %v582_v33, %v586_v34  ;;  %v446_v41 = vld [vmem:[%s7957_s6 + $0xc8] sm:$0xff] }
  0xd3   : > { %v633_v43 = vld [vmem:[%s7957_s6 + $0x6a0] sm:$0xff]  ;;  %2297 = vmatpush2.bf16.msra.mxu1 %v6493_v45  ;;  %v574_v44 = vld [vmem:[%s7957_s6 + $0x4c8] sm:$0xff] }
  0xd4   : > { %v6486_v47 = vcombine.high %v629_v42, %v633_v43  ;;  %v493_v48 = vld [vmem:[%s7957_s6 + $0x240] sm:$0xff]  ;;  %2185 = vmatprep.subr.bf16.mxu0 %v6358_v46  ;;  %v6485_v53 = vcombine.low %v629_v42, %v633_v43  ;;  %v450_v42 = vld [vmem:[%s7957_s6 + $0xe8] sm:$0xff]  ;;  %v6311_v46 = vcombine.low %v454_v30, %v458_v31 }
  0xd5   : > { %v497_v49 = vld [vmem:[%s7957_s6 + $0x260] sm:$0xff]  ;;  %2186 = vmatpush2.bf16.msra.mxu0 %v6357_v52  ;;  %v8094_v43 = vld [vmem:[%s7949_s4 + $0x4c] ss:$16 sps:$4 sm:$0xff]   ;;  %v8133_v14 = vld [vmem:[%s7949_s4 + $0x68] ss:$16 sps:$4 sm:$0xff]  }
  0xd6   : > { %v621_v50 = vld [vmem:[%s7957_s6 + $0x640] sm:$0xff]  ;;  %v6350_v54 = vcombine.high %v493_v48, %v497_v49  ;;  %2298 = vmatprep.subr.bf16.mxu1 %v6486_v47  ;;  %v6349_v62 = vcombine.low %v493_v48, %v497_v49  ;;  %v578_v45 = vld [vmem:[%s7957_s6 + $0x4e8] sm:$0xff]  ;;  %v6439_v47 = vcombine.low %v582_v33, %v586_v34  ;;  %v6304_v48 = vcombine.high %v446_v41, %v450_v42 }
  0xd7   : > { %v625_v51 = vld [vmem:[%s7957_s6 + $0x660] sm:$0xff]  ;;  %2299 = vmatpush2.bf16.msra.mxu1 %v6485_v53  ;;  %v6432_v49 = vcombine.high %v574_v44, %v578_v45  ;;  %v566_v53 = vld [vmem:[%s7957_s6 + $0x488] sm:$0xff] }
  0xd8   : > { %v485_v55 = vld [vmem:[%s7957_s6 + $0x200] sm:$0xff]  ;;  %v6478_v57 = vcombine.high %v621_v50, %v625_v51  ;;  %2187 = vmatprep.subr.bf16.mxu0 %v6350_v54  ;;  %v6477_v63 = vcombine.low %v621_v50, %v625_v51  ;;  %v438_v50 = vld [vmem:[%s7957_s6 + $0x88] sm:$0xff] }
  0xd9   : > { %v489_v58 = vld [vmem:[%s7957_s6 + $0x220] sm:$0xff]  ;;  %2188 = vmatpush2.bf16.msra.mxu0 %v6349_v62  ;;  %v442_v51 = vld [vmem:[%s7957_s6 + $0xa8] sm:$0xff] }
  0xda   : > { %v613_v60 = vld [vmem:[%s7957_s6 + $0x600] sm:$0xff]  ;;  %v6342_v0 = vcombine.high %v485_v55, %v489_v58  ;;  %2300 = vmatprep.subr.bf16.mxu1 %v6478_v57  ;;  %v6341_v6 = vcombine.low %v485_v55, %v489_v58  ;;  %v570_v54 = vld [vmem:[%s7957_s6 + $0x4a8] sm:$0xff]  ;;  %v6303_v57 = vcombine.low %v446_v41, %v450_v42  ;;  %v6431_v58 = vcombine.low %v574_v44, %v578_v45 }
  0xdb   : > { %v617_v61 = vld [vmem:[%s7957_s6 + $0x620] sm:$0xff]  ;;  %2301 = vmatpush2.bf16.msra.mxu1 %v6477_v63  ;;  %v8109_v55 = vld [vmem:[%s7949_s4 + $0x48] ss:$16 sps:$4 sm:$0xff]   ;;  %v6295_v4 = vcombine.low %v438_v50, %v442_v51  ;;  %v6423_v5 = vcombine.low %v566_v53, %v570_v54 }
  0xdc   : > { %v6470_v2 = vcombine.high %v613_v60, %v617_v61  ;;  %2189 = vmatprep.subr.bf16.mxu0 %v6342_v0  ;;  %v6469_v7 = vcombine.low %v613_v60, %v617_v61  ;;  %v8056_v12 = vld [vmem:[%s7949_s4] ss:$16 sps:$4 sm:$0xff]   ;;  %v8064_v20 = vld [vmem:[%s7949_s4 + $0x24] ss:$16 sps:$4 sm:$0xff]   ;;  %v6296_v60 = vcombine.high %v438_v50, %v442_v51  ;;  %v6424_v61 = vcombine.high %v566_v53, %v570_v54  ;;  %v430_v63 = vld [vmem:[%s7957_s6 + $0x48] sm:$0xff] }
  0xdd   : > { %2190 = vmatpush2.bf16.msra.mxu0 %v6341_v6  ;;  %v8080_v32 = vld [vmem:[%s7949_s4 + $0x20] ss:$16 sps:$4 sm:$0xff]   ;;  %v8088_v40 = vld [vmem:[%s7949_s4 + $0x44] ss:$16 sps:$4 sm:$0xff]   ;;  %v434_v0 = vld [vmem:[%s7957_s6 + $0x68] sm:$0xff] }
  0xde   : > { %2302 = vmatprep.subr.bf16.mxu1 %v6470_v2  ;;  %2385 = vmatprep.subr.bf16.mxu0 %v6336_v8  ;;  %v8104_v52 = vld [vmem:[%s7949_s4 + $0x40] ss:$16 sps:$4 sm:$0xff]   ;;  %v8112_v62 = vld [vmem:[%s7949_s4 + $0x64] ss:$16 sps:$4 sm:$0xff]   ;;  %v558_v2 = vld [vmem:[%s7957_s6 + $0x448] sm:$0xff]  ;;  %v6288_v6 = vcombine.high %v430_v63, %v434_v0 }
  0xdf   : > { %2303 = vmatpush2.bf16.msra.mxu1 %v6469_v7  ;;  %v562_v3 = vld [vmem:[%s7957_s6 + $0x468] sm:$0xff]  ;;  %v8128_v10 = vld [vmem:[%s7949_s4 + $0x60] ss:$16 sps:$4 sm:$0xff]   ;;  %v8136_v21 = vld [vmem:[%s7949_s4 + $0x84] ss:$16 sps:$4 sm:$0xff]  }
  0xe0   : > { %2498 = vmatprep.subr.bf16.mxu1 %v6464_v9  ;;  %2192 = vmatmul.mubr.bf16.vlgmr.msra.gmra.mxu0 %v8056_v12  ;;  %v6416_v7 = vcombine.high %v558_v2, %v562_v3  ;;  %v422_v8 = vld [vmem:[%s7957_s6 + $0x8] sm:$0xff]  ;;  %v8149_v31 = vld [vmem:[%s7949_s4 + $0x80] ss:$16 sps:$4 sm:$0xff]   ;;  %v8160_v42 = vld [vmem:[%s7949_s4 + $0xa4] ss:$16 sps:$4 sm:$0xff]  }
  0xe1   : > { %2386 = vmatpush1.bf16.msra.mxu0 %v6335_v16  ;;  %2201 = vmatprep.mubr.bf16.mxu0 %v8064_v20  ;;  %v426_v9 = vld [vmem:[%s7957_s6 + $0x28] sm:$0xff]  ;;  %v6287_v16 = vcombine.low %v430_v63, %v434_v0 }
  0xe2   : > { %2305 = vmatmul.mubr.bf16.vlgmr.msra.gmra.mxu1 %v8061_v15  ;;  %2387 = vmatprep.subr.bf16.mxu0 %v6328_v18  ;;  %v550_v11 = vld [vmem:[%s7957_s6 + $0x408] sm:$0xff]  ;;  %v6280_v18 = vcombine.high %v422_v8, %v426_v9 }
  0xe3   : > { %2499 = vmatpush1.bf16.msra.mxu1 %v6463_v17  ;;  %2314 = vmatprep.mubr.bf16.mxu1 %v8070_v23  ;;  %v554_v13 = vld [vmem:[%s7957_s6 + $0x428] sm:$0xff]  ;;  %v6415_v17 = vcombine.low %v558_v2, %v562_v3 }
  0xe4   : > { %2500 = vmatprep.subr.bf16.mxu1 %v6456_v19  ;;  %v6408_v19 = vcombine.high %v550_v11, %v554_v13  ;;  %v542_v22 = vld [vmem:[%s7957_s6 + $0x3c8] sm:$0xff] }
  0xe5   : > { %2388 = vmatpush1.bf16.msra.mxu0 %v6327_v26  ;;  %v546_v24 = vld [vmem:[%s7957_s6 + $0x3e8] sm:$0xff] }
  0xe6   : > { %2389 = vmatprep.subr.bf16.mxu0 %v6320_v28  ;;  %v670_v26 = vld [vmem:[%s7957_s6 + $0x7c8] sm:$0xff]  ;;  %v6279_v28 = vcombine.low %v422_v8, %v426_v9  ;;  %v6400_v30 = vcombine.high %v542_v22, %v546_v24  ;;  %v6399_v41 = vcombine.low %v542_v22, %v546_v24  ;;  %v8196_v22 = vld [vmem:[%s7949_s4 + $0xc0] ss:$16 sps:$4 sm:$0xff]  }
  0xe7   : > { %2501 = vmatpush1.bf16.msra.mxu1 %v6455_v27  ;;  %v674_v27 = vld [vmem:[%s7957_s6 + $0x7e8] sm:$0xff] }
  0xe8   : > { %2502 = vmatprep.subr.bf16.mxu1 %v6448_v29  ;;  %2202 = vmatmul.mubr.bf16.gmra.mxu0 %v8080_v32  ;;  %v6407_v29 = vcombine.low %v550_v11, %v554_v13  ;;  %v6528_v33 = vcombine.high %v670_v26, %v674_v27  ;;  %v534_v34 = vld [vmem:[%s7957_s6 + $0x388] sm:$0xff]  ;;  %v6527_v44 = vcombine.low %v670_v26, %v674_v27 }
  0xe9   : > { %2390 = vmatpush1.bf16.msra.mxu0 %v6319_v36  ;;  %2211 = vmatprep.mubr.bf16.mxu0 %v8088_v40  ;;  %v538_v36 = vld [vmem:[%s7957_s6 + $0x3a8] sm:$0xff] }
  0xea   : > { %2315 = vmatmul.mubr.bf16.gmra.mxu1 %v8085_v35  ;;  %2391 = vmatprep.subr.bf16.mxu0 %v6312_v38  ;;  %v662_v38 = vld [vmem:[%s7957_s6 + $0x788] sm:$0xff]  ;;  %v6392_v45 = vcombine.high %v534_v34, %v538_v36  ;;  %v6391_v53 = vcombine.low %v534_v34, %v538_v36  ;;  %v8208_v36 = vld [vmem:[%s7949_s4 + $0xe4] ss:$16 sps:$4 sm:$0xff]  }
  0xeb   : > { %2503 = vmatpush1.bf16.msra.mxu1 %v6447_v37  ;;  %2324 = vmatprep.mubr.bf16.mxu1 %v8094_v43  ;;  %v8155_v37 = vld [vmem:[%s7949_s4 + $0x88] ss:$16 sps:$4 sm:$0xff]   ;;  %v8187_v8 = vld [vmem:[%s7949_s4 + $0xcc] ss:$16 sps:$4 sm:$0xff]  }
  0xec   : > { %2504 = vmatprep.subr.bf16.mxu1 %v6440_v39  ;;  %v666_v39 = vld [vmem:[%s7957_s6 + $0x7a8] sm:$0xff] }
  0xed   : > { %2392 = vmatpush1.bf16.msra.mxu0 %v6311_v46  ;;  %v8163_v46 = vld [vmem:[%s7949_s4 + $0xac] ss:$16 sps:$4 sm:$0xff]   ;;  %v6520_v50 = vcombine.high %v662_v38, %v666_v39  ;;  %v6519_v54 = vcombine.low %v662_v38, %v666_v39  ;;  %v8179_v0 = vld [vmem:[%s7949_s4 + $0xa8] ss:$16 sps:$4 sm:$0xff]  }
  0xee   : > { %2393 = vmatprep.subr.bf16.mxu0 %v6304_v48  ;;  %v530_v48 = vld [vmem:[%s7957_s6 + $0x368] sm:$0xff] }
  0xef   : > { %2505 = vmatpush1.bf16.msra.mxu1 %v6439_v47  ;;  %v526_v47 = vld [vmem:[%s7957_s6 + $0x348] sm:$0xff] }
  0xf0   : > { %2506 = vmatprep.subr.bf16.mxu1 %v6432_v49  ;;  %2212 = vmatmul.mubr.bf16.gmra.mxu0 %v8104_v52  ;;  %v654_v49 = vld [vmem:[%s7957_s6 + $0x748] sm:$0xff] }
  0xf1   : > { %2394 = vmatpush1.bf16.msra.mxu0 %v6303_v57  ;;  %2221 = vmatprep.mubr.bf16.mxu0 %v8112_v62  ;;  %v658_v51 = vld [vmem:[%s7957_s6 + $0x768] sm:$0xff]  ;;  %v8172_v57 = vld [vmem:[%s7949_s4 + $0xa0] ss:$16 sps:$4 sm:$0xff]  }
  0xf2   : > { %2325 = vmatmul.mubr.bf16.gmra.mxu1 %v8109_v55  ;;  %2395 = vmatprep.subr.bf16.mxu0 %v6296_v60  ;;  %v518_v60 = vld [vmem:[%s7957_s6 + $0x308] sm:$0xff]  ;;  %v6512_v2 = vcombine.high %v654_v49, %v658_v51 }
  0xf3   : > { %2507 = vmatpush1.bf16.msra.mxu1 %v6431_v58  ;;  %2334 = vmatprep.mubr.bf16.mxu1 %v8118_v1  ;;  %v6384_v58 = vcombine.high %v526_v47, %v530_v48  ;;  %v646_v63 = vld [vmem:[%s7957_s6 + $0x708] sm:$0xff] }
  0xf4   : > { %2508 = vmatprep.subr.bf16.mxu1 %v6424_v61  ;;  %v522_v61 = vld [vmem:[%s7957_s6 + $0x328] sm:$0xff] }
  0xf5   : > { %2396 = vmatpush1.bf16.msra.mxu0 %v6295_v4  ;;  %v650_v3 = vld [vmem:[%s7957_s6 + $0x728] sm:$0xff]  ;;  %v6383_v4 = vcombine.low %v526_v47, %v530_v48 }
  0xf6   : > { %2397 = vmatprep.subr.bf16.mxu0 %v6288_v6  ;;  %v6511_v6 = vcombine.low %v654_v49, %v658_v51  ;;  %v510_v9 = vld [vmem:[%s7957_s6 + $0x2c8] sm:$0xff] }
  0xf7   : > { %2509 = vmatpush1.bf16.msra.mxu1 %v6423_v5  ;;  %v8184_v5 = vld [vmem:[%s7949_s4 + $0xc4] ss:$16 sps:$4 sm:$0xff]   ;;  %v514_v11 = vld [vmem:[%s7957_s6 + $0x2e8] sm:$0xff] }
  0xf8   : > { %2510 = vmatprep.subr.bf16.mxu1 %v6416_v7  ;;  %2222 = vmatmul.mubr.bf16.gmra.mxu0 %v8128_v10  ;;  %v6376_v7 = vcombine.high %v518_v60, %v522_v61  ;;  %v638_v13 = vld [vmem:[%s7957_s6 + $0x6c8] sm:$0xff]  ;;  %v6368_v24 = vcombine.high %v510_v9, %v514_v11  ;;  %v6367_v34 = vcombine.low %v510_v9, %v514_v11  ;;  %v479_v9 = vld [vmem:[%s7957_s6 + $0x1d0] sm:$0xff] }
  0xf9   : > { %2398 = vmatpush1.bf16.msra.mxu0 %v6287_v16  ;;  %2231 = vmatprep.mubr.bf16.mxu0 %v8136_v21  ;;  %v6504_v16 = vcombine.high %v646_v63, %v650_v3  ;;  %v502_v26 = vld [vmem:[%s7957_s6 + $0x288] sm:$0xff]  ;;  %v483_v11 = vld [vmem:[%s7957_s6 + $0x1f0] sm:$0xff] }
  0xfa   : > { %2335 = vmatmul.mubr.bf16.gmra.mxu1 %v8133_v14  ;;  %2399 = vmatprep.subr.bf16.mxu0 %v6280_v18  ;;  %v6375_v18 = vcombine.low %v518_v60, %v522_v61  ;;  %v506_v27 = vld [vmem:[%s7957_s6 + $0x2a8] sm:$0xff] }
  0xfb   : > { %2511 = vmatpush1.bf16.msra.mxu1 %v6415_v17  ;;  %2344 = vmatprep.mubr.bf16.mxu1 %v8142_v25  ;;  %v642_v17 = vld [vmem:[%s7957_s6 + $0x6e8] sm:$0xff]  ;;  %v6360_v39 = vcombine.high %v502_v26, %v506_v27 }
  0xfc   : > { %2512 = vmatprep.subr.bf16.mxu1 %v6408_v19  ;;  %v6503_v19 = vcombine.low %v646_v63, %v650_v3  ;;  %v6495_v38 = vcombine.low %v638_v13, %v642_v17  ;;  %v622_v47 = vld [vmem:[%s7957_s6 + $0x648] sm:$0xff] }
  0xfd   : > { %2400 = vmatpush1.bf16.msra.mxu0 %v6279_v28  ;;  %v630_v28 = vld [vmem:[%s7957_s6 + $0x688] sm:$0xff] }
  0xfe   : > { %2401 = vmatprep.subr.bf16.mxu0 %v6400_v30  ;;  %v6496_v30 = vcombine.high %v638_v13, %v642_v17  ;;  %v626_v49 = vld [vmem:[%s7957_s6 + $0x668] sm:$0xff]  ;;  %v607_v13 = vld [vmem:[%s7957_s6 + $0x5d0] sm:$0xff] }
  0xff   : > { %2513 = vmatpush1.bf16.msra.mxu1 %v6407_v29  ;;  %v8203_v29 = vld [vmem:[%s7949_s4 + $0xc8] ss:$16 sps:$4 sm:$0xff]   ;;  %v611_v17 = vld [vmem:[%s7957_s6 + $0x5f0] sm:$0xff] }
 0x100   : > { %2514 = vmatprep.subr.bf16.mxu1 %v6528_v33  ;;  %2232 = vmatmul.mubr.bf16.gmra.mxu0 %v8149_v31  ;;  %v634_v33 = vld [vmem:[%s7957_s6 + $0x6a8] sm:$0xff] }
 0x101   : > { %2402 = vmatpush2.bf16.msra.mxu0 %v6399_v41  ;;  %2241 = vmatprep.mubr.bf16.mxu0 %v8160_v42  ;;  %v8211_v41 = vld [vmem:[%s7949_s4 + $0xec] ss:$16 sps:$4 sm:$0xff]   ;;  %v6488_v48 = vcombine.high %v630_v28, %v634_v33  ;;  %v6487_v51 = vcombine.low %v630_v28, %v634_v33  ;;  %v8227_v63 = vld [vmem:[%s7949_s4 + $0xe8] ss:$16 sps:$4 sm:$0xff]   ;;  %v599_v28 = vld [vmem:[%s7957_s6 + $0x590] sm:$0xff] }
 0x102   : > { %2345 = vmatmul.mubr.bf16.gmra.mxu1 %v8155_v37  ;;  %2403 = vmatprep.subr.bf16.mxu0 %v6392_v45  ;;  %v498_v45 = vld [vmem:[%s7957_s6 + $0x268] sm:$0xff]  ;;  %v603_v33 = vld [vmem:[%s7957_s6 + $0x5b0] sm:$0xff] }
 0x103   : > { %2515 = vmatpush2.bf16.msra.mxu1 %v6527_v44  ;;  %2354 = vmatprep.mubr.bf16.mxu1 %v8163_v46  ;;  %v494_v44 = vld [vmem:[%s7957_s6 + $0x248] sm:$0xff] }
 0x104   : > { %2516 = vmatprep.subr.bf16.mxu1 %v6520_v50  ;;  %v6359_v50 = vcombine.low %v502_v26, %v506_v27  ;;  %v490_v60 = vld [vmem:[%s7957_s6 + $0x228] sm:$0xff]  ;;  %v471_v26 = vld [vmem:[%s7957_s6 + $0x190] sm:$0xff] }
 0x105   : > { %2404 = vmatpush2.bf16.msra.mxu0 %v6391_v53  ;;  %v8220_v53 = vld [vmem:[%s7949_s4 + $0xe0] ss:$16 sps:$4 sm:$0xff]   ;;  %v614_v61 = vld [vmem:[%s7957_s6 + $0x608] sm:$0xff] }
 0x106   : > { %2405 = vmatprep.subr.bf16.mxu0 %v6384_v58  ;;  %v486_v58 = vld [vmem:[%s7957_s6 + $0x208] sm:$0xff]  ;;  %v475_v27 = vld [vmem:[%s7957_s6 + $0x1b0] sm:$0xff] }
 0x107   : > { %2517 = vmatpush2.bf16.msra.mxu1 %v6519_v54  ;;  %v6352_v54 = vcombine.high %v494_v44, %v498_v45  ;;  %v618_v3 = vld [vmem:[%s7957_s6 + $0x628] sm:$0xff] }
 0x108   : > { %2518 = vmatprep.subr.bf16.mxu1 %v6512_v2  ;;  %2242 = vmatmul.mubr.bf16.gmra.mxu0 %v8172_v57  ;;  %v6480_v2 = vcombine.high %v622_v47, %v626_v49 }
 0x109   : > { %2406 = vmatpush2.bf16.msra.mxu0 %v6383_v4  ;;  %2251 = vmatprep.mubr.bf16.mxu0 %v8184_v5  ;;  %v6351_v4 = vcombine.low %v494_v44, %v498_v45  ;;  %v6330_v44 = vcombine.high %v471_v26, %v475_v27  ;;  %v467_v45 = vld [vmem:[%s7957_s6 + $0x170] sm:$0xff] }
 0x10a   : > { %2355 = vmatmul.mubr.bf16.gmra.mxu1 %v8179_v0  ;;  %2407 = vmatprep.subr.bf16.mxu0 %v6376_v7  ;;  %v6344_v7 = vcombine.high %v486_v58, %v490_v60 }
 0x10b   : > { %2519 = vmatpush2.bf16.msra.mxu1 %v6511_v6  ;;  %2364 = vmatprep.mubr.bf16.mxu1 %v8187_v8  ;;  %v6479_v6 = vcombine.low %v622_v47, %v626_v49  ;;  %v6458_v47 = vcombine.high %v599_v28, %v603_v33  ;;  %v455_v49 = vld [vmem:[%s7957_s6 + $0x110] sm:$0xff] }
 0x10c   : > { %2520 = vmatprep.subr.bf16.mxu1 %v6504_v16  ;;  %v6472_v16 = vcombine.high %v614_v61, %v618_v3 }
 0x10d   : > { %2408 = vmatpush2.bf16.msra.mxu0 %v6375_v18  ;;  %v6343_v18 = vcombine.low %v486_v58, %v490_v60 }
 0x10e   : > { %2409 = vmatprep.subr.bf16.mxu0 %v6368_v24  ;;  %v6338_v24 = vcombine.high %v479_v9, %v483_v11 }
 0x10f   : > { %2521 = vmatpush2.bf16.msra.mxu1 %v6503_v19  ;;  %v6471_v19 = vcombine.low %v614_v61, %v618_v3  ;;  %v447_v61 = vld [vmem:[%s7957_s6 + $0xd0] sm:$0xff] }
 0x110   : > { %2522 = vmatprep.subr.bf16.mxu1 %v6496_v30  ;;  %2252 = vmatmul.mubr.bf16.gmra.mxu0 %v8196_v22  ;;  %v6466_v30 = vcombine.high %v607_v13, %v611_v17 }
 0x111   : > { %2410 = vmatpush2.bf16.msra.mxu0 %v6367_v34  ;;  %2261 = vmatprep.mubr.bf16.mxu0 %v8208_v36  ;;  %v6337_v34 = vcombine.low %v479_v9, %v483_v11  ;;  %v439_v9 = vld [vmem:[%s7957_s6 + $0x90] sm:$0xff] }
 0x112   : > { %2365 = vmatmul.mubr.bf16.gmra.mxu1 %v8203_v29  ;;  %2411 = vmatprep.subr.bf16.mxu0 %v6360_v39  ;;  %v6465_v39 = vcombine.low %v607_v13, %v611_v17  ;;  %v443_v11 = vld [vmem:[%s7957_s6 + $0xb0] sm:$0xff] }
 0x113   : > { %2523 = vmatpush2.bf16.msra.mxu1 %v6495_v38  ;;  %2374 = vmatprep.mubr.bf16.mxu1 %v8211_v41  ;;  %v463_v38 = vld [vmem:[%s7957_s6 + $0x150] sm:$0xff] }
 0x114   : > { %2524 = vmatprep.subr.bf16.mxu1 %v6488_v48  ;;  %v591_v48 = vld [vmem:[%s7957_s6 + $0x550] sm:$0xff]  ;;  %v6321_v60 = vcombine.low %v463_v38, %v467_v45 }
 0x115   : > { %2412 = vmatpush2.bf16.msra.mxu0 %v6359_v50  ;;  %v459_v50 = vld [vmem:[%s7957_s6 + $0x130] sm:$0xff] }
 0x116   : > { %2413 = vmatprep.subr.bf16.mxu0 %v6352_v54  ;;  %v6322_v54 = vcombine.high %v463_v38, %v467_v45 }
 0x117   : > { %2525 = vmatpush2.bf16.msra.mxu1 %v6487_v51  ;;  %v6457_v51 = vcombine.low %v599_v28, %v603_v33  ;;  %v435_v28 = vld [vmem:[%s7957_s6 + $0x70] sm:$0xff] }
 0x118   : > { %2526 = vmatprep.subr.bf16.mxu1 %v6480_v2  ;;  %2262 = vmatmul.mubr.bf16.gmra.mxu0 %v8220_v53  ;;  %v451_v2 = vld [vmem:[%s7957_s6 + $0xf0] sm:$0xff] }
 0x119   : > { %2414 = vmatpush2.bf16.msra.mxu0 %v6351_v4  ;;  %2417 = vmatprep.mubr.bf16.mxu0 %v8008_v56  ;;  %v595_v56 = vld [vmem:[%s7957_s6 + $0x570] sm:$0xff]  ;;  %v6314_v4 = vcombine.high %v455_v49, %v459_v50 }
 0x11a   : > { %2375 = vmatmul.mubr.bf16.gmra.mxu1 %v8227_v63  ;;  %2415 = vmatprep.subr.bf16.mxu0 %v6344_v7  ;;  %v6450_v58 = vcombine.high %v591_v48, %v595_v56  ;;  %v6449_v3 = vcombine.low %v591_v48, %v595_v56  ;;  %v579_v7 = vld [vmem:[%s7957_s6 + $0x4f0] sm:$0xff] }
 0x11b   : > { %2527 = vmatpush2.bf16.msra.mxu1 %v6479_v6  ;;  %2530 = vmatprep.mubr.bf16.mxu1 %v8013_v59  ;;  %v6329_v59 = vcombine.low %v471_v26, %v475_v27  ;;  %v431_v27 = vld [vmem:[%s7957_s6 + $0x50] sm:$0xff] }
 0x11c   : > { %2528 = vmatprep.subr.bf16.mxu1 %v6472_v16  ;;  %v6306_v16 = vcombine.high %v447_v61, %v451_v2  ;;  %v6289_v45 = vcombine.low %v431_v27, %v435_v28 }
 0x11d   : > { %2416 = vmatpush2.bf16.msra.mxu0 %v6343_v18  ;;  %v6305_v18 = vcombine.low %v447_v61, %v451_v2 }
 0x11e   : > { %2611 = vmatprep.subr.bf16.mxu0 %v6338_v24  ;;  %v6298_v24 = vcombine.high %v439_v9, %v443_v11 }
 0x11f   : > { %2529 = vmatpush2.bf16.msra.mxu1 %v6471_v19 }
 0x120   : > { %2724 = vmatprep.subr.bf16.mxu1 %v6466_v30  ;;  %2418 = vmatmul.mubr.bf16.vlgmr.msra.gmra.mxu0 %v8056_v12  ;;  %v583_v12 = vld [vmem:[%s7957_s6 + $0x510] sm:$0xff] }
 0x121   : > { %2612 = vmatpush1.bf16.msra.mxu0 %v6337_v34  ;;  %2427 = vmatprep.mubr.bf16.mxu0 %v8064_v20  ;;  %v575_v20 = vld [vmem:[%s7957_s6 + $0x4d0] sm:$0xff]  ;;  %v6290_v34 = vcombine.high %v431_v27, %v435_v28 }
 0x122   : > { %2531 = vmatmul.mubr.bf16.vlgmr.msra.gmra.mxu1 %v8061_v15  ;;  %2613 = vmatprep.subr.bf16.mxu0 %v6330_v44  ;;  %v587_v15 = vld [vmem:[%s7957_s6 + $0x530] sm:$0xff]  ;;  %v6434_v17 = vcombine.high %v575_v20, %v579_v7  ;;  %v6433_v19 = vcombine.low %v575_v20, %v579_v7 }
 0x123   : > { %2725 = vmatpush1.bf16.msra.mxu1 %v6465_v39  ;;  %2540 = vmatprep.mubr.bf16.mxu1 %v8070_v23  ;;  %v6442_v6 = vcombine.high %v583_v12, %v587_v15  ;;  %v6313_v23 = vcombine.low %v455_v49, %v459_v50  ;;  %v6441_v13 = vcombine.low %v583_v12, %v587_v15  ;;  %v563_v30 = vld [vmem:[%s7957_s6 + $0x470] sm:$0xff] }
 0x124   : > { %2726 = vmatprep.subr.bf16.mxu1 %v6458_v47  ;;  %v423_v39 = vld [vmem:[%s7957_s6 + $0x10] sm:$0xff] }
 0x125   : > { %2614 = vmatpush1.bf16.msra.mxu0 %v6329_v59  ;;  %v551_v44 = vld [vmem:[%s7957_s6 + $0x410] sm:$0xff] }
 0x126   : > { %2615 = vmatprep.subr.bf16.mxu0 %v6322_v54  ;;  %v547_v59 = vld [vmem:[%s7957_s6 + $0x3f0] sm:$0xff] }
 0x127   : > { %2727 = vmatpush1.bf16.msra.mxu1 %v6457_v51  ;;  %v671_v49 = vld [vmem:[%s7957_s6 + $0x7d0] sm:$0xff] }
 0x128   : > { %2728 = vmatprep.subr.bf16.mxu1 %v6450_v58  ;;  %2428 = vmatmul.mubr.bf16.gmra.mxu0 %v8080_v32  ;;  %v567_v32 = vld [vmem:[%s7957_s6 + $0x490] sm:$0xff] }
 0x129   : > { %2616 = vmatpush1.bf16.msra.mxu0 %v6321_v60  ;;  %2437 = vmatprep.mubr.bf16.mxu0 %v8088_v40  ;;  %v559_v40 = vld [vmem:[%s7957_s6 + $0x450] sm:$0xff] }
 0x12a   : > { %2541 = vmatmul.mubr.bf16.gmra.mxu1 %v8085_v35  ;;  %2617 = vmatprep.subr.bf16.mxu0 %v6314_v4  ;;  %v571_v35 = vld [vmem:[%s7957_s6 + $0x4b0] sm:$0xff]  ;;  %v6418_v38 = vcombine.high %v559_v40, %v563_v30  ;;  %v6417_v47 = vcombine.low %v559_v40, %v563_v30 }
 0x12b   : > { %2729 = vmatpush1.bf16.msra.mxu1 %v6449_v3  ;;  %2550 = vmatprep.mubr.bf16.mxu1 %v8094_v43  ;;  %v6426_v26 = vcombine.high %v567_v32, %v571_v35  ;;  %v6297_v43 = vcombine.low %v439_v9, %v443_v11  ;;  %v6425_v33 = vcombine.low %v567_v32, %v571_v35  ;;  %v535_v12 = vld [vmem:[%s7957_s6 + $0x390] sm:$0xff] }
 0x12c   : > { %2730 = vmatprep.subr.bf16.mxu1 %v6442_v6  ;;  %v663_v15 = vld [vmem:[%s7957_s6 + $0x790] sm:$0xff] }
 0x12d   : > { %2618 = vmatpush1.bf16.msra.mxu0 %v6313_v23  ;;  %v531_v4 = vld [vmem:[%s7957_s6 + $0x370] sm:$0xff] }
 0x12e   : > { %2619 = vmatprep.subr.bf16.mxu0 %v6306_v16  ;;  %v655_v6 = vld [vmem:[%s7957_s6 + $0x750] sm:$0xff] }
 0x12f   : > { %2731 = vmatpush1.bf16.msra.mxu1 %v6441_v13  ;;  %v519_v11 = vld [vmem:[%s7957_s6 + $0x310] sm:$0xff] }
 0x130   : > { %2732 = vmatprep.subr.bf16.mxu1 %v6434_v17  ;;  %2438 = vmatmul.mubr.bf16.gmra.mxu0 %v8104_v52  ;;  %v427_v52 = vld [vmem:[%s7957_s6 + $0x30] sm:$0xff] }
 0x131   : > { %2620 = vmatpush1.bf16.msra.mxu0 %v6305_v18  ;;  %2447 = vmatprep.mubr.bf16.mxu0 %v8112_v62  ;;  %v6282_v48 = vcombine.high %v423_v39, %v427_v52  ;;  %v543_v62 = vld [vmem:[%s7957_s6 + $0x3d0] sm:$0xff]  ;;  %v6281_v50 = vcombine.low %v423_v39, %v427_v52 }
 0x132   : > { %2551 = vmatmul.mubr.bf16.gmra.mxu1 %v8109_v55  ;;  %2621 = vmatprep.subr.bf16.mxu0 %v6298_v24  ;;  %v555_v55 = vld [vmem:[%s7957_s6 + $0x430] sm:$0xff]  ;;  %v6402_v54 = vcombine.high %v543_v62, %v547_v59  ;;  %v6401_v60 = vcombine.low %v543_v62, %v547_v59 }
 0x133   : > { %2733 = vmatpush1.bf16.msra.mxu1 %v6433_v19  ;;  %2560 = vmatprep.mubr.bf16.mxu1 %v8118_v1  ;;  %v6410_v56 = vcombine.high %v551_v44, %v555_v55  ;;  %v675_v1 = vld [vmem:[%s7957_s6 + $0x7f0] sm:$0xff]  ;;  %v6409_v51 = vcombine.low %v551_v44, %v555_v55 }
 0x134   : > { %2734 = vmatprep.subr.bf16.mxu1 %v6426_v26  ;;  %v6530_v58 = vcombine.high %v671_v49, %v675_v1  ;;  %v6529_v61 = vcombine.low %v671_v49, %v675_v1  ;;  %v647_v13 = vld [vmem:[%s7957_s6 + $0x710] sm:$0xff] }
 0x135   : > { %2622 = vmatpush1.bf16.msra.mxu0 %v6297_v43  ;;  %v515_v18 = vld [vmem:[%s7957_s6 + $0x2f0] sm:$0xff] }
 0x136   : > { %2623 = vmatprep.subr.bf16.mxu0 %v6290_v34  ;;  %v639_v19 = vld [vmem:[%s7957_s6 + $0x6d0] sm:$0xff] }
 0x137   : > { %2735 = vmatpush1.bf16.msra.mxu1 %v6425_v33  ;;  %v503_v40 = vld [vmem:[%s7957_s6 + $0x290] sm:$0xff] }
 0x138   : > { %2736 = vmatprep.subr.bf16.mxu1 %v6418_v38  ;;  %2448 = vmatmul.mubr.bf16.gmra.mxu0 %v8128_v10  ;;  %v539_v10 = vld [vmem:[%s7957_s6 + $0x3b0] sm:$0xff] }
 0x139   : > { %2624 = vmatpush1.bf16.msra.mxu0 %v6289_v45  ;;  %2457 = vmatprep.mubr.bf16.mxu0 %v8136_v21  ;;  %v6394_v2 = vcombine.high %v535_v12, %v539_v10  ;;  %v527_v21 = vld [vmem:[%s7957_s6 + $0x350] sm:$0xff]  ;;  %v6393_v20 = vcombine.low %v535_v12, %v539_v10 }
 0x13a   : > { %2561 = vmatmul.mubr.bf16.gmra.mxu1 %v8133_v14  ;;  %2625 = vmatprep.subr.bf16.mxu0 %v6282_v48  ;;  %v667_v14 = vld [vmem:[%s7957_s6 + $0x7b0] sm:$0xff]  ;;  %v6386_v23 = vcombine.high %v527_v21, %v531_v4  ;;  %v6385_v16 = vcombine.low %v527_v21, %v531_v4  ;;  %v468_v21 = vld [vmem:[%s7957_s6 + $0x178] sm:$0xff] }
 0x13b   : > { %2737 = vmatpush1.bf16.msra.mxu1 %v6417_v47  ;;  %2570 = vmatprep.mubr.bf16.mxu1 %v8142_v25  ;;  %v6522_v3 = vcombine.high %v663_v15, %v667_v14  ;;  %v659_v25 = vld [vmem:[%s7957_s6 + $0x770] sm:$0xff]  ;;  %v6521_v7 = vcombine.low %v663_v15, %v667_v14  ;;  %v472_v15 = vld [vmem:[%s7957_s6 + $0x198] sm:$0xff] }
 0x13c   : > { %2738 = vmatprep.subr.bf16.mxu1 %v6410_v56  ;;  %v6514_v9 = vcombine.high %v655_v6, %v659_v25  ;;  %v6513_v17 = vcombine.low %v655_v6, %v659_v25  ;;  %v631_v30 = vld [vmem:[%s7957_s6 + $0x690] sm:$0xff]  ;;  %v476_v14 = vld [vmem:[%s7957_s6 + $0x1b8] sm:$0xff] }
 0x13d   : > { %2626 = vmatpush1.bf16.msra.mxu0 %v6281_v50  ;;  %v499_v39 = vld [vmem:[%s7957_s6 + $0x270] sm:$0xff]  ;;  %v484_v50 = vld [vmem:[%s7957_s6 + $0x1f8] sm:$0xff]  ;;  %v6332_v6 = vcombine.high %v472_v15, %v476_v14 }
 0x13e   : > { %2627 = vmatprep.subr.bf16.mxu0 %v6402_v54  ;;  %v623_v52 = vld [vmem:[%s7957_s6 + $0x650] sm:$0xff] }
 0x13f   : > { %2739 = vmatpush1.bf16.msra.mxu1 %v6409_v51  ;;  %v487_v48 = vld [vmem:[%s7957_s6 + $0x210] sm:$0xff]  ;;  %v608_v51 = vld [vmem:[%s7957_s6 + $0x5d8] sm:$0xff] }
 0x140   : > { %2740 = vmatprep.subr.bf16.mxu1 %v6530_v58  ;;  %2458 = vmatmul.mubr.bf16.gmra.mxu0 %v8149_v31  ;;  %v523_v31 = vld [vmem:[%s7957_s6 + $0x330] sm:$0xff] }
 0x141   : > { %2628 = vmatpush2.bf16.msra.mxu0 %v6401_v60  ;;  %2467 = vmatprep.mubr.bf16.mxu0 %v8160_v42  ;;  %v6378_v32 = vcombine.high %v519_v11, %v523_v31  ;;  %v511_v42 = vld [vmem:[%s7957_s6 + $0x2d0] sm:$0xff]  ;;  %v6377_v24 = vcombine.low %v519_v11, %v523_v31  ;;  %v600_v60 = vld [vmem:[%s7957_s6 + $0x598] sm:$0xff]  ;;  %v6331_v11 = vcombine.low %v472_v15, %v476_v14 }
 0x142   : > { %2571 = vmatmul.mubr.bf16.gmra.mxu1 %v8155_v37  ;;  %2629 = vmatprep.subr.bf16.mxu0 %v6394_v2  ;;  %v651_v37 = vld [vmem:[%s7957_s6 + $0x730] sm:$0xff]  ;;  %v6370_v27 = vcombine.high %v511_v42, %v515_v18  ;;  %v6369_v43 = vcombine.low %v511_v42, %v515_v18  ;;  %v456_v31 = vld [vmem:[%s7957_s6 + $0x118] sm:$0xff] }
 0x143   : > { %2741 = vmatpush2.bf16.msra.mxu1 %v6529_v61  ;;  %2580 = vmatprep.mubr.bf16.mxu1 %v8163_v46  ;;  %v6506_v35 = vcombine.high %v647_v13, %v651_v37  ;;  %v643_v46 = vld [vmem:[%s7957_s6 + $0x6f0] sm:$0xff]  ;;  %v6505_v26 = vcombine.low %v647_v13, %v651_v37  ;;  %v604_v61 = vld [vmem:[%s7957_s6 + $0x5b8] sm:$0xff] }
 0x144   : > { %2742 = vmatprep.subr.bf16.mxu1 %v6522_v3  ;;  %v6498_v28 = vcombine.high %v639_v19, %v643_v46  ;;  %v6497_v33 = vcombine.low %v639_v19, %v643_v46  ;;  %v615_v56 = vld [vmem:[%s7957_s6 + $0x610] sm:$0xff]  ;;  %v464_v3 = vld [vmem:[%s7957_s6 + $0x158] sm:$0xff]  ;;  %v6460_v25 = vcombine.high %v600_v60, %v604_v61  ;;  %v6459_v37 = vcombine.low %v600_v60, %v604_v61 }
 0x145   : > { %2630 = vmatpush2.bf16.msra.mxu0 %v6393_v20  ;;  %v8334_v10 = vld [vmem:[%s7949_s4 + $0x4] ss:$16 sps:$4 sm:$0xff]   ;;  %v592_v20 = vld [vmem:[%s7957_s6 + $0x558] sm:$0xff]  ;;  %v6323_v19 = vcombine.low %v464_v3, %v468_v21 }
 0x146   : > { %2631 = vmatprep.subr.bf16.mxu0 %v6386_v23  ;;  %v596_v23 = vld [vmem:[%s7957_s6 + $0x578] sm:$0xff] }
 0x147   : > { %2743 = vmatpush2.bf16.msra.mxu1 %v6521_v7  ;;  %v8349_v7 = vld [vmem:[%s7949_s4] ss:$16 sps:$4 sm:$0xff]   ;;  %v460_v13 = vld [vmem:[%s7957_s6 + $0x138] sm:$0xff] }
 0x148   : > { %2744 = vmatprep.subr.bf16.mxu1 %v6514_v9  ;;  %2468 = vmatmul.mubr.bf16.gmra.mxu0 %v8172_v57  ;;  %v507_v57 = vld [vmem:[%s7957_s6 + $0x2b0] sm:$0xff]  ;;  %v8354_v9 = vld [vmem:[%s7949_s4 + $0x8] ss:$16 sps:$4 sm:$0xff]   ;;  %v8365_v42 = vld [vmem:[%s7949_s4 + $0x2c] ss:$16 sps:$4 sm:$0xff]  }
 0x149   : > { %2632 = vmatpush2.bf16.msra.mxu0 %v6385_v16  ;;  %2477 = vmatprep.mubr.bf16.mxu0 %v8184_v5  ;;  %v6362_v34 = vcombine.high %v503_v40, %v507_v57  ;;  %v495_v5 = vld [vmem:[%s7957_s6 + $0x250] sm:$0xff]  ;;  %v6361_v44 = vcombine.low %v503_v40, %v507_v57  ;;  %v6324_v16 = vcombine.high %v464_v3, %v468_v21  ;;  %v588_v18 = vld [vmem:[%s7957_s6 + $0x538] sm:$0xff] }
 0x14a   : > { %2581 = vmatmul.mubr.bf16.gmra.mxu1 %v8179_v0  ;;  %2633 = vmatprep.subr.bf16.mxu0 %v6378_v32  ;;  %v635_v0 = vld [vmem:[%s7957_s6 + $0x6b0] sm:$0xff]  ;;  %v6354_v45 = vcombine.high %v495_v5, %v499_v39  ;;  %v6353_v62 = vcombine.low %v495_v5, %v499_v39  ;;  %v6452_v32 = vcombine.high %v592_v20, %v596_v23  ;;  %v448_v46 = vld [vmem:[%s7957_s6 + $0xd8] sm:$0xff] }
 0x14b   : > { %2745 = vmatpush2.bf16.msra.mxu1 %v6513_v17  ;;  %2590 = vmatprep.mubr.bf16.mxu1 %v8187_v8  ;;  %v6490_v38 = vcombine.high %v631_v30, %v635_v0  ;;  %v627_v8 = vld [vmem:[%s7957_s6 + $0x670] sm:$0xff]  ;;  %v6489_v55 = vcombine.low %v631_v30, %v635_v0  ;;  %v576_v40 = vld [vmem:[%s7957_s6 + $0x4d8] sm:$0xff] }
 0x14c   : > { %2746 = vmatprep.subr.bf16.mxu1 %v6506_v35  ;;  %v6482_v47 = vcombine.high %v623_v52, %v627_v8  ;;  %v6481_v59 = vcombine.low %v623_v52, %v627_v8  ;;  %v8360_v17 = vld [vmem:[%s7949_s4 + $0x24] ss:$16 sps:$4 sm:$0xff]   ;;  %v584_v35 = vld [vmem:[%s7957_s6 + $0x518] sm:$0xff]  ;;  %v8373_v57 = vld [vmem:[%s7949_s4 + $0x20] ss:$16 sps:$4 sm:$0xff]  }
 0x14d   : > { %2634 = vmatpush2.bf16.msra.mxu0 %v6377_v24  ;;  %v452_v24 = vld [vmem:[%s7957_s6 + $0xf8] sm:$0xff]  ;;  %v8384_v39 = vld [vmem:[%s7949_s4 + $0x44] ss:$16 sps:$4 sm:$0xff]  }
 0x14e   : > { %2635 = vmatprep.subr.bf16.mxu0 %v6370_v27  ;;  %v6316_v27 = vcombine.high %v456_v31, %v460_v13  ;;  %v580_v30 = vld [vmem:[%s7957_s6 + $0x4f8] sm:$0xff]  ;;  %v6308_v5 = vcombine.high %v448_v46, %v452_v24 }
 0x14f   : > { %2747 = vmatpush2.bf16.msra.mxu1 %v6505_v26  ;;  %v6451_v26 = vcombine.low %v592_v20, %v596_v23  ;;  %v8378_v0 = vld [vmem:[%s7949_s4 + $0x28] ss:$16 sps:$4 sm:$0xff]   ;;  %v6436_v52 = vcombine.high %v576_v40, %v580_v30 }
 0x150   : > { %2748 = vmatprep.subr.bf16.mxu1 %v6498_v28  ;;  %2478 = vmatmul.mubr.bf16.gmra.mxu0 %v8196_v22  ;;  %v491_v22 = vld [vmem:[%s7957_s6 + $0x230] sm:$0xff]  ;;  %v6444_v28 = vcombine.high %v584_v35, %v588_v18  ;;  %v568_v8 = vld [vmem:[%s7957_s6 + $0x498] sm:$0xff] }
 0x151   : > { %2636 = vmatpush2.bf16.msra.mxu0 %v6369_v43  ;;  %2487 = vmatprep.mubr.bf16.mxu0 %v8208_v36  ;;  %v6346_v49 = vcombine.high %v487_v48, %v491_v22  ;;  %v480_v36 = vld [vmem:[%s7957_s6 + $0x1d8] sm:$0xff]  ;;  %v6345_v54 = vcombine.low %v487_v48, %v491_v22  ;;  %v6315_v43 = vcombine.low %v456_v31, %v460_v13 }
 0x152   : > { %2591 = vmatmul.mubr.bf16.gmra.mxu1 %v8203_v29  ;;  %2637 = vmatprep.subr.bf16.mxu0 %v6362_v34  ;;  %v619_v29 = vld [vmem:[%s7957_s6 + $0x630] sm:$0xff]  ;;  %v6340_v12 = vcombine.high %v480_v36, %v484_v50  ;;  %v6339_v2 = vcombine.low %v480_v36, %v484_v50  ;;  %v444_v34 = vld [vmem:[%s7957_s6 + $0xb8] sm:$0xff]  ;;  %v6435_v22 = vcombine.low %v576_v40, %v580_v30 }
 0x153   : > { %2749 = vmatpush2.bf16.msra.mxu1 %v6497_v33  ;;  %2600 = vmatprep.mubr.bf16.mxu1 %v8211_v41  ;;  %v6474_v1 = vcombine.high %v615_v56, %v619_v29  ;;  %v612_v41 = vld [vmem:[%s7957_s6 + $0x5f8] sm:$0xff]  ;;  %v6473_v58 = vcombine.low %v615_v56, %v619_v29 }
 0x154   : > { %2750 = vmatprep.subr.bf16.mxu1 %v6490_v38  ;;  %v6467_v4 = vcombine.low %v608_v51, %v612_v41  ;;  %v440_v33 = vld [vmem:[%s7957_s6 + $0x98] sm:$0xff]  ;;  %v6443_v38 = vcombine.low %v584_v35, %v588_v18 }
 0x155   : > { %2638 = vmatpush2.bf16.msra.mxu0 %v6361_v44  ;;  %v8389_v44 = vld [vmem:[%s7949_s4 + $0x4c] ss:$16 sps:$4 sm:$0xff]   ;;  %v6300_v56 = vcombine.high %v440_v33, %v444_v34  ;;  %v6299_v36 = vcombine.low %v440_v33, %v444_v34  ;;  %v8426_v23 = vld [vmem:[%s7949_s4 + $0x68] ss:$16 sps:$4 sm:$0xff]  }
 0x156   : > { %2639 = vmatprep.subr.bf16.mxu0 %v6354_v45  ;;  %v6307_v45 = vcombine.low %v448_v46, %v452_v24  ;;  %v436_v48 = vld [vmem:[%s7957_s6 + $0x78] sm:$0xff] }
 0x157   : > { %2751 = vmatpush2.bf16.msra.mxu1 %v6489_v55  ;;  %v572_v55 = vld [vmem:[%s7957_s6 + $0x4b8] sm:$0xff] }
 0x158   : > { %2752 = vmatprep.subr.bf16.mxu1 %v6482_v47  ;;  %2488 = vmatmul.mubr.bf16.gmra.mxu0 %v8220_v53  ;;  %v6468_v53 = vcombine.high %v608_v51, %v612_v41  ;;  %v432_v47 = vld [vmem:[%s7957_s6 + $0x58] sm:$0xff]  ;;  %v6428_v29 = vcombine.high %v568_v8, %v572_v55  ;;  %v6427_v50 = vcombine.low %v568_v8, %v572_v55  ;;  %v8406_v41 = vld [vmem:[%s7949_s4 + $0x64] ss:$16 sps:$4 sm:$0xff]  }
 0x159   : > { %2640 = vmatpush2.bf16.msra.mxu0 %v6353_v62  ;;  %2643 = vmatprep.mubr.bf16.mxu0 %v8334_v10  ;;  %v560_v62 = vld [vmem:[%s7957_s6 + $0x458] sm:$0xff]  ;;  %v6292_v51 = vcombine.high %v432_v47, %v436_v48  ;;  %v6291_v60 = vcombine.low %v432_v47, %v436_v48  ;;  %v8454_v55 = vld [vmem:[%s7949_s4 + $0xa4] ss:$16 sps:$4 sm:$0xff]  }
 0x15a   : > { %2601 = vmatmul.mubr.bf16.gmra.mxu1 %v8227_v63  ;;  %2641 = vmatprep.subr.bf16.mxu0 %v6346_v49  ;;  %v8340_v63 = vld [vmem:[%s7949_s4 + $0xc] ss:$16 sps:$4 sm:$0xff]  }
 0x15b   : > { %2753 = vmatpush2.bf16.msra.mxu1 %v6481_v59  ;;  %2756 = vmatprep.mubr.bf16.mxu1 %v8340_v63  ;;  %v8397_v59 = vld [vmem:[%s7949_s4 + $0x40] ss:$16 sps:$4 sm:$0xff]   ;;  %v564_v49 = vld [vmem:[%s7957_s6 + $0x478] sm:$0xff] }
 0x15c   : > { %2754 = vmatprep.subr.bf16.mxu1 %v6474_v1  ;;  %v8402_v1 = vld [vmem:[%s7949_s4 + $0x48] ss:$16 sps:$4 sm:$0xff]   ;;  %v6419_v61 = vcombine.low %v560_v62, %v564_v49  ;;  %v8436_v18 = vld [vmem:[%s7949_s4 + $0x8c] ss:$16 sps:$4 sm:$0xff]  }
 0x15d   : > { %2642 = vmatpush2.bf16.msra.mxu0 %v6345_v54  ;;  %v6420_v54 = vcombine.high %v560_v62, %v564_v49  ;;  %v552_v15 = vld [vmem:[%s7957_s6 + $0x418] sm:$0xff] }
 0x15e   : > { %2837 = vmatprep.subr.bf16.mxu0 %v6340_v12  ;;  %v428_v12 = vld [vmem:[%s7957_s6 + $0x38] sm:$0xff] }
 0x15f   : > { %2755 = vmatpush2.bf16.msra.mxu1 %v6473_v58  ;;  %v424_v58 = vld [vmem:[%s7957_s6 + $0x18] sm:$0xff] }
 0x160   : > { %2950 = vmatprep.subr.bf16.mxu1 %v6468_v53  ;;  %2644 = vmatmul.mubr.bf16.vlgmr.msra.gmra.mxu0 %v8349_v7  ;;  %v8412_v53 = vld [vmem:[%s7949_s4 + $0x6c] ss:$16 sps:$4 sm:$0xff]  }
 0x161   : > { %2838 = vmatpush1.bf16.msra.mxu0 %v6339_v2  ;;  %2653 = vmatprep.mubr.bf16.mxu0 %v8360_v17  ;;  %v556_v14 = vld [vmem:[%s7957_s6 + $0x438] sm:$0xff]  ;;  %v6284_v2 = vcombine.high %v424_v58, %v428_v12 }
 0x162   : > { %2757 = vmatmul.mubr.bf16.vlgmr.msra.gmra.mxu1 %v8354_v9  ;;  %2839 = vmatprep.subr.bf16.mxu0 %v6332_v6  ;;  %v6412_v3 = vcombine.high %v552_v15, %v556_v14  ;;  %v544_v21 = vld [vmem:[%s7957_s6 + $0x3d8] sm:$0xff]  ;;  %v8420_v6 = vld [vmem:[%s7949_s4 + $0x60] ss:$16 sps:$4 sm:$0xff]   ;;  %v6411_v31 = vcombine.low %v552_v15, %v556_v14 }
 0x163   : > { %2951 = vmatpush1.bf16.msra.mxu1 %v6467_v4  ;;  %2766 = vmatprep.mubr.bf16.mxu1 %v8365_v42  ;;  %v548_v4 = vld [vmem:[%s7957_s6 + $0x3f8] sm:$0xff] }
 0x164   : > { %2952 = vmatprep.subr.bf16.mxu1 %v6460_v25  ;;  %v672_v25 = vld [vmem:[%s7957_s6 + $0x7d8] sm:$0xff]  ;;  %v6404_v13 = vcombine.high %v544_v21, %v548_v4  ;;  %v6403_v24 = vcombine.low %v544_v21, %v548_v4 }
 0x165   : > { %2840 = vmatpush1.bf16.msra.mxu0 %v6331_v11  ;;  %v676_v20 = vld [vmem:[%s7957_s6 + $0x7f8] sm:$0xff]  ;;  %v6283_v11 = vcombine.low %v424_v58, %v428_v12  ;;  %v8468_v58 = vld [vmem:[%s7949_s4 + $0xa0] ss:$16 sps:$4 sm:$0xff]  }
 0x166   : > { %2841 = vmatprep.subr.bf16.mxu0 %v6324_v16  ;;  %v6532_v16 = vcombine.high %v672_v25, %v676_v20  ;;  %v540_v35 = vld [vmem:[%s7957_s6 + $0x3b8] sm:$0xff] }
 0x167   : > { %2953 = vmatpush1.bf16.msra.mxu1 %v6459_v37  ;;  %v8430_v37 = vld [vmem:[%s7949_s4 + $0x84] ss:$16 sps:$4 sm:$0xff]   ;;  %v668_v46 = vld [vmem:[%s7957_s6 + $0x7b8] sm:$0xff] }
 0x168   : > { %2954 = vmatprep.subr.bf16.mxu1 %v6452_v32  ;;  %2654 = vmatmul.mubr.bf16.gmra.mxu0 %v8373_v57  ;;  %v536_v32 = vld [vmem:[%s7957_s6 + $0x398] sm:$0xff] }
 0x169   : > { %2842 = vmatpush1.bf16.msra.mxu0 %v6323_v19  ;;  %2663 = vmatprep.mubr.bf16.mxu0 %v8384_v39  ;;  %v664_v19 = vld [vmem:[%s7957_s6 + $0x798] sm:$0xff] }
 0x16a   : > { %2767 = vmatmul.mubr.bf16.gmra.mxu1 %v8378_v0  ;;  %2843 = vmatprep.subr.bf16.mxu0 %v6316_v27  ;;  %v6396_v27 = vcombine.high %v536_v32, %v540_v35  ;;  %v528_v40 = vld [vmem:[%s7957_s6 + $0x358] sm:$0xff] }
 0x16b   : > { %2955 = vmatpush1.bf16.msra.mxu1 %v6451_v26  ;;  %2776 = vmatprep.mubr.bf16.mxu1 %v8389_v44  ;;  %v6531_v26 = vcombine.low %v672_v25, %v676_v20  ;;  %v532_v30 = vld [vmem:[%s7957_s6 + $0x378] sm:$0xff] }
 0x16c   : > { %2956 = vmatprep.subr.bf16.mxu1 %v6444_v28  ;;  %v6524_v28 = vcombine.high %v664_v19, %v668_v46  ;;  %v656_v33 = vld [vmem:[%s7957_s6 + $0x758] sm:$0xff]  ;;  %v6388_v8 = vcombine.high %v528_v40, %v532_v30  ;;  %v6387_v62 = vcombine.low %v528_v40, %v532_v30 }
 0x16d   : > { %2844 = vmatpush1.bf16.msra.mxu0 %v6315_v43  ;;  %v8444_v43 = vld [vmem:[%s7949_s4 + $0x80] ss:$16 sps:$4 sm:$0xff]   ;;  %v660_v34 = vld [vmem:[%s7957_s6 + $0x778] sm:$0xff] }
 0x16e   : > { %2845 = vmatprep.subr.bf16.mxu0 %v6308_v5  ;;  %v6395_v5 = vcombine.low %v536_v32, %v540_v35  ;;  %v520_v47 = vld [vmem:[%s7957_s6 + $0x318] sm:$0xff]  ;;  %v6515_v49 = vcombine.low %v656_v33, %v660_v34 }
 0x16f   : > { %2957 = vmatpush1.bf16.msra.mxu1 %v6443_v38  ;;  %v8450_v38 = vld [vmem:[%s7949_s4 + $0x88] ss:$16 sps:$4 sm:$0xff]   ;;  %v8484_v20 = vld [vmem:[%s7949_s4 + $0xcc] ss:$16 sps:$4 sm:$0xff]  }
 0x170   : > { %2958 = vmatprep.subr.bf16.mxu1 %v6436_v52  ;;  %2664 = vmatmul.mubr.bf16.gmra.mxu0 %v8397_v59  ;;  %v6523_v52 = vcombine.low %v664_v19, %v668_v46  ;;  %v524_v48 = vld [vmem:[%s7957_s6 + $0x338] sm:$0xff] }
 0x171   : > { %2846 = vmatpush1.bf16.msra.mxu0 %v6307_v45  ;;  %2673 = vmatprep.mubr.bf16.mxu0 %v8406_v41  ;;  %v6516_v45 = vcombine.high %v656_v33, %v660_v34  ;;  %v640_v12 = vld [vmem:[%s7957_s6 + $0x6d8] sm:$0xff]  ;;  %v8502_v34 = vld [vmem:[%s7949_s4 + $0xe4] ss:$16 sps:$4 sm:$0xff]  }
 0x172   : > { %2777 = vmatmul.mubr.bf16.gmra.mxu1 %v8402_v1  ;;  %2847 = vmatprep.subr.bf16.mxu0 %v6300_v56  ;;  %v648_v56 = vld [vmem:[%s7957_s6 + $0x718] sm:$0xff] }
 0x173   : > { %2959 = vmatpush1.bf16.msra.mxu1 %v6435_v22  ;;  %2786 = vmatprep.mubr.bf16.mxu1 %v8412_v53  ;;  %v8460_v22 = vld [vmem:[%s7949_s4 + $0xac] ss:$16 sps:$4 sm:$0xff]   ;;  %v8474_v14 = vld [vmem:[%s7949_s4 + $0xa8] ss:$16 sps:$4 sm:$0xff]  }
 0x174   : > { %2960 = vmatprep.subr.bf16.mxu1 %v6428_v29  ;;  %v652_v29 = vld [vmem:[%s7957_s6 + $0x738] sm:$0xff] }
 0x175   : > { %2848 = vmatpush1.bf16.msra.mxu0 %v6299_v36  ;;  %v6380_v36 = vcombine.high %v520_v47, %v524_v48  ;;  %v644_v15 = vld [vmem:[%s7957_s6 + $0x6f8] sm:$0xff] }
 0x176   : > { %2849 = vmatprep.subr.bf16.mxu0 %v6292_v51  ;;  %v512_v51 = vld [vmem:[%s7957_s6 + $0x2d8] sm:$0xff]  ;;  %v6500_v21 = vcombine.high %v640_v12, %v644_v15 }
 0x177   : > { %2961 = vmatpush1.bf16.msra.mxu1 %v6427_v50  ;;  %v6508_v50 = vcombine.high %v648_v56, %v652_v29  ;;  %v504_v4 = vld [vmem:[%s7957_s6 + $0x298] sm:$0xff] }
 0x178   : > { %2962 = vmatprep.subr.bf16.mxu1 %v6420_v54  ;;  %2674 = vmatmul.mubr.bf16.gmra.mxu0 %v8420_v6  ;;  %v516_v54 = vld [vmem:[%s7957_s6 + $0x2f8] sm:$0xff] }
 0x179   : > { %2850 = vmatpush1.bf16.msra.mxu0 %v6291_v60  ;;  %2683 = vmatprep.mubr.bf16.mxu0 %v8430_v37  ;;  %v6379_v60 = vcombine.low %v520_v47, %v524_v48  ;;  %v508_v25 = vld [vmem:[%s7957_s6 + $0x2b8] sm:$0xff] }
 0x17a   : > { %2787 = vmatmul.mubr.bf16.gmra.mxu1 %v8426_v23  ;;  %2851 = vmatprep.subr.bf16.mxu0 %v6284_v2  ;;  %v6372_v2 = vcombine.high %v512_v51, %v516_v54  ;;  %v6364_v32 = vcombine.high %v504_v4, %v508_v25  ;;  %v496_v19 = vld [vmem:[%s7957_s6 + $0x258] sm:$0xff]  ;;  %v6363_v40 = vcombine.low %v504_v4, %v508_v25  ;;  %v7011_v4 = vld [vmem:[%s7966_s1 + $0x2c4] ss:$16 sps:$4 sm:$0xff]  }
 0x17b   : > { %2963 = vmatpush1.bf16.msra.mxu1 %v6419_v61  ;;  %2796 = vmatprep.mubr.bf16.mxu1 %v8436_v18  ;;  %v6507_v61 = vcombine.low %v648_v56, %v652_v29  ;;  %v500_v46 = vld [vmem:[%s7957_s6 + $0x278] sm:$0xff] }
 0x17c   : > { %2964 = vmatprep.subr.bf16.mxu1 %v6412_v3  ;;  %v8478_v3 = vld [vmem:[%s7949_s4 + $0xc4] ss:$16 sps:$4 sm:$0xff]   ;;  %v6356_v33 = vcombine.high %v496_v19, %v500_v46  ;;  %v616_v47 = vld [vmem:[%s7957_s6 + $0x618] sm:$0xff]  ;;  %v6355_v56 = vcombine.low %v496_v19, %v500_v46 }
 0x17d   : > { %2852 = vmatpush1.bf16.msra.mxu0 %v6283_v11  ;;  %v632_v11 = vld [vmem:[%s7957_s6 + $0x698] sm:$0xff] }
 0x17e   : > { %2853 = vmatprep.subr.bf16.mxu0 %v6404_v13  ;;  %v6371_v13 = vcombine.low %v512_v51, %v516_v54  ;;  %v620_v48 = vld [vmem:[%s7957_s6 + $0x638] sm:$0xff] }
 0x17f   : > { %2965 = vmatpush1.bf16.msra.mxu1 %v6411_v31  ;;  %v636_v31 = vld [vmem:[%s7957_s6 + $0x6b8] sm:$0xff]  ;;  %v6475_v54 = vcombine.low %v616_v47, %v620_v48 }
 0x180   : > { %2966 = vmatprep.subr.bf16.mxu1 %v6532_v16  ;;  %2684 = vmatmul.mubr.bf16.gmra.mxu0 %v8444_v43  ;;  %v6499_v16 = vcombine.low %v640_v12, %v644_v15  ;;  %v6492_v35 = vcombine.high %v632_v11, %v636_v31  ;;  %v6491_v30 = vcombine.low %v632_v11, %v636_v31  ;;  %v6990_v12 = vld [vmem:[%s7966_s1 + $0xe4] ss:$16 sps:$4 sm:$0xff]  }
 0x181   : > { %2854 = vmatpush2.bf16.msra.mxu0 %v6403_v24  ;;  %2693 = vmatprep.mubr.bf16.mxu0 %v8454_v55  ;;  %v8492_v24 = vld [vmem:[%s7949_s4 + $0xc0] ss:$16 sps:$4 sm:$0xff]   ;;  %v7005_v15 = vld [vmem:[%s7966_s1 + $0x2e4] ss:$16 sps:$4 sm:$0xff]  }
 0x182   : > { %2797 = vmatmul.mubr.bf16.gmra.mxu1 %v8450_v38  ;;  %2855 = vmatprep.subr.bf16.mxu0 %v6396_v27  ;;  %v628_v27 = vld [vmem:[%s7957_s6 + $0x678] sm:$0xff]  ;;  %v6996_v11 = vld [vmem:[%s7966_s1 + $0xa4] ss:$16 sps:$4 sm:$0xff]  }
 0x183   : > { %2967 = vmatpush2.bf16.msra.mxu1 %v6531_v26  ;;  %2806 = vmatprep.mubr.bf16.mxu1 %v8460_v22  ;;  %v624_v26 = vld [vmem:[%s7957_s6 + $0x658] sm:$0xff] }
 0x184   : > { %2968 = vmatprep.subr.bf16.mxu1 %v6524_v28  ;;  %v8498_v28 = vld [vmem:[%s7949_s4 + $0xc8] ss:$16 sps:$4 sm:$0xff]   ;;  %v6483_v29 = vcombine.low %v624_v26, %v628_v27 }
 0x185   : > { %2856 = vmatpush2.bf16.msra.mxu0 %v6395_v5  ;;  %v6484_v5 = vcombine.high %v624_v26, %v628_v27  ;;  %v7023_v26 = vld [vmem:[%s7966_s1 + $0x284] ss:$16 sps:$4 sm:$0xff]  }
 0x186   : > { %2857 = vmatprep.subr.bf16.mxu0 %v6388_v8  ;;  %v492_v8 = vld [vmem:[%s7957_s6 + $0x238] sm:$0xff] }
 0x187   : > { %2969 = vmatpush2.bf16.msra.mxu1 %v6523_v52  ;;  %v488_v52 = vld [vmem:[%s7957_s6 + $0x218] sm:$0xff] }
 0x188   : > { %2970 = vmatprep.subr.bf16.mxu1 %v6516_v45  ;;  %2694 = vmatmul.mubr.bf16.gmra.mxu0 %v8468_v58  ;;  %v8508_v45 = vld [vmem:[%s7949_s4 + $0xec] ss:$16 sps:$4 sm:$0xff]   ;;  %v6347_v51 = vcombine.low %v488_v52, %v492_v8 }
 0x189   : > { %2858 = vmatpush2.bf16.msra.mxu0 %v6387_v62  ;;  %2703 = vmatprep.mubr.bf16.mxu0 %v8478_v3  ;;  %v6348_v62 = vcombine.high %v488_v52, %v492_v8 }
 0x18a   : > { %2807 = vmatmul.mubr.bf16.gmra.mxu1 %v8474_v14  ;;  %2859 = vmatprep.subr.bf16.mxu0 %v6380_v36  ;;  %v8514_v36 = vld [vmem:[%s7949_s4 + $0xe0] ss:$16 sps:$4 sm:$0xff]  }
 0x18b   : > { %2971 = vmatpush2.bf16.msra.mxu1 %v6515_v49  ;;  %2816 = vmatprep.mubr.bf16.mxu1 %v8484_v20  ;;  %v6476_v49 = vcombine.high %v616_v47, %v620_v48  ;;  %v7000_v47 = vld [vmem:[%s7966_s1 + $0x60] ss:$16 sps:$4 sm:$0xff]  }
 0x18c   : > { %2972 = vmatprep.subr.bf16.mxu1 %v6508_v50  ;;  %v8518_v50 = vld [vmem:[%s7949_s4 + $0xe8] ss:$16 sps:$4 sm:$0xff]  }
 0x18d   : > { %2860 = vmatpush2.bf16.msra.mxu0 %v6379_v60  ;;  %v6988_v60 = vld [vmem:[%s7966_s1 + $0xe0] ss:$16 sps:$4 sm:$0xff]  }
 0x18e   : > { %2861 = vmatprep.subr.bf16.mxu0 %v6372_v2  ;;  %v7003_v2 = vld [vmem:[%s7966_s1 + $0x2e0] ss:$16 sps:$4 sm:$0xff]  }
 0x18f   : > { %2973 = vmatpush2.bf16.msra.mxu1 %v6507_v61  ;;  %v6993_v61 = vld [vmem:[%s7966_s1 + $0xc4] ss:$16 sps:$4 sm:$0xff]  }
 0x190   : > { %2974 = vmatprep.subr.bf16.mxu1 %v6500_v21  ;;  %2704 = vmatmul.mubr.bf16.gmra.mxu0 %v8492_v24 }
 0x191   : > { %2862 = vmatpush2.bf16.msra.mxu0 %v6371_v13  ;;  %2713 = vmatprep.mubr.bf16.mxu0 %v8502_v34 }
 0x192   : > { %2817 = vmatmul.mubr.bf16.gmra.mxu1 %v8498_v28  ;;  %2863 = vmatprep.subr.bf16.mxu0 %v6364_v32  ;;  %v6994_v32 = vld [vmem:[%s7966_s1 + $0xa0] ss:$16 sps:$4 sm:$0xff]  }
 0x193   : > { %2975 = vmatpush2.bf16.msra.mxu1 %v6499_v16  ;;  %2826 = vmatprep.mubr.bf16.mxu1 %v8508_v45 }
 0x194   : > { %2976 = vmatprep.subr.bf16.mxu1 %v6492_v35 }
 0x195   : > { %2864 = vmatpush2.bf16.msra.mxu0 %v6363_v40  ;;  %v6997_v40 = vld [vmem:[%s7966_s1 + $0x80] ss:$16 sps:$4 sm:$0xff]  }
 0x196   : > { %2865 = vmatprep.subr.bf16.mxu0 %v6356_v33  ;;  %v7002_v33 = vld [vmem:[%s7966_s1 + $0x64] ss:$16 sps:$4 sm:$0xff]  }
 0x197   : > { %2977 = vmatpush2.bf16.msra.mxu1 %v6491_v30 }
 0x198   : > { %2978 = vmatprep.subr.bf16.mxu1 %v6484_v5  ;;  %2714 = vmatmul.mubr.bf16.gmra.mxu0 %v8514_v36 }
 0x199   : > { %2866 = vmatpush2.bf16.msra.mxu0 %v6355_v56  ;;  %2869 = vmatprep.mubr.bf16.mxu0 %v8334_v10 }
 0x19a   : > { %2827 = vmatmul.mubr.bf16.gmra.mxu1 %v8518_v50  ;;  %2867 = vmatprep.subr.bf16.mxu0 %v6348_v62  ;;  %v7035_v62 = vld [vmem:[%s7966_s1 + $0x244] ss:$16 sps:$4 sm:$0xff]  }
 0x19b   : > { %2979 = vmatpush2.bf16.msra.mxu1 %v6483_v29  ;;  %2982 = vmatprep.mubr.bf16.mxu1 %v8340_v63  ;;  %v6991_v63 = vld [vmem:[%s7966_s1 + $0xc0] ss:$16 sps:$4 sm:$0xff]  }
 0x19c   : > { %2980 = vmatprep.subr.bf16.mxu1 %v6476_v49 }
 0x19d   : > { %2868 = vmatpush2.bf16.msra.mxu0 %v6347_v51  ;;  %v7006_v51 = vld [vmem:[%s7966_s1 + $0x40] ss:$16 sps:$4 sm:$0xff]  }
 0x19e   : > { %4791 = vmatprep.subr.bf16.mxu0 %v6990_v12  ;;  %v7014_v12 = vld [vmem:[%s7966_s1 + $0x24] ss:$16 sps:$4 sm:$0xff]  }
 0x19f   : > { %2981 = vmatpush2.bf16.msra.mxu1 %v6475_v54 }
 0x1a0   : > { %4904 = vmatprep.subr.bf16.mxu1 %v7005_v15  ;;  %v8528_v21 = vpop.f32.mrf.mxu0  ;;  %2870 = vmatmul.mubr.bf16.vlgmr.msra.gmra.mxu0 %v8349_v7  ;;  %v7009_v7 = vld [vmem:[%s7966_s1 + $0x2c0] ss:$16 sps:$4 sm:$0xff]  }
 0x1a1   : > { %4792 = vmatpush1.bf16.msra.mxu0 %v6988_v60  ;;  %2879 = vmatprep.mubr.bf16.mxu0 %v8360_v17  ;;  %v6999_v17 = vld [vmem:[%s7966_s1 + $0x84] ss:$16 sps:$4 sm:$0xff]  }
 0x1a2   : > { %v8532_v10 = vpop.f32.mrf.mxu1  ;;  %2983 = vmatmul.mubr.bf16.vlgmr.msra.gmra.mxu1 %v8354_v9  ;;  %v8536_v25 = vpop.f32.mrf.mxu0  ;;  %4793 = vmatprep.subr.bf16.mxu0 %v6993_v61  ;;  %v7017_v9 = vld [vmem:[%s7966_s1 + $0x2a4] ss:$16 sps:$4 sm:$0xff]  }
 0x1a3   : > { %2992 = vmatprep.mubr.bf16.mxu1 %v8365_v42  ;;  %4905 = vmatpush1.bf16.msra.mxu1 %v7003_v2  ;;  %v7015_v42 = vld [vmem:[%s7966_s1 + $0x2a0] ss:$16 sps:$4 sm:$0xff]  }
 0x1a4   : > { %v8540_v31 = vpop.f32.mrf.mxu1  ;;  %v8544_v13 = vpop.f32.mrf.mxu0  ;;  %4906 = vmatprep.subr.bf16.mxu1 %v7011_v4  ;;  %v7012_v2 = vld [vmem:[%s7966_s1 + $0x20] ss:$16 sps:$4 sm:$0xff]  }
 0x1a5   : > { %4794 = vmatpush1.bf16.msra.mxu0 %v6991_v63 }
 0x1a6   : > { %v8547_v16 = vpop.f32.mrf.mxu1  ;;  %v8550_v35 = vpop.f32.mrf.mxu0  ;;  %4795 = vmatprep.subr.bf16.mxu0 %v6996_v11 }
 0x1a7   : > { %4907 = vmatpush1.bf16.msra.mxu1 %v7009_v7  ;;  %v7047_v7 = vld [vmem:[%s7966_s1 + $0x204] ss:$16 sps:$4 sm:$0xff]  }
 0x1a8   : > { %v8553_v19 = vpop.f32.mrf.mxu1  ;;  %v8556_v46 = vpop.f32.mrf.mxu0  ;;  %2880 = vmatmul.mubr.bf16.gmra.mxu0 %v8373_v57  ;;  %4908 = vmatprep.subr.bf16.mxu1 %v7017_v9  ;;  %v7021_v57 = vld [vmem:[%s7966_s1 + $0x280] ss:$16 sps:$4 sm:$0xff]  }
 0x1a9   : > { %4796 = vmatpush1.bf16.msra.mxu0 %v6994_v32  ;;  %2889 = vmatprep.mubr.bf16.mxu0 %v8384_v39  ;;  %v7008_v39 = vld [vmem:[%s7966_s1 + $0x44] ss:$16 sps:$4 sm:$0xff]   ;;  %v7018_v32 = vld [vmem:[%s7966_s1] ss:$16 sps:$4 sm:$0xff]  }
 0x1aa   : > { %v8560_v27 = vpop.f32.mrf.mxu1  ;;  %2993 = vmatmul.mubr.bf16.gmra.mxu1 %v8378_v0  ;;  %v8564_v30 = vpop.f32.mrf.mxu0  ;;  %4797 = vmatprep.subr.bf16.mxu0 %v6999_v17  ;;  %v7029_v0 = vld [vmem:[%s7966_s1 + $0x264] ss:$16 sps:$4 sm:$0xff]  }
 0x1ab   : > { %3002 = vmatprep.mubr.bf16.mxu1 %v8389_v44  ;;  %4909 = vmatpush1.bf16.msra.mxu1 %v7015_v42  ;;  %v7027_v44 = vld [vmem:[%s7966_s1 + $0x260] ss:$16 sps:$4 sm:$0xff]   ;;  %v7026_v42 = vld [vmem:[%s7966_s1 + $0x1e4] ss:$16 sps:$4 sm:$0xff]  }
 0x1ac   : > { %v8568_v5 = vpop.f32.mrf.mxu1  ;;  %v8572_v52 = vpop.f32.mrf.mxu0  ;;  %4910 = vmatprep.subr.bf16.mxu1 %v7023_v26 }
 0x1ad   : > { %4798 = vmatpush1.bf16.msra.mxu0 %v6997_v40 }
 0x1ae   : > { %v8575_v8 = vpop.f32.mrf.mxu1  ;;  %v8578_v48 = vpop.f32.mrf.mxu0  ;;  %4799 = vmatprep.subr.bf16.mxu0 %v7002_v33 }
 0x1af   : > { %4911 = vmatpush1.bf16.msra.mxu1 %v7021_v57  ;;  %v7024_v57 = vld [vmem:[%s7966_s1 + $0x1e0] ss:$16 sps:$4 sm:$0xff]  }
 0x1b0   : > { %v8581_v56 = vpop.f32.mrf.mxu1  ;;  %v8584_v29 = vpop.f32.mrf.mxu0  ;;  %2890 = vmatmul.mubr.bf16.gmra.mxu0 %v8397_v59  ;;  %4912 = vmatprep.subr.bf16.mxu1 %v7029_v0  ;;  %v7033_v59 = vld [vmem:[%s7966_s1 + $0x240] ss:$16 sps:$4 sm:$0xff]  }
 0x1b1   : > { %4800 = vmatpush1.bf16.msra.mxu0 %v7000_v47  ;;  %2899 = vmatprep.mubr.bf16.mxu0 %v8406_v41  ;;  %v7020_v41 = vld [vmem:[%s7966_s1 + $0x4] ss:$16 sps:$4 sm:$0xff]  }
 0x1b2   : > { %v8588_v49 = vpop.f32.mrf.mxu1  ;;  %3003 = vmatmul.mubr.bf16.gmra.mxu1 %v8402_v1  ;;  %v8592_v54 = vpop.f32.mrf.mxu0  ;;  %4801 = vmatprep.subr.bf16.mxu0 %v7008_v39  ;;  %v7041_v1 = vld [vmem:[%s7966_s1 + $0x224] ss:$16 sps:$4 sm:$0xff]   ;;  %v679_v39 = vlaneseq }
 0x1b3   : > { %3012 = vmatprep.mubr.bf16.mxu1 %v8412_v53  ;;  %4913 = vmatpush1.bf16.msra.mxu1 %v7027_v44  ;;  %v7039_v53 = vld [vmem:[%s7966_s1 + $0x220] ss:$16 sps:$4 sm:$0xff]  }
 0x1b4   : > { %v8596_v15 = vpop.f32.mrf.mxu1  ;;  %v8600_v60 = vpop.f32.mrf.mxu0  ;;  %4914 = vmatprep.subr.bf16.mxu1 %v7035_v62  ;;  %v7059_v62 = vld [vmem:[%s7966_s1 + $0x3c4] ss:$16 sps:$4 sm:$0xff]  }
 0x1b5   : > { %4802 = vmatpush1.bf16.msra.mxu0 %v7006_v51 }
 0x1b6   : > { %v8603_v61 = vpop.f32.mrf.mxu1  ;;  %v8606_v4 = vpop.f32.mrf.mxu0  ;;  %4803 = vmatprep.subr.bf16.mxu0 %v7014_v12  ;;  %v7030_v12 = vld [vmem:[%s7966_s1 + $0x1c0] ss:$16 sps:$4 sm:$0xff]  }
 0x1b7   : > { %4915 = vmatpush1.bf16.msra.mxu1 %v7033_v59 }
 0x1b8   : > { %v8609_v63 = vpop.f32.mrf.mxu1  ;;  %v8612_v11 = vpop.f32.mrf.mxu0  ;;  %2900 = vmatmul.mubr.bf16.gmra.mxu0 %v8420_v6  ;;  %4916 = vmatprep.subr.bf16.mxu1 %v7041_v1  ;;  %v7045_v6 = vld [vmem:[%s7966_s1 + $0x200] ss:$16 sps:$4 sm:$0xff]   ;;  %v7038_v1 = vld [vmem:[%s7966_s1 + $0x1a4] ss:$16 sps:$4 sm:$0xff]  }
 0x1b9   : > { %4804 = vmatpush1.bf16.msra.mxu0 %v7012_v2  ;;  %2909 = vmatprep.mubr.bf16.mxu0 %v8430_v37  ;;  %v7032_v37 = vld [vmem:[%s7966_s1 + $0x1c4] ss:$16 sps:$4 sm:$0xff]  }
 0x1ba   : > { %v8616_v9 = vpop.f32.mrf.mxu1  ;;  %3013 = vmatmul.mubr.bf16.gmra.mxu1 %v8426_v23  ;;  %v8620_v17 = vpop.f32.mrf.mxu0  ;;  %4805 = vmatprep.subr.bf16.mxu0 %v7020_v41  ;;  %v7053_v23 = vld [vmem:[%s7966_s1 + $0x3e4] ss:$16 sps:$4 sm:$0xff]   ;;  %v8656_v41 = vshrl.u32 %v679_v39, 7 }
 0x1bb   : > { %3022 = vmatprep.mubr.bf16.mxu1 %v8436_v18  ;;  %4917 = vmatpush1.bf16.msra.mxu1 %v7039_v53  ;;  %v7051_v18 = vld [vmem:[%s7966_s1 + $0x3e0] ss:$16 sps:$4 sm:$0xff]   ;;  %v7065_v53 = vld [vmem:[%s7966_s1 + $0x3a4] ss:$16 sps:$4 sm:$0xff]  }
 0x1bc   : > { %v8624_v26 = vpop.f32.mrf.mxu1  ;;  %v8628_v40 = vpop.f32.mrf.mxu0  ;;  %4918 = vmatprep.subr.bf16.mxu1 %v7047_v7  ;;  %10539 = vst [vmem:[#allocation27_spill] sm:$0xff] %v8656_v41 }
 0x1bd   : > { %4806 = vmatpush1.bf16.msra.mxu0 %v7018_v32  ;;  %v10485_v32 = vsub.s32 1, %v8656_v41 }
 0x1be   : > { %v8631_v33 = vpop.f32.mrf.mxu1  ;;  %v8634_v0 = vpop.f32.mrf.mxu0  ;;  %4807 = vmatprep.subr.bf16.mxu0 %v7026_v42 }
 0x1bf   : > { %4919 = vmatpush1.bf16.msra.mxu1 %v7045_v6 }
 0x1c0   : > { %v8637_v47 = vpop.f32.mrf.mxu1  ;;  %v8640_v44 = vpop.f32.mrf.mxu0  ;;  %2910 = vmatmul.mubr.bf16.gmra.mxu0 %v8444_v43  ;;  %4920 = vmatprep.subr.bf16.mxu1 %v7053_v23  ;;  %v7057_v43 = vld [vmem:[%s7966_s1 + $0x3c0] ss:$16 sps:$4 sm:$0xff]  }
 0x1c1   : > { %4808 = vmatpush2.bf16.msra.mxu0 %v7024_v57  ;;  %2919 = vmatprep.mubr.bf16.mxu0 %v8454_v55  ;;  %v7036_v55 = vld [vmem:[%s7966_s1 + $0x1a0] ss:$16 sps:$4 sm:$0xff]  }
 0x1c2   : > { %v8644_v51 = vpop.f32.mrf.mxu1  ;;  %3023 = vmatmul.mubr.bf16.gmra.mxu1 %v8450_v38  ;;  %v8648_v59 = vpop.f32.mrf.mxu0  ;;  %4809 = vmatprep.subr.bf16.mxu0 %v7032_v37  ;;  %v7063_v23 = vld [vmem:[%s7966_s1 + $0x3a0] ss:$16 sps:$4 sm:$0xff]   ;;  %v7071_v37 = vld [vmem:[%s7966_s1 + $0x384] ss:$16 sps:$4 sm:$0xff]  }
 0x1c3   : > { %3032 = vmatprep.mubr.bf16.mxu1 %v8460_v22  ;;  %4921 = vmatpush2.bf16.msra.mxu1 %v7051_v18  ;;  %v7044_v22 = vld [vmem:[%s7966_s1 + $0x184] ss:$16 sps:$4 sm:$0xff]  }
 0x1c4   : > { %v8652_v2 = vpop.f32.mrf.mxu1  ;;  %v8658_v38 = vpop.f32.mrf.mxu0  ;;  %4922 = vmatprep.subr.bf16.mxu1 %v7059_v62  ;;  %v8677_v18 = vld [vmem:[%s329_s9] sm:$0xff] }
 0x1c5   : > { %4810 = vmatpush2.bf16.msra.mxu0 %v7030_v12  ;;  %v7042_v62 = vld [vmem:[%s7966_s1 + $0x180] ss:$16 sps:$4 sm:$0xff]   ;;  %v8686_v12 = vrot.slane %v8677_v18, %v10485_v32 }
 0x1c6   : > { %v8661_v7 = vpop.f32.mrf.mxu1  ;;  %v8665_v42 = vpop.f32.mrf.mxu0  ;;  %4811 = vmatprep.subr.bf16.mxu0 %v7038_v1  ;;  %v7050_v1 = vld [vmem:[%s7966_s1 + $0x164] ss:$16 sps:$4 sm:$0xff]  }
 0x1c7   : > { %4923 = vmatpush2.bf16.msra.mxu1 %v7057_v43 }
 0x1c8   : > { %v8668_v6 = vpop.f32.mrf.mxu1  ;;  %v8671_v57 = vpop.f32.mrf.mxu0  ;;  %2920 = vmatmul.mubr.bf16.gmra.mxu0 %v8468_v58  ;;  %4924 = vmatprep.subr.bf16.mxu1 %v7065_v53  ;;  %v7056_v53 = vld [vmem:[%s7966_s1 + $0x144] ss:$16 sps:$4 sm:$0xff]  }
 0x1c9   : > { %10540 = vst [vmem:[#allocation28_spill] sm:$0xff] %v8671_v57  ;;  %4812 = vmatpush2.bf16.msra.mxu0 %v7036_v55  ;;  %2929 = vmatprep.mubr.bf16.mxu0 %v8478_v3  ;;  %v2200_v55 = vadd.f32 %v8550_v35, %v8686_v12  ;;  %v7072_v35 = vld [vmem:[%s7966_s1 + $0x360] ss:$16 sps:$4 sm:$0xff]  }
 0x1ca   : > { %v8679_v39 = vpop.f32.mrf.mxu1  ;;  %3033 = vmatmul.mubr.bf16.gmra.mxu1 %v8474_v14  ;;  %v8688_v58 = vpop.f32.mrf.mxu0  ;;  %4813 = vmatprep.subr.bf16.mxu0 %v7044_v22  ;;  %v7069_v14 = vld [vmem:[%s7966_s1 + $0x380] ss:$16 sps:$4 sm:$0xff]   ;;  %v7074_v22 = vld [vmem:[%s7966_s1 + $0x364] ss:$16 sps:$4 sm:$0xff]  }
 0x1cb   : > { %10541 = vst [vmem:[#allocation29_spill] sm:$0xff] %v8679_v39  ;;  %3042 = vmatprep.mubr.bf16.mxu1 %v8484_v20  ;;  %4925 = vmatpush2.bf16.msra.mxu1 %v7063_v23  ;;  %v7048_v39 = vld [vmem:[%s7966_s1 + $0x160] ss:$16 sps:$4 sm:$0xff]   ;;  %v2196_v20 = vadd.f32 %v8536_v25, %v8686_v12  ;;  %v7077_v25 = vld [vmem:[%s7966_s1 + $0x344] ss:$16 sps:$4 sm:$0xff]  }
 0x1cc   : > { %v8692_v43 = vpop.f32.mrf.mxu1  ;;  %v8699_v32 = vpop.f32.mrf.mxu0  ;;  %4926 = vmatprep.subr.bf16.mxu1 %v7071_v37  ;;  %v10545_v37 = vsub.s32 0, %v8656_v41 }
 0x1cd   : > { %10542 = vst [vmem:[#allocation30_spill] sm:$0xff] %v8692_v43  ;;  %4814 = vmatpush2.bf16.msra.mxu0 %v7042_v62  ;;  %v2313_v62 = vadd.f32 %v8553_v19, %v2200_v55  ;;  %v2210_v55 = vadd.f32 %v8578_v48, %v8686_v12 }
 0x1ce   : > { %v8702_v3 = vpop.f32.mrf.mxu1  ;;  %v8707_v23 = vpop.f32.mrf.mxu0  ;;  %4815 = vmatprep.subr.bf16.mxu0 %v7050_v1  ;;  %v8716_v43 = vrot.slane %v8677_v18, %v10545_v37 }
 0x1cf   : > { %10543 = vst [vmem:[#allocation31_spill] sm:$0xff] %v8702_v3  ;;  %4927 = vmatpush2.bf16.msra.mxu1 %v7069_v14  ;;  %v7054_v14 = vld [vmem:[%s7966_s1 + $0x140] ss:$16 sps:$4 sm:$0xff]  }
 0x1d0   : > { %v8710_v57 = vpop.f32.mrf.mxu1  ;;  %v8719_v3 = vpop.f32.mrf.mxu0  ;;  %2930 = vmatmul.mubr.bf16.gmra.mxu0 %v8492_v24  ;;  %4928 = vmatprep.subr.bf16.mxu1 %v7074_v22  ;;  %v2198_v37 = vadd.f32 %v8544_v13, %v8716_v43  ;;  %v7062_v24 = vld [vmem:[%s7966_s1 + $0x124] ss:$16 sps:$4 sm:$0xff]   ;;  %v3072_v13 = vmax.f32 %v2313_v62, 0.0  ;;  %v2323_v62 = vadd.f32 %v8581_v56, %v2210_v55  ;;  %v7066_v56 = vld [vmem:[%s7966_s1 + $0x100] ss:$16 sps:$4 sm:$0xff]  }
 0x1d1   : > { %10544 = vst [vmem:[#allocation32_spill] sm:$0xff] %v8710_v57  ;;  %4816 = vmatpush2.bf16.msra.mxu0 %v7048_v39  ;;  %v2309_v57 = vadd.f32 %v8540_v31, %v2196_v20  ;;  %2939 = vmatprep.mubr.bf16.mxu0 %v8502_v34  ;;  %v2194_v31 = vadd.f32 %v8528_v21, %v8716_v43  ;;  %v7080_v34 = vld [vmem:[%s7966_s1 + $0x324] ss:$16 sps:$4 sm:$0xff]  }
 0x1d2   : > { %v8723_v1 = vpop.f32.mrf.mxu1  ;;  %3043 = vmatmul.mubr.bf16.gmra.mxu1 %v8498_v28  ;;  %v8730_v19 = vpop.f32.mrf.mxu0  ;;  %4817 = vmatprep.subr.bf16.mxu0 %v7056_v53  ;;  %v7075_v28 = vld [vmem:[%s7966_s1 + $0x340] ss:$16 sps:$4 sm:$0xff]   ;;  %v2206_v53 = vadd.f32 %v8564_v30, %v8686_v12  ;;  %v7068_v21 = vld [vmem:[%s7966_s1 + $0x104] ss:$16 sps:$4 sm:$0xff]  }
 0x1d3   : > { %10546 = vst [vmem:[#allocation33_spill] sm:$0xff] %v8723_v1  ;;  %3052 = vmatprep.mubr.bf16.mxu1 %v8508_v45  ;;  %4929 = vmatpush2.bf16.msra.mxu1 %v7072_v35  ;;  %v7060_v45 = vld [vmem:[%s7966_s1 + $0x120] ss:$16 sps:$4 sm:$0xff]   ;;  %v3064_v20 = vmax.f32 %v2309_v57, 0.0  ;;  %v2311_v35 = vadd.f32 %v8547_v16, %v2198_v37  ;;  %v2307_v30 = vadd.f32 %v8532_v10, %v2194_v31  ;;  %v7083_v16 = vld [vmem:[%s7966_s1 + $0x304] ss:$16 sps:$4 sm:$0xff]  }
 0x1d4   : > { %v8736_v22 = vpop.f32.mrf.mxu1  ;;  %v8742_v39 = vpop.f32.mrf.mxu0  ;;  %4930 = vmatprep.subr.bf16.mxu1 %v7077_v25  ;;  %v2208_v10 = vadd.f32 %v8572_v52, %v8716_v43  ;;  %v2204_v52 = vadd.f32 %v8556_v46, %v8716_v43 }
 0x1d5   : > { %10547 = vst [vmem:[#allocation34_spill] sm:$0xff] %v8742_v39  ;;  %4818 = vmatpush2.bf16.msra.mxu0 %v7054_v14  ;;  %v7078_v39 = vld [vmem:[%s7966_s1 + $0x320] ss:$16 sps:$4 sm:$0xff]   ;;  %v8762_v57 = vpack.c.bf16 %v3072_v13, %v3064_v20  ;;  %v2319_v14 = vadd.f32 %v8568_v5, %v2206_v53  ;;  %v7086_v5 = vld [vmem:[%s7966_s1 + $0x4e4] ss:$16 sps:$4 sm:$0xff]  }
 0x1d6   : > { %v8747_v48 = vpop.f32.mrf.mxu1  ;;  %v8751_v1 = vpop.f32.mrf.mxu0  ;;  %4819 = vmatprep.subr.bf16.mxu0 %v7062_v24  ;;  %v3071_v24 = vmax.f32 %v2311_v35, 0.0  ;;  %v7081_v13 = vld [vmem:[%s7966_s1 + $0x300] ss:$16 sps:$4 sm:$0xff]   ;;  %v7134_v20 = vld [vmem:[%s7966_s1 + $0x6e4] ss:$16 sps:$4 sm:$0xff]  }
 0x1d7   : > { %10548 = vst [vmem:[#allocation35_spill] sm:$0xff] %v8747_v48  ;;  %4931 = vmatpush2.bf16.msra.mxu1 %v7075_v28  ;;  %10549 = vst [vmem:[#allocation36_spill] sm:$0xff] %v8762_v57  ;;  %v3088_v28 = vmax.f32 %v2323_v62, 0.0  ;;  %v3080_v35 = vmax.f32 %v2319_v14, 0.0  ;;  %v10552_v14 = vsub.s32 3, %v8656_v41 }
 0x1d8   : > { %v8755_v25 = vpop.f32.mrf.mxu1  ;;  %v8759_v48 = vpop.f32.mrf.mxu0  ;;  %2940 = vmatmul.mubr.bf16.gmra.mxu0 %v8514_v36  ;;  %4932 = vmatprep.subr.bf16.mxu1 %v7080_v34  ;;  %v2220_v36 = vadd.f32 %v8606_v4, %v8686_v12  ;;  %v3063_v34 = vmax.f32 %v2307_v30, 0.0  ;;  %v2216_v4 = vadd.f32 %v8592_v54, %v8686_v12  ;;  %v2321_v30 = vadd.f32 %v8575_v8, %v2208_v10  ;;  %v7089_v54 = vld [vmem:[%s7966_s1 + $0x4c4] ss:$16 sps:$4 sm:$0xff]  }
 0x1d9   : > { %4820 = vmatpush2.bf16.msra.mxu0 %v7060_v45  ;;  %4823 = vmatprep.mubr.bf16.mxu0 %v8762_v57  ;;  %v10487_v45 = vsub.s32 2, %v8656_v41 }
 0x1da   : > { %v8766_v37 = vpop.f32.mrf.mxu1  ;;  %3053 = vmatmul.mubr.bf16.gmra.mxu1 %v8518_v50  ;;  %v8775_v55 = vpop.f32.mrf.mxu0  ;;  %4821 = vmatprep.subr.bf16.mxu0 %v7068_v21  ;;  %v8793_v62 = vpack.c.bf16 %v3071_v24, %v3063_v34  ;;  %v2333_v46 = vadd.f32 %v8609_v63, %v2220_v36  ;;  %v2317_v24 = vadd.f32 %v8560_v27, %v2204_v52  ;;  %v7087_v27 = vld [vmem:[%s7966_s1 + $0x4c0] ss:$16 sps:$4 sm:$0xff]   ;;  %v7092_v52 = vld [vmem:[%s7966_s1 + $0x4a4] ss:$16 sps:$4 sm:$0xff]  }
 0x1db   : > { %4933 = vmatpush2.bf16.msra.mxu1 %v7078_v39  ;;  %v7084_v39 = vld [vmem:[%s7966_s1 + $0x4e0] ss:$16 sps:$4 sm:$0xff]   ;;  %v2329_v8 = vadd.f32 %v8596_v15, %v2216_v4  ;;  %v8814_v63 = vrot.slane %v8677_v18, %v10487_v45  ;;  %v2218_v36 = vadd.f32 %v8600_v60, %v8716_v43  ;;  %v2214_v15 = vadd.f32 %v8584_v29, %v8716_v43 }
 0x1dc   : > { %v8778_v31 = vpop.f32.mrf.mxu1  ;;  %v8786_v53 = vpop.f32.mrf.mxu0  ;;  %4934 = vmatprep.subr.bf16.mxu1 %v7083_v16  ;;  %10550 = vst [vmem:[#allocation37_spill] sm:$0xff] %v8793_v62  ;;  %v8802_v16 = vpack.c.bf16 %v3088_v28, %v3080_v35  ;;  %v3087_v28 = vmax.f32 %v2321_v30, 0.0  ;;  %v2230_v4 = vadd.f32 %v8634_v0, %v8686_v12  ;;  %v3079_v35 = vmax.f32 %v2317_v24, 0.0 }
 0x1dd   : > { %4822 = vmatpush2.bf16.msra.mxu0 %v7066_v56  ;;  %v8807_v56 = vrot.slane %v8677_v18, %v10552_v14  ;;  %v3096_v14 = vmax.f32 %v2329_v8, 0.0  ;;  %v2331_v45 = vadd.f32 %v8603_v61, %v2218_v36  ;;  %v2226_v29 = vadd.f32 %v8620_v17, %v8686_v12  ;;  %v7095_v61 = vld [vmem:[%s7966_s1 + $0x484] ss:$16 sps:$4 sm:$0xff]  }
 0x1de   : > { %v8790_v21 = vpop.f32.mrf.mxu1  ;;  %v8797_v50 = vpop.f32.mrf.mxu0  ;;  %5017 = vmatprep.subr.bf16.mxu0 %v7086_v5  ;;  %10551 = vst [vmem:[#allocation38_spill] sm:$0xff] %v8802_v16  ;;  %v8833_v0 = vpack.c.bf16 %v3087_v28, %v3079_v35  ;;  %v2228_v24 = vadd.f32 %v8628_v40, %v8716_v43  ;;  %v2343_v17 = vadd.f32 %v8637_v47, %v2230_v4  ;;  %v7093_v47 = vld [vmem:[%s7966_s1 + $0x480] ss:$16 sps:$4 sm:$0xff]  }
 0x1df   : > { %4935 = vmatpush2.bf16.msra.mxu1 %v7081_v13  ;;  %v3104_v13 = vmax.f32 %v2333_v46, 0.0  ;;  %v2224_v28 = vadd.f32 %v8612_v11, %v8716_v43  ;;  %v3103_v40 = vmax.f32 %v2331_v45, 0.0  ;;  %v2240_v11 = vadd.f32 %v8665_v42, %v8686_v12 }
 0x1e0   : > { %v8800_v57 = vpop.f32.mrf.mxu1  ;;  %v2419_v10 = vpop.f32.mrf.mxu0  ;;  %4824 = vmatmul.mubr.bf16.vlgmr.msra.gmra.mxu0 %v8793_v62  ;;  %5130 = vmatprep.subr.bf16.mxu1 %v7134_v20 }
 0x1e1   : > { %4833 = vmatprep.mubr.bf16.mxu0 %v8802_v16  ;;  %5018 = vmatpush1.bf16.msra.mxu0 %v7084_v39  ;;  %v2420_v39 = vadd.f32 %v2419_v10, %v8814_v63  ;;  %v7090_v16 = vld [vmem:[%s7966_s1 + $0x4a0] ss:$16 sps:$4 sm:$0xff]   ;;  %v8838_v10 = vpack.c.bf16 %v3104_v13, %v3096_v14  ;;  %v2339_v13 = vadd.f32 %v8624_v26, %v2226_v29  ;;  %v7098_v14 = vld [vmem:[%s7966_s1 + $0x464] ss:$16 sps:$4 sm:$0xff]  }
 0x1e2   : > { %v2532_v5 = vpop.f32.mrf.mxu1  ;;  %v2421_v34 = vpop.f32.mrf.mxu0  ;;  %5019 = vmatprep.subr.bf16.mxu0 %v7089_v54 }
 0x1e3   : > { %v2422_v20 = vadd.f32 %v2421_v34, %v8807_v56  ;;  %v2327_v34 = vadd.f32 %v8588_v49, %v2214_v15  ;;  %v2533_v49 = vadd.f32 %v2532_v5, %v2420_v39  ;;  %v3120_v39 = vmax.f32 %v2343_v17, 0.0 }
 0x1e4   : > { %v2534_v60 = vpop.f32.mrf.mxu1  ;;  %v2423_v30 = vpop.f32.mrf.mxu0 }
 0x1e5   : > { %v2424_v46 = vadd.f32 %v2423_v30, %v8814_v63  ;;  %5020 = vmatpush1.bf16.msra.mxu0 %v7087_v27  ;;  %v2535_v36 = vadd.f32 %v2534_v60, %v2422_v20  ;;  %v3095_v4 = vmax.f32 %v2327_v34, 0.0  ;;  %v2341_v20 = vadd.f32 %v8631_v33, %v2228_v24 }
 0x1e6   : > { %v2536_v54 = vpop.f32.mrf.mxu1  ;;  %v2425_v8 = vpop.f32.mrf.mxu0  ;;  %5021 = vmatprep.subr.bf16.mxu0 %v7092_v52  ;;  %v3065_v33 = vmax.f32 %v2533_v49, 0.0  ;;  %v3112_v24 = vmax.f32 %v2339_v13, 0.0  ;;  %v7101_v49 = vld [vmem:[%s7966_s1 + $0x444] ss:$16 sps:$4 sm:$0xff]  }
 0x1e7   : > { %v2537_v30 = vadd.f32 %v2536_v54, %v2424_v46  ;;  %v2426_v27 = vadd.f32 %v2425_v8, %v8807_v56  ;;  %v3066_v45 = vmax.f32 %v2535_v36, 0.0  ;;  %v2236_v46 = vadd.f32 %v8648_v59, %v8686_v12 }
 0x1e8   : > { %v2538_v62 = vpop.f32.mrf.mxu1  ;;  %v2429_v15 = vpop.f32.mrf.mxu0  ;;  %4834 = vmatmul.mubr.bf16.gmra.mxu0 %v8833_v0  ;;  %v8858_v34 = vpack.c.bf16 %v3103_v40, %v3095_v4  ;;  %v3119_v36 = vmax.f32 %v2341_v20, 0.0  ;;  %v2234_v59 = vadd.f32 %v8640_v44, %v8716_v43  ;;  %v8873_v4 = vpack.c.bf16 %v3120_v39, %v3112_v24  ;;  %v7140_v20 = vld [vmem:[%s7966_s1 + $0x6c4] ss:$16 sps:$4 sm:$0xff]   ;;  %v7099_v39 = vld [vmem:[%s7966_s1 + $0x440] ss:$16 sps:$4 sm:$0xff]  }
 0x1e9   : > { %v2539_v52 = vadd.f32 %v2538_v62, %v2426_v27  ;;  %4843 = vmatprep.mubr.bf16.mxu0 %v8838_v10  ;;  %5022 = vmatpush1.bf16.msra.mxu0 %v7090_v16  ;;  %v3073_v5 = vmax.f32 %v2537_v30, 0.0  ;;  %v2337_v16 = vadd.f32 %v8616_v9, %v2224_v28  ;;  %v2430_v42 = vadd.f32 %v2429_v15, %v8814_v63  ;;  %v7096_v9 = vld [vmem:[%s7966_s1 + $0x460] ss:$16 sps:$4 sm:$0xff]  }
 0x1ea   : > { %v2542_v35 = vpop.f32.mrf.mxu1  ;;  %v2431_v60 = vpop.f32.mrf.mxu0  ;;  %5023 = vmatprep.subr.bf16.mxu0 %v7095_v61  ;;  %v2353_v30 = vadd.f32 %v8668_v6, %v2240_v11  ;;  %v7132_v15 = vld [vmem:[%s7966_s1 + $0x6e0] ss:$16 sps:$4 sm:$0xff]   ;;  %v2349_v6 = vadd.f32 %v8652_v2, %v2236_v46 }
 0x1eb   : > { %v3074_v26 = vmax.f32 %v2539_v52, 0.0  ;;  %v2432_v62 = vadd.f32 %v2431_v60, %v8807_v56  ;;  %v8867_v27 = vpack.c.bf16 %v3073_v5, %v3065_v33  ;;  %v3111_v44 = vmax.f32 %v2337_v16, 0.0  ;;  %v7104_v16 = vld [vmem:[%s7966_s1 + $0x424] ss:$16 sps:$4 sm:$0xff]   ;;  %v7138_v46 = vld [vmem:[%s7966_s1 + $0x6c0] ss:$16 sps:$4 sm:$0xff]  }
 0x1ec   : > { %v2544_v29 = vpop.f32.mrf.mxu1  ;;  %v2433_v54 = vpop.f32.mrf.mxu0  ;;  %v2543_v11 = vadd.f32 %v2542_v35, %v2430_v42  ;;  %v2238_v60 = vadd.f32 %v8658_v38, %v8716_v43  ;;  %v3136_v2 = vmax.f32 %v2353_v30, 0.0  ;;  %v2250_v35 = vadd.f32 %v8707_v23, %v8686_v12 }
 0x1ed   : > { %v2434_v8 = vadd.f32 %v2433_v54, %v8814_v63  ;;  %v8861_v17 = vpack.c.bf16 %v3074_v26, %v3066_v45  ;;  %5024 = vmatpush1.bf16.msra.mxu0 %v7093_v47  ;;  %v2545_v40 = vadd.f32 %v2544_v29, %v2432_v62  ;;  %v8883_v26 = vpack.c.bf16 %v3119_v36, %v3111_v44  ;;  %v7144_v44 = vld [vmem:[%s7966_s1 + $0x6a0] ss:$16 sps:$4 sm:$0xff]  }
 0x1ee   : > { %v2546_v61 = vpop.f32.mrf.mxu1  ;;  %v2435_v28 = vpop.f32.mrf.mxu0  ;;  %5025 = vmatprep.subr.bf16.mxu0 %v7098_v14  ;;  %v8890_v38 = vadd.f32 %v8644_v51, %v2234_v59  ;;  %v2246_v23 = vadd.f32 %v8688_v58, %v8686_v12  ;;  %v2351_v51 = vadd.f32 %v8661_v7, %v2238_v60  ;;  %v2248_v59 = vadd.f32 %v8699_v32, %v8716_v43  ;;  %v10553_v58 = vld [vmem:[#allocation32_spill] sm:$0xff]  ;;  %v7107_v7 = vld [vmem:[%s7966_s1 + $0x404] ss:$16 sps:$4 sm:$0xff]  }
 0x1ef   : > { %v2547_v13 = vadd.f32 %v2546_v61, %v2434_v8  ;;  %v2436_v52 = vadd.f32 %v2435_v28, %v8807_v56  ;;  %4936 = vmatprep.mubr.bf16.mxu1 %v8861_v17  ;;  %v3082_v33 = vmax.f32 %v2545_v40, 0.0  ;;  %v7146_v8 = vld [vmem:[%s7966_s1 + $0x6a4] ss:$16 sps:$4 sm:$0xff]   ;;  %v3128_v61 = vmax.f32 %v2349_v6, 0.0  ;;  %v7102_v40 = vld [vmem:[%s7966_s1 + $0x420] ss:$16 sps:$4 sm:$0xff]  }
 0x1f0   : > { %v2548_v47 = vpop.f32.mrf.mxu1  ;;  %v2439_v5 = vpop.f32.mrf.mxu0  ;;  %4844 = vmatmul.mubr.bf16.gmra.mxu0 %v8858_v34  ;;  %4937 = vmatmul.mubr.bf16.vlgmr.msra.gmra.mxu1 %v8867_v27  ;;  %v7152_v60 = vld [vmem:[%s7966_s1 + $0x684] ss:$16 sps:$4 sm:$0xff]  }
 0x1f1   : > { %v2549_v14 = vadd.f32 %v2548_v47, %v2436_v52  ;;  %4853 = vmatprep.mubr.bf16.mxu0 %v8873_v4  ;;  %5026 = vmatpush1.bf16.msra.mxu0 %v7096_v9  ;;  %v3089_v62 = vmax.f32 %v2547_v13, 0.0  ;;  %v3081_v9 = vmax.f32 %v2543_v11, 0.0  ;;  %v2440_v36 = vadd.f32 %v2439_v5, %v8814_v63 }
 0x1f2   : > { %v2552_v45 = vpop.f32.mrf.mxu1  ;;  %v2441_v29 = vpop.f32.mrf.mxu0  ;;  %5027 = vmatprep.subr.bf16.mxu0 %v7101_v49  ;;  %5131 = vmatpush1.bf16.msra.mxu1 %v7132_v15  ;;  %v2363_v13 = vadd.f32 %v10553_v58, %v2250_v35  ;;  %v7158_v58 = vld [vmem:[%s7966_s1 + $0x664] ss:$16 sps:$4 sm:$0xff]  }
 0x1f3   : > { %v3090_v42 = vmax.f32 %v2549_v14, 0.0  ;;  %v2442_v54 = vadd.f32 %v2441_v29, %v8807_v56  ;;  %5132 = vmatprep.subr.bf16.mxu1 %v7140_v20  ;;  %v8905_v52 = vpack.c.bf16 %v3089_v62, %v3081_v9  ;;  %v8907_v20 = vpack.c.bf16 %v3136_v2, %v3128_v61  ;;  %v10554_v14 = vld [vmem:[#allocation30_spill] sm:$0xff]  ;;  %v10555_v29 = vld [vmem:[#allocation28_spill] sm:$0xff] }
 0x1f4   : > { %v2554_v24 = vpop.f32.mrf.mxu1  ;;  %v2443_v30 = vpop.f32.mrf.mxu0  ;;  %v2553_v35 = vadd.f32 %v2552_v45, %v2440_v36  ;;  %v3135_v62 = vmax.f32 %v2351_v51, 0.0  ;;  %v3127_v45 = vmax.f32 %v8890_v38, 0.0  ;;  %v7150_v9 = vld [vmem:[%s7966_s1 + $0x680] ss:$16 sps:$4 sm:$0xff]   ;;  %v10556_v36 = vld [vmem:[#allocation31_spill] sm:$0xff] }
 0x1f5   : > { %v2444_v28 = vadd.f32 %v2443_v30, %v8814_v63  ;;  %v8901_v15 = vpack.c.bf16 %v3090_v42, %v3082_v33  ;;  %5028 = vmatpush1.bf16.msra.mxu0 %v7099_v39  ;;  %v2555_v32 = vadd.f32 %v2554_v24, %v2442_v54  ;;  %v2359_v39 = vadd.f32 %v10554_v14, %v2246_v23  ;;  %v7105_v42 = vld [vmem:[%s7966_s1 + $0x400] ss:$16 sps:$4 sm:$0xff]   ;;  %v7110_v54 = vld [vmem:[%s7966_s1 + $0x5e4] ss:$16 sps:$4 sm:$0xff]  }
 0x1f6   : > { %v2556_v49 = vpop.f32.mrf.mxu1  ;;  %v2445_v47 = vpop.f32.mrf.mxu0  ;;  %5029 = vmatprep.subr.bf16.mxu0 %v7104_v16  ;;  %5133 = vmatpush1.bf16.msra.mxu1 %v7138_v46  ;;  %v2244_v16 = vadd.f32 %v10555_v29, %v8716_v43  ;;  %v3152_v24 = vmax.f32 %v2363_v13, 0.0  ;;  %v2361_v30 = vadd.f32 %v10556_v36, %v2248_v59  ;;  %v2256_v13 = vadd.f32 %v8730_v19, %v8686_v12  ;;  %v10557_v59 = vld [vmem:[#allocation29_spill] sm:$0xff] }
 0x1f7   : > { %v2557_v6 = vadd.f32 %v2556_v49, %v2444_v28  ;;  %v2446_v11 = vadd.f32 %v2445_v47, %v8807_v56  ;;  %4946 = vmatprep.mubr.bf16.mxu1 %v8901_v15  ;;  %5134 = vmatprep.subr.bf16.mxu1 %v7146_v8  ;;  %v2260_v8 = vadd.f32 %v8751_v1, %v8686_v12  ;;  %v3098_v51 = vmax.f32 %v2555_v32, 0.0 }
 0x1f8   : > { %v2558_v5 = vpop.f32.mrf.mxu1  ;;  %v2449_v2 = vpop.f32.mrf.mxu0  ;;  %4854 = vmatmul.mubr.bf16.gmra.mxu0 %v8883_v26  ;;  %4947 = vmatmul.mubr.bf16.gmra.mxu1 %v8905_v52  ;;  %v3144_v38 = vmax.f32 %v2359_v39, 0.0  ;;  %v3097_v1 = vmax.f32 %v2553_v35, 0.0  ;;  %v2357_v32 = vadd.f32 %v10557_v59, %v2244_v16  ;;  %v3151_v29 = vmax.f32 %v2361_v30, 0.0  ;;  %v7170_v59 = vld [vmem:[%s7966_s1 + $0x624] ss:$16 sps:$4 sm:$0xff]  }
 0x1f9   : > { %v2559_v46 = vadd.f32 %v2558_v5, %v2446_v11  ;;  %4863 = vmatprep.mubr.bf16.mxu0 %v8907_v20  ;;  %5030 = vmatpush1.bf16.msra.mxu0 %v7102_v40  ;;  %v3105_v61 = vmax.f32 %v2557_v6, 0.0  ;;  %v2450_v47 = vadd.f32 %v2449_v2, %v8814_v63  ;;  %v2373_v19 = vadd.f32 %v8755_v25, %v2260_v8  ;;  %v7113_v2 = vld [vmem:[%s7966_s1 + $0x5c4] ss:$16 sps:$4 sm:$0xff]  }
 0x1fa   : > { %v2562_v33 = vpop.f32.mrf.mxu1  ;;  %v2451_v23 = vpop.f32.mrf.mxu0  ;;  %5031 = vmatprep.subr.bf16.mxu0 %v7107_v7  ;;  %5135 = vmatpush1.bf16.msra.mxu1 %v7144_v44  ;;  %v8932_v44 = vpack.c.bf16 %v3135_v62, %v3127_v45  ;;  %v8942_v35 = vpack.c.bf16 %v3152_v24, %v3144_v38  ;;  %v7156_v62 = vld [vmem:[%s7966_s1 + $0x660] ss:$16 sps:$4 sm:$0xff]   ;;  %v7164_v25 = vld [vmem:[%s7966_s1 + $0x644] ss:$16 sps:$4 sm:$0xff]  }
 0x1fb   : > { %v3106_v28 = vmax.f32 %v2559_v46, 0.0  ;;  %v2452_v49 = vadd.f32 %v2451_v23, %v8807_v56  ;;  %5136 = vmatprep.subr.bf16.mxu1 %v7152_v60  ;;  %v7108_v60 = vld [vmem:[%s7966_s1 + $0x5e0] ss:$16 sps:$4 sm:$0xff]   ;;  %v8940_v14 = vpack.c.bf16 %v3105_v61, %v3097_v1  ;;  %v2563_v8 = vadd.f32 %v2562_v33, %v2450_v47 }
 0x1fc   : > { %v2564_v40 = vpop.f32.mrf.mxu1  ;;  %v2453_v7 = vpop.f32.mrf.mxu0  ;;  %v2254_v61 = vadd.f32 %v8719_v3, %v8716_v43  ;;  %v3168_v33 = vmax.f32 %v2373_v19, 0.0  ;;  %v7162_v3 = vld [vmem:[%s7966_s1 + $0x640] ss:$16 sps:$4 sm:$0xff]   ;;  %v10559_v19 = vld [vmem:[#allocation33_spill] sm:$0xff] }
 0x1fd   : > { %v2454_v6 = vadd.f32 %v2453_v7, %v8814_v63  ;;  %v8936_v5 = vpack.c.bf16 %v3106_v28, %v3098_v51  ;;  %5032 = vmatpush1.bf16.msra.mxu0 %v7105_v42  ;;  %v2565_v16 = vadd.f32 %v2564_v40, %v2452_v49  ;;  %v2369_v42 = vadd.f32 %v8736_v22, %v2256_v13  ;;  %v7111_v22 = vld [vmem:[%s7966_s1 + $0x5c0] ss:$16 sps:$4 sm:$0xff]  }
 0x1fe   : > { %v2566_v11 = vpop.f32.mrf.mxu1  ;;  %v2455_v39 = vpop.f32.mrf.mxu0  ;;  %5033 = vmatprep.subr.bf16.mxu0 %v7110_v54  ;;  %5137 = vmatpush1.bf16.msra.mxu1 %v7150_v9  ;;  %v3143_v54 = vmax.f32 %v2357_v32, 0.0  ;;  %v10558_v9 = vld [vmem:[#allocation34_spill] sm:$0xff]  ;;  %v2270_v28 = vadd.f32 %v8797_v50, %v8686_v12  ;;  %v2266_v50 = vadd.f32 %v8775_v55, %v8686_v12 }
 0x1ff   : > { %v2567_v46 = vadd.f32 %v2566_v11, %v2454_v6  ;;  %v2456_v45 = vadd.f32 %v2455_v39, %v8807_v56  ;;  %4956 = vmatprep.mubr.bf16.mxu1 %v8936_v5  ;;  %5138 = vmatprep.subr.bf16.mxu1 %v7158_v58  ;;  %v2258_v36 = vadd.f32 %v10558_v9, %v8716_v43  ;;  %v7116_v58 = vld [vmem:[%s7966_s1 + $0x5a4] ss:$16 sps:$4 sm:$0xff]   ;;  %v3114_v13 = vmax.f32 %v2565_v16, 0.0 }
 0x200   : > { %v2568_v23 = vpop.f32.mrf.mxu1  ;;  %v2459_v24 = vpop.f32.mrf.mxu0  ;;  %4864 = vmatmul.mubr.bf16.gmra.mxu0 %v8932_v44  ;;  %4957 = vmatmul.mubr.bf16.gmra.mxu1 %v8940_v14  ;;  %v8962_v38 = vpack.c.bf16 %v3151_v29, %v3143_v54  ;;  %v3160_v32 = vmax.f32 %v2369_v42, 0.0  ;;  %v3113_v6 = vmax.f32 %v2563_v8, 0.0  ;;  %v2367_v39 = vadd.f32 %v10559_v19, %v2254_v61  ;;  %v7119_v42 = vld [vmem:[%s7966_s1 + $0x584] ss:$16 sps:$4 sm:$0xff]   ;;  %v7168_v8 = vld [vmem:[%s7966_s1 + $0x620] ss:$16 sps:$4 sm:$0xff]  }
 0x201   : > { %v2569_v30 = vadd.f32 %v2568_v23, %v2456_v45  ;;  %4873 = vmatprep.mubr.bf16.mxu0 %v8942_v35  ;;  %5034 = vmatpush2.bf16.msra.mxu0 %v7108_v60  ;;  %v3121_v49 = vmax.f32 %v2567_v46, 0.0  ;;  %v2460_v11 = vadd.f32 %v2459_v24, %v8814_v63  ;;  %v7114_v45 = vld [vmem:[%s7966_s1 + $0x5a0] ss:$16 sps:$4 sm:$0xff]   ;;  %v2383_v12 = vadd.f32 %v8800_v57, %v2270_v28 }
 0x202   : > { %v2572_v51 = vpop.f32.mrf.mxu1  ;;  %v2461_v40 = vpop.f32.mrf.mxu0  ;;  %5035 = vmatprep.subr.bf16.mxu0 %v7113_v2  ;;  %5139 = vmatpush1.bf16.msra.mxu1 %v7156_v62  ;;  %v10560_v2 = vld [vmem:[#allocation35_spill] sm:$0xff]  ;;  %v2379_v57 = vadd.f32 %v8778_v31, %v2266_v50 }
 0x203   : > { %v3122_v1 = vmax.f32 %v2569_v30, 0.0  ;;  %v2462_v47 = vadd.f32 %v2461_v40, %v8807_v56  ;;  %5140 = vmatprep.subr.bf16.mxu1 %v7164_v25  ;;  %v2371_v62 = vadd.f32 %v10560_v2, %v2258_v36  ;;  %v8976_v55 = vpack.c.bf16 %v3121_v49, %v3113_v6  ;;  %v7176_v36 = vld [vmem:[%s7966_s1 + $0x604] ss:$16 sps:$4 sm:$0xff]   ;;  %v7117_v40 = vld [vmem:[%s7966_s1 + $0x580] ss:$16 sps:$4 sm:$0xff]  }
 0x204   : > { %v2574_v7 = vpop.f32.mrf.mxu1  ;;  %v2463_v60 = vpop.f32.mrf.mxu0  ;;  %v8978_v25 = vpack.c.bf16 %v3168_v33, %v3160_v32  ;;  %v2573_v30 = vadd.f32 %v2572_v51, %v2460_v11  ;;  %v3184_v31 = vmax.f32 %v2383_v12, 0.0  ;;  %v7182_v6 = vld [vmem:[%s7966_s1 + $0x7e4] ss:$16 sps:$4 sm:$0xff]   ;;  %v2264_v11 = vadd.f32 %v8759_v48, %v8716_v43 }
 0x205   : > { %v2464_v29 = vadd.f32 %v2463_v60, %v8814_v63  ;;  %v8972_v46 = vpack.c.bf16 %v3122_v1, %v3114_v13  ;;  %5036 = vmatpush2.bf16.msra.mxu0 %v7111_v22  ;;  %v2575_v24 = vadd.f32 %v2574_v7, %v2462_v47  ;;  %v3167_v33 = vmax.f32 %v2371_v62, 0.0  ;;  %v7122_v13 = vld [vmem:[%s7966_s1 + $0x564] ss:$16 sps:$4 sm:$0xff]   ;;  %v7174_v1 = vld [vmem:[%s7966_s1 + $0x600] ss:$16 sps:$4 sm:$0xff]  }
 0x206   : > { %v2576_v16 = vpop.f32.mrf.mxu1  ;;  %v2465_v23 = vpop.f32.mrf.mxu0  ;;  %5037 = vmatprep.subr.bf16.mxu0 %v7116_v58  ;;  %5141 = vmatpush1.bf16.msra.mxu1 %v7162_v3  ;;  %v2268_v58 = vadd.f32 %v8786_v53, %v8716_v43  ;;  %v3159_v47 = vmax.f32 %v2367_v39, 0.0  ;;  %v3176_v53 = vmax.f32 %v2379_v57, 0.0  ;;  %v3129_v60 = vmax.f32 %v2573_v30, 0.0 }
 0x207   : > { %v2577_v54 = vadd.f32 %v2576_v16, %v2464_v29  ;;  %v2466_v61 = vadd.f32 %v2465_v23, %v8807_v56  ;;  %4966 = vmatprep.mubr.bf16.mxu1 %v8972_v46  ;;  %5142 = vmatprep.subr.bf16.mxu1 %v7170_v59  ;;  %v3130_v7 = vmax.f32 %v2575_v24, 0.0 }
 0x208   : > { %v2578_v9 = vpop.f32.mrf.mxu1  ;;  %v2469_v22 = vpop.f32.mrf.mxu0  ;;  %4874 = vmatmul.mubr.bf16.gmra.mxu0 %v8962_v38  ;;  %4967 = vmatmul.mubr.bf16.gmra.mxu1 %v8976_v55  ;;  %v8999_v62 = vpack.c.bf16 %v3167_v33, %v3159_v47  ;;  %v2381_v12 = vadd.f32 %v8790_v21, %v2268_v58  ;;  %v9008_v23 = vpack.c.bf16 %v3184_v31, %v3176_v53  ;;  %v7188_v21 = vld [vmem:[%s7966_s1 + $0x7c4] ss:$16 sps:$4 sm:$0xff]  }
 0x209   : > { %v2579_v28 = vadd.f32 %v2578_v9, %v2466_v61  ;;  %4883 = vmatprep.mubr.bf16.mxu0 %v8978_v25  ;;  %5038 = vmatpush2.bf16.msra.mxu0 %v7114_v45  ;;  %v3137_v3 = vmax.f32 %v2577_v54, 0.0  ;;  %v2470_v19 = vadd.f32 %v2469_v22, %v8814_v63  ;;  %v7120_v45 = vld [vmem:[%s7966_s1 + $0x560] ss:$16 sps:$4 sm:$0xff]   ;;  %v7194_v47 = vld [vmem:[%s7966_s1 + $0x7a4] ss:$16 sps:$4 sm:$0xff]  }
 0x20a   : > { %v2582_v49 = vpop.f32.mrf.mxu1  ;;  %v2471_v51 = vpop.f32.mrf.mxu0  ;;  %5039 = vmatprep.subr.bf16.mxu0 %v7119_v42  ;;  %5143 = vmatpush1.bf16.msra.mxu1 %v7168_v8  ;;  %v7125_v42 = vld [vmem:[%s7966_s1 + $0x544] ss:$16 sps:$4 sm:$0xff]   ;;  %v7180_v8 = vld [vmem:[%s7966_s1 + $0x7e0] ss:$16 sps:$4 sm:$0xff]  }
 0x20b   : > { %v3138_v59 = vmax.f32 %v2579_v28, 0.0  ;;  %v2472_v32 = vadd.f32 %v2471_v51, %v8807_v56  ;;  %5144 = vmatprep.subr.bf16.mxu1 %v7176_v36  ;;  %v9006_v43 = vpack.c.bf16 %v3137_v3, %v3129_v60  ;;  %v2377_v36 = vadd.f32 %v8766_v37, %v2264_v11  ;;  %v7123_v28 = vld [vmem:[%s7966_s1 + $0x540] ss:$16 sps:$4 sm:$0xff]   ;;  %v7128_v3 = vld [vmem:[%s7966_s1 + $0x524] ss:$16 sps:$4 sm:$0xff]  }
 0x20c   : > { %v2584_v50 = vpop.f32.mrf.mxu1  ;;  %v2473_v2 = vpop.f32.mrf.mxu0  ;;  %v2583_v57 = vadd.f32 %v2582_v49, %v2470_v19  ;;  %v7186_v37 = vld [vmem:[%s7966_s1 + $0x7c0] ss:$16 sps:$4 sm:$0xff]  }
 0x20d   : > { %v2474_v39 = vadd.f32 %v2473_v2, %v8814_v63  ;;  %v9002_v16 = vpack.c.bf16 %v3138_v59, %v3130_v7  ;;  %5040 = vmatpush2.bf16.msra.mxu0 %v7117_v40  ;;  %v2585_v24 = vadd.f32 %v2584_v50, %v2472_v32  ;;  %v3183_v40 = vmax.f32 %v2381_v12, 0.0  ;;  %v7126_v60 = vld [vmem:[%s7966_s1 + $0x520] ss:$16 sps:$4 sm:$0xff]  }
 0x20e   : > { %v2586_v29 = vpop.f32.mrf.mxu1  ;;  %v2475_v48 = vpop.f32.mrf.mxu0  ;;  %5041 = vmatprep.subr.bf16.mxu0 %v7122_v13  ;;  %5145 = vmatpush1.bf16.msra.mxu1 %v7174_v1  ;;  %v3175_v7 = vmax.f32 %v2377_v36, 0.0  ;;  %v3145_v59 = vmax.f32 %v2583_v57, 0.0  ;;  %v7129_v36 = vld [vmem:[%s7966_s1 + $0x500] ss:$16 sps:$4 sm:$0xff]  }
 0x20f   : > { %v2587_v54 = vadd.f32 %v2586_v29, %v2474_v39  ;;  %v2476_v61 = vadd.f32 %v2475_v48, %v8807_v56  ;;  %4976 = vmatprep.mubr.bf16.mxu1 %v9002_v16  ;;  %5146 = vmatprep.subr.bf16.mxu1 %v7182_v6  ;;  %v3146_v49 = vmax.f32 %v2585_v24, 0.0  ;;  %v7131_v29 = vld [vmem:[%s7966_s1 + $0x504] ss:$16 sps:$4 sm:$0xff]  }
 0x210   : > { %v2588_v9 = vpop.f32.mrf.mxu1  ;;  %v2479_v30 = vpop.f32.mrf.mxu0  ;;  %4884 = vmatmul.mubr.bf16.gmra.mxu0 %v8999_v62  ;;  %4977 = vmatmul.mubr.bf16.gmra.mxu1 %v9006_v43  ;;  %v9029_v19 = vpack.c.bf16 %v3183_v40, %v3175_v7  ;;  %v7200_v24 = vld [vmem:[%s7966_s1 + $0x784] ss:$16 sps:$4 sm:$0xff]   ;;  %v7198_v40 = vld [vmem:[%s7966_s1 + $0x780] ss:$16 sps:$4 sm:$0xff]  }
 0x211   : > { %v2589_v22 = vadd.f32 %v2588_v9, %v2476_v61  ;;  %4893 = vmatprep.mubr.bf16.mxu0 %v9008_v23  ;;  %5042 = vmatpush2.bf16.msra.mxu0 %v7120_v45  ;;  %v3153_v58 = vmax.f32 %v2587_v54, 0.0  ;;  %v2480_v32 = vadd.f32 %v2479_v30, %v8814_v63  ;;  %v7192_v45 = vld [vmem:[%s7966_s1 + $0x7a0] ss:$16 sps:$4 sm:$0xff]  }
 0x212   : > { %v2592_v33 = vpop.f32.mrf.mxu1  ;;  %v2481_v31 = vpop.f32.mrf.mxu0  ;;  %5043 = vmatprep.subr.bf16.mxu0 %v7125_v42  ;;  %5147 = vmatpush2.bf16.msra.mxu1 %v7180_v8 }
 0x213   : > { %v3154_v51 = vmax.f32 %v2589_v22, 0.0  ;;  %v2482_v13 = vadd.f32 %v2481_v31, %v8807_v56  ;;  %5148 = vmatprep.subr.bf16.mxu1 %v7188_v21  ;;  %v9031_v2 = vpack.c.bf16 %v3153_v58, %v3145_v59  ;;  %v2593_v54 = vadd.f32 %v2592_v33, %v2480_v32 }
 0x214   : > { %v2594_v1 = vpop.f32.mrf.mxu1  ;;  %v2483_v50 = vpop.f32.mrf.mxu0  ;;  %v701_v22 = vsub.s32 5, %v8656_v41 }
 0x215   : > { %v2484_v6 = vadd.f32 %v2483_v50, %v8814_v63  ;;  %v9026_v53 = vpack.c.bf16 %v3154_v51, %v3146_v49  ;;  %5044 = vmatpush2.bf16.msra.mxu0 %v7123_v28  ;;  %v2595_v12 = vadd.f32 %v2594_v1, %v2482_v13  ;;  %v7137_v28 = vld [vmem:[%s7966_s1 + $0xec] ss:$16 sps:$4 sm:$0xff]   ;;  %v3161_v49 = vmax.f32 %v2593_v54, 0.0 }
 0x216   : > { %v2596_v11 = vpop.f32.mrf.mxu1  ;;  %v2485_v39 = vpop.f32.mrf.mxu0  ;;  %5045 = vmatprep.subr.bf16.mxu0 %v7128_v3  ;;  %5149 = vmatpush2.bf16.msra.mxu1 %v7186_v37  ;;  %v7206_v37 = vld [vmem:[%s7966_s1 + $0x764] ss:$16 sps:$4 sm:$0xff]   ;;  %v697_v1 = vsub.s32 4, %v8656_v41 }
 0x217   : > { %v2597_v48 = vadd.f32 %v2596_v11, %v2484_v6  ;;  %v2486_v42 = vadd.f32 %v2485_v39, %v8807_v56  ;;  %4986 = vmatprep.mubr.bf16.mxu1 %v9026_v53  ;;  %5150 = vmatprep.subr.bf16.mxu1 %v7194_v47  ;;  %v3162_v58 = vmax.f32 %v2595_v12, 0.0  ;;  %v9054_v6 = vrot.slane %v8677_v18, %v701_v22  ;;  %v7204_v11 = vld [vmem:[%s7966_s1 + $0x760] ss:$16 sps:$4 sm:$0xff]  }
 0x218   : > { %v2598_v8 = vpop.f32.mrf.mxu1  ;;  %v2489_v61 = vpop.f32.mrf.mxu0  ;;  %4894 = vmatmul.mubr.bf16.gmra.mxu0 %v9029_v19  ;;  %4987 = vmatmul.mubr.bf16.gmra.mxu1 %v9031_v2 }
 0x219   : > { %v2599_v9 = vadd.f32 %v2598_v8, %v2486_v42  ;;  %5046 = vmatpush2.bf16.msra.mxu0 %v7126_v60  ;;  %v3169_v57 = vmax.f32 %v2597_v48, 0.0  ;;  %v2490_v51 = vadd.f32 %v2489_v61, %v8814_v63  ;;  %v9061_v48 = vrot.slane %v8677_v18, %v697_v1 }
 0x21a   : > { %v2602_v21 = vpop.f32.mrf.mxu1  ;;  %v2491_v30 = vpop.f32.mrf.mxu0  ;;  %5047 = vmatprep.subr.bf16.mxu0 %v7131_v29  ;;  %5151 = vmatpush2.bf16.msra.mxu1 %v7192_v45  ;;  %v7212_v45 = vld [vmem:[%s7966_s1 + $0x744] ss:$16 sps:$4 sm:$0xff]  }
 0x21b   : > { %v3170_v33 = vmax.f32 %v2599_v9, 0.0  ;;  %v2492_v31 = vadd.f32 %v2491_v30, %v8807_v56  ;;  %5152 = vmatprep.subr.bf16.mxu1 %v7200_v24  ;;  %v9051_v32 = vpack.c.bf16 %v3169_v57, %v3161_v49  ;;  %v2603_v12 = vadd.f32 %v2602_v21, %v2490_v51  ;;  %v7210_v9 = vld [vmem:[%s7966_s1 + $0x740] ss:$16 sps:$4 sm:$0xff]   ;;  %v7218_v21 = vld [vmem:[%s7966_s1 + $0x724] ss:$16 sps:$4 sm:$0xff]  }
 0x21c   : > { %v2604_v3 = vpop.f32.mrf.mxu1  ;;  %v2493_v13 = vpop.f32.mrf.mxu0 }
 0x21d   : > { %v2494_v47 = vadd.f32 %v2493_v13, %v8814_v63  ;;  %v9049_v59 = vpack.c.bf16 %v3170_v33, %v3162_v58  ;;  %5048 = vmatpush2.bf16.msra.mxu0 %v7129_v36  ;;  %10562 = vst [vmem:[#allocation30_spill] sm:$0xff] %v9051_v32  ;;  %v2605_v60 = vadd.f32 %v2604_v3, %v2492_v31  ;;  %v3177_v22 = vmax.f32 %v2603_v12, 0.0 }
 0x21e   : > { %v2606_v7 = vpop.f32.mrf.mxu1  ;;  %v2495_v50 = vpop.f32.mrf.mxu0  ;;  %5243 = vmatprep.subr.bf16.mxu0 %v7137_v28  ;;  %5153 = vmatpush2.bf16.msra.mxu1 %v7198_v40 }
 0x21f   : > { %10561 = vst [vmem:[#allocation32_spill] sm:$0xff] %v9049_v59  ;;  %v2607_v39 = vadd.f32 %v2606_v7, %v2494_v47  ;;  %v2496_v29 = vadd.f32 %v2495_v50, %v8807_v56  ;;  %4996 = vmatprep.mubr.bf16.mxu1 %v9049_v59  ;;  %5154 = vmatprep.subr.bf16.mxu1 %v7206_v37  ;;  %v3178_v56 = vmax.f32 %v2605_v60, 0.0  ;;  %v7216_v37 = vld [vmem:[%s7966_s1 + $0x720] ss:$16 sps:$4 sm:$0xff]   ;;  %v7224_v47 = vld [vmem:[%s7966_s1 + $0x704] ss:$16 sps:$4 sm:$0xff]  }
 0x220   : > { %v2608_v63 = vpop.f32.mrf.mxu1  ;;  %v2645_v42 = vpop.f32.mrf.mxu0  ;;  %4997 = vmatmul.mubr.bf16.gmra.mxu1 %v9051_v32 }
 0x221   : > { %v2609_v8 = vadd.f32 %v2608_v63, %v2496_v29  ;;  %v3185_v54 = vmax.f32 %v2607_v39, 0.0  ;;  %v2646_v18 = vadd.f32 %v2645_v42, %v9061_v48  ;;  %v7222_v63 = vld [vmem:[%s7966_s1 + $0x700] ss:$16 sps:$4 sm:$0xff]  }
 0x222   : > { %v2758_v24 = vpop.f32.mrf.mxu1  ;;  %v2647_v61 = vpop.f32.mrf.mxu0  ;;  %5155 = vmatpush2.bf16.msra.mxu1 %v7204_v11 }
 0x223   : > { %v3186_v36 = vmax.f32 %v2609_v8, 0.0  ;;  %v2648_v57 = vadd.f32 %v2647_v61, %v9054_v6  ;;  %5156 = vmatprep.subr.bf16.mxu1 %v7212_v45  ;;  %v9071_v31 = vpack.c.bf16 %v3185_v54, %v3177_v22  ;;  %v2759_v7 = vadd.f32 %v2758_v24, %v2646_v18  ;;  %v7230_v54 = vld [vmem:[%s7966_s1 + $0x2ec] ss:$16 sps:$4 sm:$0xff]  }
 0x224   : > { %v2760_v30 = vpop.f32.mrf.mxu1  ;;  %v2649_v28 = vpop.f32.mrf.mxu0  ;;  %v7143_v18 = vld [vmem:[%s7966_s1 + $0xcc] ss:$16 sps:$4 sm:$0xff]  }
 0x225   : > { %v2650_v40 = vadd.f32 %v2649_v28, %v9061_v48  ;;  %v9069_v33 = vpack.c.bf16 %v3186_v36, %v3178_v56  ;;  %10564 = vst [vmem:[#allocation31_spill] sm:$0xff] %v9071_v31  ;;  %v2761_v49 = vadd.f32 %v2760_v30, %v2648_v57  ;;  %v3067_v61 = vmax.f32 %v2759_v7, 0.0  ;;  %v7135_v30 = vld [vmem:[%s7966_s1 + $0xe8] ss:$16 sps:$4 sm:$0xff]  }
 0x226   : > { %v2762_v58 = vpop.f32.mrf.mxu1  ;;  %v2651_v3 = vpop.f32.mrf.mxu0  ;;  %5157 = vmatpush2.bf16.msra.mxu1 %v7210_v9 }
 0x227   : > { %10563 = vst [vmem:[#allocation28_spill] sm:$0xff] %v9069_v33  ;;  %v2763_v51 = vadd.f32 %v2762_v58, %v2650_v40  ;;  %v2652_v13 = vadd.f32 %v2651_v3, %v9054_v6  ;;  %5006 = vmatprep.mubr.bf16.mxu1 %v9069_v33  ;;  %5158 = vmatprep.subr.bf16.mxu1 %v7218_v21  ;;  %v3068_v45 = vmax.f32 %v2761_v49, 0.0  ;;  %v7215_v33 = vld [vmem:[%s7966_s1 + $0x14c] ss:$16 sps:$4 sm:$0xff]  }
 0x228   : > { %v2764_v1 = vpop.f32.mrf.mxu1  ;;  %v2655_v50 = vpop.f32.mrf.mxu0  ;;  %5007 = vmatmul.mubr.bf16.gmra.mxu1 %v9071_v31 }
 0x229   : > { %v2765_v11 = vadd.f32 %v2764_v1, %v2652_v13  ;;  %v3075_v39 = vmax.f32 %v2763_v51, 0.0  ;;  %v2656_v24 = vadd.f32 %v2655_v50, %v9061_v48  ;;  %v7141_v1 = vld [vmem:[%s7966_s1 + $0xc8] ss:$16 sps:$4 sm:$0xff]   ;;  %v7149_v50 = vld [vmem:[%s7966_s1 + $0xac] ss:$16 sps:$4 sm:$0xff]  }
 0x22a   : > { %v2768_v60 = vpop.f32.mrf.mxu1  ;;  %v2657_v29 = vpop.f32.mrf.mxu0  ;;  %5159 = vmatpush2.bf16.msra.mxu1 %v7216_v37 }
 0x22b   : > { %v3076_v12 = vmax.f32 %v2765_v11, 0.0  ;;  %v2658_v42 = vadd.f32 %v2657_v29, %v9054_v6  ;;  %5160 = vmatprep.subr.bf16.mxu1 %v7224_v47  ;;  %v9086_v21 = vpack.c.bf16 %v3075_v39, %v3067_v61  ;;  %v2769_v37 = vadd.f32 %v2768_v60, %v2656_v24  ;;  %v7147_v61 = vld [vmem:[%s7966_s1 + $0xa8] ss:$16 sps:$4 sm:$0xff]  }
 0x22c   : > { %v2770_v8 = vpop.f32.mrf.mxu1  ;;  %v2659_v9 = vpop.f32.mrf.mxu0 }
 0x22d   : > { %v2660_v56 = vadd.f32 %v2659_v9, %v9061_v48  ;;  %v9083_v57 = vpack.c.bf16 %v3076_v12, %v3068_v45  ;;  %v2771_v28 = vadd.f32 %v2770_v8, %v2658_v42  ;;  %v3083_v45 = vmax.f32 %v2769_v37, 0.0  ;;  %v7153_v37 = vld [vmem:[%s7966_s1 + $0x88] ss:$16 sps:$4 sm:$0xff]  }
 0x22e   : > { %v2772_v36 = vpop.f32.mrf.mxu1  ;;  %v2661_v22 = vpop.f32.mrf.mxu0  ;;  %5161 = vmatpush2.bf16.msra.mxu1 %v7222_v63 }
 0x22f   : > { %v2773_v40 = vadd.f32 %v2772_v36, %v2660_v56  ;;  %v2662_v58 = vadd.f32 %v2661_v22, %v9054_v6  ;;  %5049 = vmatprep.mubr.bf16.mxu0 %v9083_v57  ;;  %5356 = vmatprep.subr.bf16.mxu1 %v7230_v54  ;;  %v3084_v11 = vmax.f32 %v2771_v28, 0.0  ;;  %v7155_v56 = vld [vmem:[%s7966_s1 + $0x8c] ss:$16 sps:$4 sm:$0xff]  }
 0x230   : > { %v2774_v3 = vpop.f32.mrf.mxu1  ;;  %v2665_v49 = vpop.f32.mrf.mxu0  ;;  %5050 = vmatmul.mubr.bf16.vlgmr.msra.gmra.mxu0 %v9086_v21 }
 0x231   : > { %v2775_v51 = vadd.f32 %v2774_v3, %v2662_v58  ;;  %5244 = vmatpush1.bf16.msra.mxu0 %v7135_v30  ;;  %v3091_v47 = vmax.f32 %v2773_v40, 0.0  ;;  %v2666_v60 = vadd.f32 %v2665_v49, %v9061_v48 }
 0x232   : > { %v2778_v13 = vpop.f32.mrf.mxu1  ;;  %v2667_v7 = vpop.f32.mrf.mxu0  ;;  %5245 = vmatprep.subr.bf16.mxu0 %v7143_v18 }
 0x233   : > { %v3092_v39 = vmax.f32 %v2775_v51, 0.0  ;;  %v2668_v29 = vadd.f32 %v2667_v7, %v9054_v6  ;;  %v9100_v24 = vpack.c.bf16 %v3091_v47, %v3083_v45  ;;  %v2779_v28 = vadd.f32 %v2778_v13, %v2666_v60 }
 0x234   : > { %v2780_v63 = vpop.f32.mrf.mxu1  ;;  %v2669_v12 = vpop.f32.mrf.mxu0 }
 0x235   : > { %v2670_v42 = vadd.f32 %v2669_v12, %v9061_v48  ;;  %5246 = vmatpush1.bf16.msra.mxu0 %v7141_v1  ;;  %v9097_v54 = vpack.c.bf16 %v3092_v39, %v3084_v11  ;;  %v2781_v36 = vadd.f32 %v2780_v63, %v2668_v29  ;;  %v7161_v1 = vld [vmem:[%s7966_s1 + $0x6c] ss:$16 sps:$4 sm:$0xff]   ;;  %v3099_v39 = vmax.f32 %v2779_v28, 0.0  ;;  %v7159_v12 = vld [vmem:[%s7966_s1 + $0x68] ss:$16 sps:$4 sm:$0xff]  }
 0x236   : > { %v2782_v8 = vpop.f32.mrf.mxu1  ;;  %v2671_v9 = vpop.f32.mrf.mxu0  ;;  %5247 = vmatprep.subr.bf16.mxu0 %v7149_v50 }
 0x237   : > { %v2783_v30 = vadd.f32 %v2782_v8, %v2670_v42  ;;  %v2672_v22 = vadd.f32 %v2671_v9, %v9054_v6  ;;  %5059 = vmatprep.mubr.bf16.mxu0 %v9097_v54  ;;  %v3100_v47 = vmax.f32 %v2781_v36, 0.0 }
 0x238   : > { %v2784_v18 = vpop.f32.mrf.mxu1  ;;  %v2675_v40 = vpop.f32.mrf.mxu0  ;;  %5060 = vmatmul.mubr.bf16.gmra.mxu0 %v9100_v24 }
 0x239   : > { %v2785_v58 = vadd.f32 %v2784_v18, %v2672_v22  ;;  %5248 = vmatpush1.bf16.msra.mxu0 %v7147_v61  ;;  %v3107_v49 = vmax.f32 %v2783_v30, 0.0  ;;  %v2676_v13 = vadd.f32 %v2675_v40, %v9061_v48  ;;  %v7167_v61 = vld [vmem:[%s7966_s1 + $0x4c] ss:$16 sps:$4 sm:$0xff]  }
 0x23a   : > { %v2788_v3 = vpop.f32.mrf.mxu1  ;;  %v2677_v51 = vpop.f32.mrf.mxu0  ;;  %5249 = vmatprep.subr.bf16.mxu0 %v7155_v56 }
 0x23b   : > { %v3108_v7 = vmax.f32 %v2785_v58, 0.0  ;;  %v2678_v50 = vadd.f32 %v2677_v51, %v9054_v6  ;;  %v9114_v42 = vpack.c.bf16 %v3107_v49, %v3099_v39  ;;  %v2789_v22 = vadd.f32 %v2788_v3, %v2676_v13  ;;  %v7165_v58 = vld [vmem:[%s7966_s1 + $0x48] ss:$16 sps:$4 sm:$0xff]   ;;  %v7173_v51 = vld [vmem:[%s7966_s1 + $0x2c] ss:$16 sps:$4 sm:$0xff]  }
 0x23c   : > { %v2790_v11 = vpop.f32.mrf.mxu1  ;;  %v2679_v29 = vpop.f32.mrf.mxu0 }
 0x23d   : > { %v2680_v63 = vadd.f32 %v2679_v29, %v9061_v48  ;;  %5250 = vmatpush1.bf16.msra.mxu0 %v7153_v37  ;;  %v9111_v60 = vpack.c.bf16 %v3108_v7, %v3100_v47  ;;  %v2791_v9 = vadd.f32 %v2790_v11, %v2678_v50  ;;  %v3115_v11 = vmax.f32 %v2789_v22, 0.0 }
 0x23e   : > { %v2792_v45 = vpop.f32.mrf.mxu1  ;;  %v2681_v8 = vpop.f32.mrf.mxu0  ;;  %5251 = vmatprep.subr.bf16.mxu0 %v7161_v1 }
 0x23f   : > { %v2793_v56 = vadd.f32 %v2792_v45, %v2680_v63  ;;  %v2682_v36 = vadd.f32 %v2681_v8, %v9054_v6  ;;  %5069 = vmatprep.mubr.bf16.mxu0 %v9111_v60  ;;  %v3116_v1 = vmax.f32 %v2791_v9, 0.0  ;;  %v7171_v45 = vld [vmem:[%s7966_s1 + $0x28] ss:$16 sps:$4 sm:$0xff]  }
 0x240   : > { %v2794_v30 = vpop.f32.mrf.mxu1  ;;  %v2685_v18 = vpop.f32.mrf.mxu0  ;;  %5070 = vmatmul.mubr.bf16.gmra.mxu0 %v9114_v42 }
 0x241   : > { %v2795_v28 = vadd.f32 %v2794_v30, %v2682_v36  ;;  %5252 = vmatpush1.bf16.msra.mxu0 %v7159_v12  ;;  %v3123_v37 = vmax.f32 %v2793_v56, 0.0  ;;  %v2686_v3 = vadd.f32 %v2685_v18, %v9061_v48 }
 0x242   : > { %v2798_v40 = vpop.f32.mrf.mxu1  ;;  %v2687_v49 = vpop.f32.mrf.mxu0  ;;  %5253 = vmatprep.subr.bf16.mxu0 %v7167_v61  ;;  %v7179_v61 = vld [vmem:[%s7966_s1 + $0xc] ss:$16 sps:$4 sm:$0xff]  }
 0x243   : > { %v3124_v47 = vmax.f32 %v2795_v28, 0.0  ;;  %v2688_v7 = vadd.f32 %v2687_v49, %v9054_v6  ;;  %v9128_v12 = vpack.c.bf16 %v3123_v37, %v3115_v11  ;;  %v2799_v22 = vadd.f32 %v2798_v40, %v2686_v3  ;;  %v7177_v37 = vld [vmem:[%s7966_s1 + $0x8] ss:$16 sps:$4 sm:$0xff]  }
 0x244   : > { %v2800_v50 = vpop.f32.mrf.mxu1  ;;  %v2689_v39 = vpop.f32.mrf.mxu0 }
 0x245   : > { %v2690_v13 = vadd.f32 %v2689_v39, %v9061_v48  ;;  %5254 = vmatpush1.bf16.msra.mxu0 %v7165_v58  ;;  %v9125_v63 = vpack.c.bf16 %v3124_v47, %v3116_v1  ;;  %v2801_v9 = vadd.f32 %v2800_v50, %v2688_v7  ;;  %v7185_v1 = vld [vmem:[%s7966_s1 + $0x1ec] ss:$16 sps:$4 sm:$0xff]   ;;  %v3131_v39 = vmax.f32 %v2799_v22, 0.0 }
 0x246   : > { %v2802_v29 = vpop.f32.mrf.mxu1  ;;  %v2691_v8 = vpop.f32.mrf.mxu0  ;;  %5255 = vmatprep.subr.bf16.mxu0 %v7173_v51 }
 0x247   : > { %v2803_v56 = vadd.f32 %v2802_v29, %v2690_v13  ;;  %v2692_v36 = vadd.f32 %v2691_v8, %v9054_v6  ;;  %5079 = vmatprep.mubr.bf16.mxu0 %v9125_v63  ;;  %v3132_v47 = vmax.f32 %v2801_v9, 0.0  ;;  %v7183_v8 = vld [vmem:[%s7966_s1 + $0x1e8] ss:$16 sps:$4 sm:$0xff]   ;;  %v7191_v9 = vld [vmem:[%s7966_s1 + $0x1cc] ss:$16 sps:$4 sm:$0xff]  }
 0x248   : > { %v2804_v30 = vpop.f32.mrf.mxu1  ;;  %v2695_v18 = vpop.f32.mrf.mxu0  ;;  %5080 = vmatmul.mubr.bf16.gmra.mxu0 %v9128_v12 }
 0x249   : > { %v2805_v28 = vadd.f32 %v2804_v30, %v2692_v36  ;;  %5256 = vmatpush1.bf16.msra.mxu0 %v7171_v45  ;;  %v3139_v49 = vmax.f32 %v2803_v56, 0.0  ;;  %v2696_v40 = vadd.f32 %v2695_v18, %v9061_v48 }
 0x24a   : > { %v2808_v58 = vpop.f32.mrf.mxu1  ;;  %v2697_v51 = vpop.f32.mrf.mxu0  ;;  %5257 = vmatprep.subr.bf16.mxu0 %v7179_v61 }
 0x24b   : > { %v3140_v7 = vmax.f32 %v2805_v28, 0.0  ;;  %v2698_v50 = vadd.f32 %v2697_v51, %v9054_v6  ;;  %v9142_v61 = vpack.c.bf16 %v3139_v49, %v3131_v39  ;;  %v2809_v28 = vadd.f32 %v2808_v58, %v2696_v40  ;;  %v7189_v49 = vld [vmem:[%s7966_s1 + $0x1c8] ss:$16 sps:$4 sm:$0xff]   ;;  %v7197_v39 = vld [vmem:[%s7966_s1 + $0x1ac] ss:$16 sps:$4 sm:$0xff]  }
 0x24c   : > { %v2810_v11 = vpop.f32.mrf.mxu1  ;;  %v2699_v3 = vpop.f32.mrf.mxu0 }
 0x24d   : > { %v2700_v13 = vadd.f32 %v2699_v3, %v9061_v48  ;;  %5258 = vmatpush1.bf16.msra.mxu0 %v7177_v37  ;;  %v9139_v45 = vpack.c.bf16 %v3140_v7, %v3132_v47  ;;  %v2811_v36 = vadd.f32 %v2810_v11, %v2698_v50 }
 0x24e   : > { %v2812_v29 = vpop.f32.mrf.mxu1  ;;  %v2701_v56 = vpop.f32.mrf.mxu0  ;;  %5259 = vmatprep.subr.bf16.mxu0 %v7185_v1 }
 0x24f   : > { %v2813_v30 = vadd.f32 %v2812_v29, %v2700_v13  ;;  %v2702_v22 = vadd.f32 %v2701_v56, %v9054_v6  ;;  %5089 = vmatprep.mubr.bf16.mxu0 %v9139_v45  ;;  %v3148_v50 = vmax.f32 %v2811_v36, 0.0  ;;  %v3147_v29 = vmax.f32 %v2809_v28, 0.0  ;;  %v7203_v36 = vld [vmem:[%s7966_s1 + $0x18c] ss:$16 sps:$4 sm:$0xff]  }
 0x250   : > { %v2814_v18 = vpop.f32.mrf.mxu1  ;;  %v2705_v51 = vpop.f32.mrf.mxu0  ;;  %5090 = vmatmul.mubr.bf16.gmra.mxu0 %v9142_v61 }
 0x251   : > { %v2815_v37 = vadd.f32 %v2814_v18, %v2702_v22  ;;  %5260 = vmatpush2.bf16.msra.mxu0 %v7183_v8  ;;  %v3155_v7 = vmax.f32 %v2813_v30, 0.0  ;;  %v2706_v58 = vadd.f32 %v2705_v51, %v9061_v48  ;;  %v7195_v30 = vld [vmem:[%s7966_s1 + $0x1a8] ss:$16 sps:$4 sm:$0xff]  }
 0x252   : > { %v2818_v47 = vpop.f32.mrf.mxu1  ;;  %v2707_v1 = vpop.f32.mrf.mxu0  ;;  %5261 = vmatprep.subr.bf16.mxu0 %v7191_v9 }
 0x253   : > { %v3156_v11 = vmax.f32 %v2815_v37, 0.0  ;;  %v2708_v3 = vadd.f32 %v2707_v1, %v9054_v6  ;;  %v9156_v9 = vpack.c.bf16 %v3155_v7, %v3147_v29  ;;  %v7201_v7 = vld [vmem:[%s7966_s1 + $0x188] ss:$16 sps:$4 sm:$0xff]  }
 0x254   : > { %v2820_v13 = vpop.f32.mrf.mxu1  ;;  %v2709_v40 = vpop.f32.mrf.mxu0 }
 0x255   : > { %v2710_v56 = vadd.f32 %v2709_v40, %v9061_v48  ;;  %5262 = vmatpush2.bf16.msra.mxu0 %v7189_v49  ;;  %v9153_v8 = vpack.c.bf16 %v3156_v11, %v3148_v50  ;;  %v2821_v37 = vadd.f32 %v2820_v13, %v2708_v3  ;;  %v2819_v40 = vadd.f32 %v2818_v47, %v2706_v58 }
 0x256   : > { %v2822_v22 = vpop.f32.mrf.mxu1  ;;  %v2711_v18 = vpop.f32.mrf.mxu0  ;;  %5263 = vmatprep.subr.bf16.mxu0 %v7197_v39  ;;  %v7209_v39 = vld [vmem:[%s7966_s1 + $0x16c] ss:$16 sps:$4 sm:$0xff]   ;;  %v709_v47 = vsub.s32 7, %v8656_v41 }
 0x257   : > { %v2823_v1 = vadd.f32 %v2822_v22, %v2710_v56  ;;  %v2712_v28 = vadd.f32 %v2711_v18, %v9054_v6  ;;  %5099 = vmatprep.mubr.bf16.mxu0 %v9153_v8  ;;  %v3164_v3 = vmax.f32 %v2821_v37, 0.0  ;;  %v3163_v58 = vmax.f32 %v2819_v40, 0.0  ;;  %v7207_v37 = vld [vmem:[%s7966_s1 + $0x168] ss:$16 sps:$4 sm:$0xff]  }
 0x258   : > { %v2824_v51 = vpop.f32.mrf.mxu1  ;;  %v2715_v31 = vpop.f32.mrf.mxu0  ;;  %5100 = vmatmul.mubr.bf16.gmra.mxu0 %v9156_v9 }
 0x259   : > { %v2825_v49 = vadd.f32 %v2824_v51, %v2712_v28  ;;  %5264 = vmatpush2.bf16.msra.mxu0 %v7195_v30  ;;  %v3171_v11 = vmax.f32 %v2823_v1, 0.0  ;;  %v2716_v18 = vadd.f32 %v2715_v31, %v9061_v48  ;;  %v705_v30 = vsub.s32 6, %v8656_v41 }
 0x25a   : > { %v2828_v50 = vpop.f32.mrf.mxu1  ;;  %v2717_v29 = vpop.f32.mrf.mxu0  ;;  %5265 = vmatprep.subr.bf16.mxu0 %v7203_v36 }
 0x25b   : > { %v3172_v13 = vmax.f32 %v2825_v49, 0.0  ;;  %v2718_v56 = vadd.f32 %v2717_v29, %v9054_v6  ;;  %v9172_v49 = vpack.c.bf16 %v3171_v11, %v3163_v58 }
 0x25c   : > { %v2830_v22 = vpop.f32.mrf.mxu1  ;;  %v2719_v28 = vpop.f32.mrf.mxu0 }
 0x25d   : > { %v2720_v1 = vadd.f32 %v2719_v28, %v9061_v48  ;;  %5266 = vmatpush2.bf16.msra.mxu0 %v7201_v7  ;;  %v9169_v36 = vpack.c.bf16 %v3172_v13, %v3164_v3  ;;  %10566 = vst [vmem:[#allocation34_spill] sm:$0xff] %v9172_v49  ;;  %v2831_v40 = vadd.f32 %v2830_v22, %v2718_v56  ;;  %v7404_v48 = vld [vmem:[%s329_s9] sm:$0xff] }
 0x25e   : > { %v2832_v51 = vpop.f32.mrf.mxu1  ;;  %v2721_v29 = vpop.f32.mrf.mxu0  ;;  %5267 = vmatprep.subr.bf16.mxu0 %v7209_v39  ;;  %v9179_v7 = vrot.slane %v7404_v48, %v709_v47  ;;  %v2829_v3 = vadd.f32 %v2828_v50, %v2716_v18  ;;  %v9181_v13 = vrot.slane %v7404_v48, %v705_v30  ;;  %v7213_v56 = vld [vmem:[%s7966_s1 + $0x148] ss:$16 sps:$4 sm:$0xff]   ;;  %v7221_v28 = vld [vmem:[%s7966_s1 + $0x12c] ss:$16 sps:$4 sm:$0xff]  }
 0x25f   : > { %10565 = vst [vmem:[#allocation29_spill] sm:$0xff] %v9169_v36  ;;  %v2833_v32 = vadd.f32 %v2832_v51, %v2720_v1  ;;  %v2722_v31 = vadd.f32 %v2721_v29, %v9054_v6  ;;  %5109 = vmatprep.mubr.bf16.mxu0 %v9169_v36  ;;  %v3180_v1 = vmax.f32 %v2831_v40, 0.0  ;;  %v7227_v40 = vld [vmem:[%s7966_s1 + $0x10c] ss:$16 sps:$4 sm:$0xff]  }
 0x260   : > { %v2834_v59 = vpop.f32.mrf.mxu1  ;;  %v2871_v11 = vpop.f32.mrf.mxu0  ;;  %5110 = vmatmul.mubr.bf16.gmra.mxu0 %v9172_v49  ;;  %v3179_v18 = vmax.f32 %v2829_v3, 0.0 }
 0x261   : > { %v2835_v39 = vadd.f32 %v2834_v59, %v2722_v31  ;;  %5268 = vmatpush2.bf16.msra.mxu0 %v7207_v37  ;;  %v3187_v6 = vmax.f32 %v2833_v32, 0.0  ;;  %v2872_v30 = vadd.f32 %v2871_v11, %v9181_v13  ;;  %v7219_v32 = vld [vmem:[%s7966_s1 + $0x128] ss:$16 sps:$4 sm:$0xff]  }
 0x262   : > { %v2984_v58 = vpop.f32.mrf.mxu1  ;;  %v2873_v22 = vpop.f32.mrf.mxu0  ;;  %5269 = vmatprep.subr.bf16.mxu0 %v7215_v33 }
 0x263   : > { %v3188_v51 = vmax.f32 %v2835_v39, 0.0  ;;  %v2874_v47 = vadd.f32 %v2873_v22, %v9179_v7  ;;  %v9192_v48 = vpack.c.bf16 %v3187_v6, %v3179_v18  ;;  %v10569_v6 = vld [vmem:[#allocation36_spill] sm:$0xff] }
 0x264   : > { %v2986_v50 = vpop.f32.mrf.mxu1  ;;  %v2875_v29 = vpop.f32.mrf.mxu0 }
 0x265   : > { %v2876_v59 = vadd.f32 %v2875_v29, %v9181_v13  ;;  %5270 = vmatpush2.bf16.msra.mxu0 %v7213_v56  ;;  %v9189_v37 = vpack.c.bf16 %v3188_v51, %v3180_v1  ;;  %10568 = vst [vmem:[#allocation35_spill] sm:$0xff] %v9192_v48  ;;  %v2987_v39 = vadd.f32 %v2986_v50, %v2874_v47  ;;  %v7225_v51 = vld [vmem:[%s7966_s1 + $0x108] ss:$16 sps:$4 sm:$0xff]   ;;  %v7233_v50 = vld [vmem:[%s7966_s1 + $0x4ec] ss:$16 sps:$4 sm:$0xff]  }
 0x266   : > { %v2988_v31 = vpop.f32.mrf.mxu1  ;;  %v2877_v33 = vpop.f32.mrf.mxu0  ;;  %5271 = vmatprep.subr.bf16.mxu0 %v7221_v28  ;;  %v2985_v29 = vadd.f32 %v2984_v58, %v2872_v30 }
 0x267   : > { %10567 = vst [vmem:[#allocation33_spill] sm:$0xff] %v9189_v37  ;;  %v2989_v22 = vadd.f32 %v2988_v31, %v2876_v59  ;;  %v2878_v3 = vadd.f32 %v2877_v33, %v9179_v7  ;;  %5119 = vmatprep.mubr.bf16.mxu0 %v9189_v37  ;;  %v3070_v18 = vmax.f32 %v2987_v39, 0.0 }
 0x268   : > { %v2990_v11 = vpop.f32.mrf.mxu1  ;;  %v2881_v41 = vpop.f32.mrf.mxu0  ;;  %5120 = vmatmul.mubr.bf16.gmra.mxu0 %v9192_v48  ;;  %v3069_v31 = vmax.f32 %v2985_v29, 0.0  ;;  %v7231_v48 = vld [vmem:[%s7966_s1 + $0x4e8] ss:$16 sps:$4 sm:$0xff]  }
 0x269   : > { %v2991_v56 = vadd.f32 %v2990_v11, %v2878_v3  ;;  %5272 = vmatpush2.bf16.msra.mxu0 %v7219_v32  ;;  %5275 = vmatprep.mubr.bf16.mxu0 %v10569_v6  ;;  %v3077_v28 = vmax.f32 %v2989_v22, 0.0  ;;  %v2882_v33 = vadd.f32 %v2881_v41, %v9181_v13 }
 0x26a   : > { %v2994_v1 = vpop.f32.mrf.mxu1  ;;  %v2883_v47 = vpop.f32.mrf.mxu0  ;;  %5273 = vmatprep.subr.bf16.mxu0 %v7227_v40  ;;  %v7228_v40 = vld [vmem:[%s7966_s1 + $0x2e8] ss:$16 sps:$4 sm:$0xff]  }
 0x26b   : > { %v3078_v59 = vmax.f32 %v2991_v56, 0.0  ;;  %v2884_v58 = vadd.f32 %v2883_v47, %v9179_v7  ;;  %v9207_v6 = vpack.c.bf16 %v3077_v28, %v3069_v31  ;;  %v7236_v56 = vld [vmem:[%s7966_s1 + $0x2cc] ss:$16 sps:$4 sm:$0xff]   ;;  %v10572_v28 = vld [vmem:[#allocation37_spill] sm:$0xff] }
 0x26c   : > { %v2996_v30 = vpop.f32.mrf.mxu1  ;;  %v2885_v3 = vpop.f32.mrf.mxu0 }
 0x26d   : > { %v2886_v32 = vadd.f32 %v2885_v3, %v9181_v13  ;;  %5274 = vmatpush2.bf16.msra.mxu0 %v7225_v51  ;;  %v9204_v22 = vpack.c.bf16 %v3078_v59, %v3070_v18  ;;  %10571 = vst [vmem:[#allocation39_spill] sm:$0xff] %v9207_v6  ;;  %v2997_v47 = vadd.f32 %v2996_v30, %v2884_v58  ;;  %v7239_v51 = vld [vmem:[%s7966_s1 + $0x4cc] ss:$16 sps:$4 sm:$0xff]   ;;  %v7234_v58 = vld [vmem:[%s7966_s1 + $0x2c8] ss:$16 sps:$4 sm:$0xff]  }
 0x26e   : > { %v2998_v11 = vpop.f32.mrf.mxu1  ;;  %v2887_v39 = vpop.f32.mrf.mxu0  ;;  %5469 = vmatprep.subr.bf16.mxu0 %v7233_v50  ;;  %v2995_v18 = vadd.f32 %v2994_v1, %v2882_v33  ;;  %v10573_v3 = vld [vmem:[#allocation38_spill] sm:$0xff] }
 0x26f   : > { %10570 = vst [vmem:[#allocation36_spill] sm:$0xff] %v9204_v22  ;;  %v2999_v29 = vadd.f32 %v2998_v11, %v2886_v32  ;;  %v2888_v41 = vadd.f32 %v2887_v39, %v9179_v7  ;;  %5162 = vmatprep.mubr.bf16.mxu1 %v9204_v22  ;;  %v7237_v11 = vld [vmem:[%s7966_s1 + $0x4c8] ss:$16 sps:$4 sm:$0xff]   ;;  %v7242_v39 = vld [vmem:[%s7966_s1 + $0x2ac] ss:$16 sps:$4 sm:$0xff]   ;;  %v3086_v1 = vmax.f32 %v2997_v47, 0.0 }
 0x270   : > { %v3000_v37 = vpop.f32.mrf.mxu1  ;;  %v2891_v59 = vpop.f32.mrf.mxu0  ;;  %5163 = vmatmul.mubr.bf16.vlgmr.msra.gmra.mxu1 %v9207_v6  ;;  %5276 = vmatmul.mubr.bf16.vlgmr.msra.gmra.mxu0 %v10572_v28  ;;  %v7240_v47 = vld [vmem:[%s7966_s1 + $0x2a8] ss:$16 sps:$4 sm:$0xff]  }
 0x271   : > { %v3001_v31 = vadd.f32 %v3000_v37, %v2888_v41  ;;  %5285 = vmatprep.mubr.bf16.mxu0 %v10573_v3  ;;  %5357 = vmatpush1.bf16.msra.mxu1 %v7228_v40  ;;  %v3093_v30 = vmax.f32 %v2999_v29, 0.0  ;;  %v7245_v37 = vld [vmem:[%s7966_s1 + $0x4ac] ss:$16 sps:$4 sm:$0xff]   ;;  %v3085_v41 = vmax.f32 %v2995_v18, 0.0  ;;  %v2892_v40 = vadd.f32 %v2891_v59, %v9181_v13  ;;  %v7243_v22 = vld [vmem:[%s7966_s1 + $0x4a8] ss:$16 sps:$4 sm:$0xff]  }
 0x272   : > { %v3004_v50 = vpop.f32.mrf.mxu1  ;;  %5470 = vmatpush1.bf16.msra.mxu0 %v7231_v48  ;;  %v2893_v32 = vpop.f32.mrf.mxu0  ;;  %5358 = vmatprep.subr.bf16.mxu1 %v7236_v56 }
 0x273   : > { %v3094_v33 = vmax.f32 %v3001_v31, 0.0  ;;  %v2894_v6 = vadd.f32 %v2893_v32, %v9179_v7  ;;  %5471 = vmatprep.subr.bf16.mxu0 %v7239_v51  ;;  %v9227_v31 = vpack.c.bf16 %v3093_v30, %v3085_v41  ;;  %v7248_v51 = vld [vmem:[%s7966_s1 + $0x28c] ss:$16 sps:$4 sm:$0xff]  }
 0x274   : > { %v3006_v28 = vpop.f32.mrf.mxu1  ;;  %v2895_v3 = vpop.f32.mrf.mxu0  ;;  %v7254_v41 = vld [vmem:[%s7966_s1 + $0x26c] ss:$16 sps:$4 sm:$0xff]  }
 0x275   : > { %v2896_v48 = vadd.f32 %v2895_v3, %v9181_v13  ;;  %5359 = vmatpush1.bf16.msra.mxu1 %v7234_v58  ;;  %v9224_v56 = vpack.c.bf16 %v3094_v33, %v3086_v1  ;;  %v3007_v18 = vadd.f32 %v3006_v28, %v2894_v6  ;;  %v7251_v58 = vld [vmem:[%s7966_s1 + $0x48c] ss:$16 sps:$4 sm:$0xff]   ;;  %v3005_v1 = vadd.f32 %v3004_v50, %v2892_v40  ;;  %v7246_v6 = vld [vmem:[%s7966_s1 + $0x288] ss:$16 sps:$4 sm:$0xff]  }
 0x276   : > { %v3008_v29 = vpop.f32.mrf.mxu1  ;;  %5472 = vmatpush1.bf16.msra.mxu0 %v7237_v11  ;;  %v2897_v32 = vpop.f32.mrf.mxu0  ;;  %5360 = vmatprep.subr.bf16.mxu1 %v7242_v39 }
 0x277   : > { %v3009_v49 = vadd.f32 %v3008_v29, %v2896_v48  ;;  %v2898_v59 = vadd.f32 %v2897_v32, %v9179_v7  ;;  %5172 = vmatprep.mubr.bf16.mxu1 %v9224_v56  ;;  %5473 = vmatprep.subr.bf16.mxu0 %v7245_v37  ;;  %v7249_v37 = vld [vmem:[%s7966_s1 + $0x488] ss:$16 sps:$4 sm:$0xff]   ;;  %v3102_v50 = vmax.f32 %v3007_v18, 0.0  ;;  %v3101_v48 = vmax.f32 %v3005_v1, 0.0 }
 0x278   : > { %v3010_v36 = vpop.f32.mrf.mxu1  ;;  %v2901_v30 = vpop.f32.mrf.mxu0  ;;  %5173 = vmatmul.mubr.bf16.gmra.mxu1 %v9227_v31  ;;  %5286 = vmatmul.mubr.bf16.gmra.mxu0 %v8833_v0  ;;  %v7252_v32 = vld [vmem:[%s7966_s1 + $0x268] ss:$16 sps:$4 sm:$0xff]  }
 0x279   : > { %v3011_v11 = vadd.f32 %v3010_v36, %v2898_v59  ;;  %5295 = vmatprep.mubr.bf16.mxu0 %v8838_v10  ;;  %5361 = vmatpush1.bf16.msra.mxu1 %v7240_v47  ;;  %v3109_v33 = vmax.f32 %v3009_v49, 0.0  ;;  %v7257_v36 = vld [vmem:[%s7966_s1 + $0x46c] ss:$16 sps:$4 sm:$0xff]   ;;  %v2902_v10 = vadd.f32 %v2901_v30, %v9181_v13  ;;  %v7255_v59 = vld [vmem:[%s7966_s1 + $0x468] ss:$16 sps:$4 sm:$0xff]  }
 0x27a   : > { %v3014_v39 = vpop.f32.mrf.mxu1  ;;  %5474 = vmatpush1.bf16.msra.mxu0 %v7243_v22  ;;  %v2903_v28 = vpop.f32.mrf.mxu0  ;;  %5362 = vmatprep.subr.bf16.mxu1 %v7248_v51 }
 0x27b   : > { %v3110_v40 = vmax.f32 %v3011_v11, 0.0  ;;  %v2904_v3 = vadd.f32 %v2903_v28, %v9179_v7  ;;  %5475 = vmatprep.subr.bf16.mxu0 %v7251_v58  ;;  %v9247_v51 = vpack.c.bf16 %v3109_v33, %v3101_v48  ;;  %v7260_v58 = vld [vmem:[%s7966_s1 + $0x24c] ss:$16 sps:$4 sm:$0xff]  }
 0x27c   : > { %v3016_v0 = vpop.f32.mrf.mxu1  ;;  %v2905_v29 = vpop.f32.mrf.mxu0  ;;  %v7266_v48 = vld [vmem:[%s7966_s1 + $0x22c] ss:$16 sps:$4 sm:$0xff]  }
 0x27d   : > { %v2906_v49 = vadd.f32 %v2905_v29, %v9181_v13  ;;  %5363 = vmatpush1.bf16.msra.mxu1 %v7246_v6  ;;  %v9244_v47 = vpack.c.bf16 %v3110_v40, %v3102_v50  ;;  %v3017_v1 = vadd.f32 %v3016_v0, %v2904_v3  ;;  %v7263_v6 = vld [vmem:[%s7966_s1 + $0x44c] ss:$16 sps:$4 sm:$0xff]   ;;  %v3015_v50 = vadd.f32 %v3014_v39, %v2902_v10  ;;  %v7258_v40 = vld [vmem:[%s7966_s1 + $0x248] ss:$16 sps:$4 sm:$0xff]  }
 0x27e   : > { %v3018_v22 = vpop.f32.mrf.mxu1  ;;  %5476 = vmatpush1.bf16.msra.mxu0 %v7249_v37  ;;  %v2907_v18 = vpop.f32.mrf.mxu0  ;;  %5364 = vmatprep.subr.bf16.mxu1 %v7254_v41 }
 0x27f   : > { %v3019_v11 = vadd.f32 %v3018_v22, %v2906_v49  ;;  %v2908_v30 = vadd.f32 %v2907_v18, %v9179_v7  ;;  %5182 = vmatprep.mubr.bf16.mxu1 %v9244_v47  ;;  %5477 = vmatprep.subr.bf16.mxu0 %v7257_v36  ;;  %v7261_v36 = vld [vmem:[%s7966_s1 + $0x448] ss:$16 sps:$4 sm:$0xff]   ;;  %v3118_v39 = vmax.f32 %v3017_v1, 0.0  ;;  %v7269_v49 = vld [vmem:[%s7966_s1 + $0x42c] ss:$16 sps:$4 sm:$0xff]   ;;  %v3117_v22 = vmax.f32 %v3015_v50, 0.0 }
 0x280   : > { %v3020_v28 = vpop.f32.mrf.mxu1  ;;  %v2911_v33 = vpop.f32.mrf.mxu0  ;;  %5183 = vmatmul.mubr.bf16.gmra.mxu1 %v9247_v51  ;;  %5296 = vmatmul.mubr.bf16.gmra.mxu0 %v8858_v34  ;;  %v7264_v1 = vld [vmem:[%s7966_s1 + $0x228] ss:$16 sps:$4 sm:$0xff]  }
 0x281   : > { %v3021_v37 = vadd.f32 %v3020_v28, %v2908_v30  ;;  %5305 = vmatprep.mubr.bf16.mxu0 %v8873_v4  ;;  %5365 = vmatpush1.bf16.msra.mxu1 %v7252_v32  ;;  %v3125_v3 = vmax.f32 %v3019_v11, 0.0  ;;  %v2912_v4 = vadd.f32 %v2911_v33, %v9181_v13  ;;  %v7267_v28 = vld [vmem:[%s7966_s1 + $0x428] ss:$16 sps:$4 sm:$0xff]  }
 0x282   : > { %v3024_v41 = vpop.f32.mrf.mxu1  ;;  %5478 = vmatpush1.bf16.msra.mxu0 %v7255_v59  ;;  %v2913_v0 = vpop.f32.mrf.mxu0  ;;  %5366 = vmatprep.subr.bf16.mxu1 %v7260_v58 }
 0x283   : > { %v3126_v10 = vmax.f32 %v3021_v37, 0.0  ;;  %v2914_v29 = vadd.f32 %v2913_v0, %v9179_v7  ;;  %5479 = vmatprep.subr.bf16.mxu0 %v7263_v6  ;;  %v9267_v11 = vpack.c.bf16 %v3125_v3, %v3117_v22  ;;  %v7272_v6 = vld [vmem:[%s7966_s1 + $0x20c] ss:$16 sps:$4 sm:$0xff]  }
 0x284   : > { %v3026_v34 = vpop.f32.mrf.mxu1  ;;  %v2915_v32 = vpop.f32.mrf.mxu0  ;;  %v7278_v22 = vld [vmem:[%s7966_s1 + $0x3ec] ss:$16 sps:$4 sm:$0xff]  }
 0x285   : > { %v2916_v18 = vadd.f32 %v2915_v32, %v9181_v13  ;;  %5367 = vmatpush1.bf16.msra.mxu1 %v7258_v40  ;;  %v9264_v58 = vpack.c.bf16 %v3126_v10, %v3118_v39  ;;  %v3027_v50 = vadd.f32 %v3026_v34, %v2914_v29  ;;  %v7275_v40 = vld [vmem:[%s7966_s1 + $0x40c] ss:$16 sps:$4 sm:$0xff]   ;;  %v3025_v39 = vadd.f32 %v3024_v41, %v2912_v4  ;;  %v7270_v10 = vld [vmem:[%s7966_s1 + $0x208] ss:$16 sps:$4 sm:$0xff]  }
 0x286   : > { %v3028_v59 = vpop.f32.mrf.mxu1  ;;  %5480 = vmatpush1.bf16.msra.mxu0 %v7261_v36  ;;  %v2917_v30 = vpop.f32.mrf.mxu0  ;;  %5368 = vmatprep.subr.bf16.mxu1 %v7266_v48 }
 0x287   : > { %v3029_v37 = vadd.f32 %v3028_v59, %v2916_v18  ;;  %v2918_v33 = vadd.f32 %v2917_v30, %v9179_v7  ;;  %5192 = vmatprep.mubr.bf16.mxu1 %v9264_v58  ;;  %5481 = vmatprep.subr.bf16.mxu0 %v7269_v49  ;;  %v7273_v49 = vld [vmem:[%s7966_s1 + $0x408] ss:$16 sps:$4 sm:$0xff]   ;;  %v3134_v41 = vmax.f32 %v3027_v50, 0.0  ;;  %v7281_v18 = vld [vmem:[%s7966_s1 + $0x5ec] ss:$16 sps:$4 sm:$0xff]   ;;  %v3133_v59 = vmax.f32 %v3025_v39, 0.0 }
 0x288   : > { %v3030_v0 = vpop.f32.mrf.mxu1  ;;  %v2921_v3 = vpop.f32.mrf.mxu0  ;;  %5193 = vmatmul.mubr.bf16.gmra.mxu1 %v9267_v11  ;;  %5306 = vmatmul.mubr.bf16.gmra.mxu0 %v8883_v26  ;;  %v7276_v50 = vld [vmem:[%s7966_s1 + $0x3e8] ss:$16 sps:$4 sm:$0xff]  }
 0x289   : > { %v3031_v36 = vadd.f32 %v3030_v0, %v2918_v33  ;;  %5315 = vmatprep.mubr.bf16.mxu0 %v8907_v20  ;;  %5369 = vmatpush1.bf16.msra.mxu1 %v7264_v1  ;;  %v3141_v29 = vmax.f32 %v3029_v37, 0.0  ;;  %v2922_v20 = vadd.f32 %v2921_v3, %v9181_v13  ;;  %v7279_v0 = vld [vmem:[%s7966_s1 + $0x5e8] ss:$16 sps:$4 sm:$0xff]  }
 0x28a   : > { %v3034_v48 = vpop.f32.mrf.mxu1  ;;  %5482 = vmatpush1.bf16.msra.mxu0 %v7267_v28  ;;  %v2923_v34 = vpop.f32.mrf.mxu0  ;;  %5370 = vmatprep.subr.bf16.mxu1 %v7272_v6 }
 0x28b   : > { %v3142_v4 = vmax.f32 %v3031_v36, 0.0  ;;  %v2924_v32 = vadd.f32 %v2923_v34, %v9179_v7  ;;  %5483 = vmatprep.subr.bf16.mxu0 %v7275_v40  ;;  %v9287_v37 = vpack.c.bf16 %v3141_v29, %v3133_v59  ;;  %v7284_v40 = vld [vmem:[%s7966_s1 + $0x3cc] ss:$16 sps:$4 sm:$0xff]  }
 0x28c   : > { %v3036_v26 = vpop.f32.mrf.mxu1  ;;  %v2925_v1 = vpop.f32.mrf.mxu0  ;;  %v7290_v59 = vld [vmem:[%s7966_s1 + $0x3ac] ss:$16 sps:$4 sm:$0xff]  }
 0x28d   : > { %v2926_v30 = vadd.f32 %v2925_v1, %v9181_v13  ;;  %5371 = vmatpush1.bf16.msra.mxu1 %v7270_v10  ;;  %v9284_v6 = vpack.c.bf16 %v3142_v4, %v3134_v41  ;;  %v3037_v39 = vadd.f32 %v3036_v26, %v2924_v32  ;;  %v7287_v10 = vld [vmem:[%s7966_s1 + $0x5cc] ss:$16 sps:$4 sm:$0xff]   ;;  %v3035_v41 = vadd.f32 %v3034_v48, %v2922_v20  ;;  %v7282_v4 = vld [vmem:[%s7966_s1 + $0x3c8] ss:$16 sps:$4 sm:$0xff]  }
 0x28e   : > { %v3038_v28 = vpop.f32.mrf.mxu1  ;;  %5484 = vmatpush1.bf16.msra.mxu0 %v7273_v49  ;;  %v2927_v33 = vpop.f32.mrf.mxu0  ;;  %5372 = vmatprep.subr.bf16.mxu1 %v7278_v22 }
 0x28f   : > { %v3039_v36 = vadd.f32 %v3038_v28, %v2926_v30  ;;  %v2928_v3 = vadd.f32 %v2927_v33, %v9179_v7  ;;  %5202 = vmatprep.mubr.bf16.mxu1 %v9284_v6  ;;  %5485 = vmatprep.subr.bf16.mxu0 %v7281_v18  ;;  %v7285_v18 = vld [vmem:[%s7966_s1 + $0x5c8] ss:$16 sps:$4 sm:$0xff]   ;;  %v3150_v48 = vmax.f32 %v3037_v39, 0.0  ;;  %v7293_v30 = vld [vmem:[%s7966_s1 + $0x5ac] ss:$16 sps:$4 sm:$0xff]   ;;  %v3149_v28 = vmax.f32 %v3035_v41, 0.0 }
 0x290   : > { %v3040_v34 = vpop.f32.mrf.mxu1  ;;  %v2931_v29 = vpop.f32.mrf.mxu0  ;;  %5203 = vmatmul.mubr.bf16.gmra.mxu1 %v9287_v37  ;;  %5316 = vmatmul.mubr.bf16.gmra.mxu0 %v8932_v44  ;;  %v7288_v39 = vld [vmem:[%s7966_s1 + $0x3a8] ss:$16 sps:$4 sm:$0xff]  }
 0x291   : > { %v3041_v49 = vadd.f32 %v3040_v34, %v2928_v3  ;;  %5325 = vmatprep.mubr.bf16.mxu0 %v8942_v35  ;;  %5373 = vmatpush2.bf16.msra.mxu1 %v7276_v50  ;;  %v3157_v32 = vmax.f32 %v3039_v36, 0.0  ;;  %v2932_v35 = vadd.f32 %v2931_v29, %v9181_v13  ;;  %v7291_v34 = vld [vmem:[%s7966_s1 + $0x5a8] ss:$16 sps:$4 sm:$0xff]  }
 0x292   : > { %v3044_v22 = vpop.f32.mrf.mxu1  ;;  %5486 = vmatpush2.bf16.msra.mxu0 %v7279_v0  ;;  %v2933_v26 = vpop.f32.mrf.mxu0  ;;  %5374 = vmatprep.subr.bf16.mxu1 %v7284_v40 }
 0x293   : > { %v3158_v20 = vmax.f32 %v3041_v49, 0.0  ;;  %v2934_v1 = vadd.f32 %v2933_v26, %v9179_v7  ;;  %5487 = vmatprep.subr.bf16.mxu0 %v7287_v10  ;;  %v9307_v36 = vpack.c.bf16 %v3157_v32, %v3149_v28  ;;  %v7296_v10 = vld [vmem:[%s7966_s1 + $0x38c] ss:$16 sps:$4 sm:$0xff]  }
 0x294   : > { %v3046_v44 = vpop.f32.mrf.mxu1  ;;  %v2935_v50 = vpop.f32.mrf.mxu0  ;;  %v7302_v28 = vld [vmem:[%s7966_s1 + $0x36c] ss:$16 sps:$4 sm:$0xff]  }
 0x295   : > { %v2936_v33 = vadd.f32 %v2935_v50, %v9181_v13  ;;  %5375 = vmatpush2.bf16.msra.mxu1 %v7282_v4  ;;  %v9304_v40 = vpack.c.bf16 %v3158_v20, %v3150_v48  ;;  %v3047_v41 = vadd.f32 %v3046_v44, %v2934_v1  ;;  %v7299_v4 = vld [vmem:[%s7966_s1 + $0x58c] ss:$16 sps:$4 sm:$0xff]   ;;  %v3045_v48 = vadd.f32 %v3044_v22, %v2932_v35  ;;  %v7294_v20 = vld [vmem:[%s7966_s1 + $0x388] ss:$16 sps:$4 sm:$0xff]  }
 0x296   : > { %v3048_v0 = vpop.f32.mrf.mxu1  ;;  %5488 = vmatpush2.bf16.msra.mxu0 %v7285_v18  ;;  %v2937_v3 = vpop.f32.mrf.mxu0  ;;  %5376 = vmatprep.subr.bf16.mxu1 %v7290_v59 }
 0x297   : > { %v3049_v49 = vadd.f32 %v3048_v0, %v2936_v33  ;;  %v2938_v29 = vadd.f32 %v2937_v3, %v9179_v7  ;;  %5212 = vmatprep.mubr.bf16.mxu1 %v9304_v40  ;;  %5489 = vmatprep.subr.bf16.mxu0 %v7293_v30  ;;  %v7297_v30 = vld [vmem:[%s7966_s1 + $0x588] ss:$16 sps:$4 sm:$0xff]   ;;  %v3166_v22 = vmax.f32 %v3047_v41, 0.0  ;;  %v7305_v33 = vld [vmem:[%s7966_s1 + $0x56c] ss:$16 sps:$4 sm:$0xff]   ;;  %v3165_v0 = vmax.f32 %v3045_v48, 0.0 }
 0x298   : > { %v3050_v26 = vpop.f32.mrf.mxu1  ;;  %v2941_v32 = vpop.f32.mrf.mxu0  ;;  %5213 = vmatmul.mubr.bf16.gmra.mxu1 %v9307_v36  ;;  %5326 = vmatmul.mubr.bf16.gmra.mxu0 %v8962_v38  ;;  %v7300_v41 = vld [vmem:[%s7966_s1 + $0x368] ss:$16 sps:$4 sm:$0xff]  }
 0x299   : > { %v3051_v18 = vadd.f32 %v3050_v26, %v2938_v29  ;;  %5335 = vmatprep.mubr.bf16.mxu0 %v8978_v25  ;;  %5377 = vmatpush2.bf16.msra.mxu1 %v7288_v39  ;;  %v3173_v1 = vmax.f32 %v3049_v49, 0.0  ;;  %v2942_v25 = vadd.f32 %v2941_v32, %v9181_v13  ;;  %v7303_v26 = vld [vmem:[%s7966_s1 + $0x568] ss:$16 sps:$4 sm:$0xff]  }
 0x29a   : > { %v3054_v59 = vpop.f32.mrf.mxu1  ;;  %5490 = vmatpush2.bf16.msra.mxu0 %v7291_v34  ;;  %v2943_v44 = vpop.f32.mrf.mxu0  ;;  %5378 = vmatprep.subr.bf16.mxu1 %v7296_v10 }
 0x29b   : > { %v3174_v35 = vmax.f32 %v3051_v18, 0.0  ;;  %v2944_v50 = vadd.f32 %v2943_v44, %v9179_v7  ;;  %5491 = vmatprep.subr.bf16.mxu0 %v7299_v4  ;;  %v9327_v49 = vpack.c.bf16 %v3173_v1, %v3165_v0  ;;  %v7308_v4 = vld [vmem:[%s7966_s1 + $0x34c] ss:$16 sps:$4 sm:$0xff]  }
 0x29c   : > { %v3056_v38 = vpop.f32.mrf.mxu1  ;;  %v2945_v39 = vpop.f32.mrf.mxu0 }
 0x29d   : > { %v2946_v3 = vadd.f32 %v2945_v39, %v9181_v13  ;;  %5379 = vmatpush2.bf16.msra.mxu1 %v7294_v20  ;;  %v9324_v10 = vpack.c.bf16 %v3174_v35, %v3166_v22  ;;  %v3057_v48 = vadd.f32 %v3056_v38, %v2944_v50  ;;  %v7311_v13 = vld [vmem:[%s7966_s1 + $0x54c] ss:$16 sps:$4 sm:$0xff]   ;;  %v3055_v20 = vadd.f32 %v3054_v59, %v2942_v25  ;;  %v7309_v35 = vld [vmem:[%s7966_s1 + $0x548] ss:$16 sps:$4 sm:$0xff]  }
 0x29e   : > { %v3058_v34 = vpop.f32.mrf.mxu1  ;;  %5492 = vmatpush2.bf16.msra.mxu0 %v7297_v30  ;;  %v2947_v29 = vpop.f32.mrf.mxu0  ;;  %5380 = vmatprep.subr.bf16.mxu1 %v7302_v28  ;;  %v7314_v59 = vld [vmem:[%s7966_s1 + $0x32c] ss:$16 sps:$4 sm:$0xff]   ;;  %v7312_v25 = vld [vmem:[%s7966_s1 + $0x328] ss:$16 sps:$4 sm:$0xff]  }
 0x29f   : > { %v3059_v18 = vadd.f32 %v3058_v34, %v2946_v3  ;;  %v2948_v32 = vadd.f32 %v2947_v29, %v9179_v7  ;;  %5222 = vmatprep.mubr.bf16.mxu1 %v9324_v10  ;;  %5493 = vmatprep.subr.bf16.mxu0 %v7305_v33  ;;  %v7306_v7 = vld [vmem:[%s7966_s1 + $0x348] ss:$16 sps:$4 sm:$0xff]   ;;  %v3182_v50 = vmax.f32 %v3057_v48, 0.0  ;;  %v7317_v33 = vld [vmem:[%s7966_s1 + $0x52c] ss:$16 sps:$4 sm:$0xff]  }
 0x2a0   : > { %v3060_v44 = vpop.f32.mrf.mxu1  ;;  %v4825_v1 = vpop.f32.mrf.mxu0  ;;  %5223 = vmatmul.mubr.bf16.gmra.mxu1 %v9327_v49  ;;  %5336 = vmatmul.mubr.bf16.gmra.mxu0 %v8999_v62  ;;  %v3181_v62 = vmax.f32 %v3055_v20, 0.0  ;;  %v7315_v34 = vld [vmem:[%s7966_s1 + $0x528] ss:$16 sps:$4 sm:$0xff]   ;;  %v7323_v29 = vld [vmem:[%s7966_s1 + $0x50c] ss:$16 sps:$4 sm:$0xff]  }
 0x2a1   : > { %v3061_v30 = vadd.f32 %v3060_v44, %v2948_v32  ;;  %5345 = vmatprep.mubr.bf16.mxu0 %v9008_v23  ;;  %5381 = vmatpush2.bf16.msra.mxu1 %v7300_v41  ;;  %v3189_v28 = vmax.f32 %v3059_v18, 0.0  ;;  %v7320_v41 = vld [vmem:[%s7966_s1 + $0x30c] ss:$16 sps:$4 sm:$0xff]   ;;  %v7321_v18 = vld [vmem:[%s7966_s1 + $0x508] ss:$16 sps:$4 sm:$0xff]  }
 0x2a2   : > { %5494 = vmatpush2.bf16.msra.mxu0 %v7303_v26  ;;  %v4827_v22 = vpop.f32.mrf.mxu0  ;;  %5382 = vmatprep.subr.bf16.mxu1 %v7308_v4  ;;  %v7318_v4 = vld [vmem:[%s7966_s1 + $0x308] ss:$16 sps:$4 sm:$0xff]   ;;  %v7326_v32 = vld [vmem:[%s7966_s1 + $0x6ec] ss:$16 sps:$4 sm:$0xff]  }
 0x2a3   : > { %v3190_v38 = vmax.f32 %v3061_v30, 0.0  ;;  %5495 = vmatprep.subr.bf16.mxu0 %v7311_v13  ;;  %v9344_v39 = vpack.c.bf16 %v3189_v28, %v3181_v62  ;;  %v7329_v44 = vld [vmem:[%s7966_s1 + $0x6cc] ss:$16 sps:$4 sm:$0xff]  }
 0x2a4   : > { %v4829_v0 = vpop.f32.mrf.mxu0 }
 0x2a5   : > { %5383 = vmatpush2.bf16.msra.mxu1 %v7306_v7  ;;  %v9341_v23 = vpack.c.bf16 %v3190_v38, %v3182_v50  ;;  %v7332_v50 = vld [vmem:[%s7966_s1 + $0x6ac] ss:$16 sps:$4 sm:$0xff]  }
 0x2a6   : > { %5496 = vmatpush2.bf16.msra.mxu0 %v7309_v35  ;;  %v9346_v3 = vpop.f32.mrf.mxu0  ;;  %5384 = vmatprep.subr.bf16.mxu1 %v7314_v59  ;;  %v7327_v35 = vld [vmem:[%s7966_s1 + $0x6c8] ss:$16 sps:$4 sm:$0xff]  }
 0x2a7   : > { %5232 = vmatprep.mubr.bf16.mxu1 %v9341_v23  ;;  %5497 = vmatprep.subr.bf16.mxu0 %v7317_v33  ;;  %v7335_v33 = vld [vmem:[%s7966_s1 + $0x68c] ss:$16 sps:$4 sm:$0xff]  }
 0x2a8   : > { %v4835_v26 = vpop.f32.mrf.mxu0  ;;  %5233 = vmatmul.mubr.bf16.gmra.mxu1 %v9344_v39  ;;  %5346 = vmatmul.mubr.bf16.gmra.mxu0 %v9029_v19  ;;  %v7324_v19 = vld [vmem:[%s7966_s1 + $0x6e8] ss:$16 sps:$4 sm:$0xff]  }
 0x2a9   : > { %5385 = vmatpush2.bf16.msra.mxu1 %v7312_v25  ;;  %5388 = vmatprep.mubr.bf16.mxu1 %v8861_v17 }
 0x2aa   : > { %5498 = vmatpush2.bf16.msra.mxu0 %v7315_v34  ;;  %5501 = vmatprep.mubr.bf16.mxu0 %v9083_v57  ;;  %v4837_v48 = vpop.f32.mrf.mxu0 }
 0x2ab   : > { %5386 = vmatprep.subr.bf16.mxu1 %v7320_v41  ;;  %5499 = vmatprep.subr.bf16.mxu0 %v7323_v29  ;;  %v7333_v41 = vld [vmem:[%s7966_s1 + $0x688] ss:$16 sps:$4 sm:$0xff]  }
 0x2ac   : > { %v4839_v13 = vpop.f32.mrf.mxu0 }
 0x2ad   : > { %5387 = vmatpush2.bf16.msra.mxu1 %v7318_v4  ;;  %v7338_v4 = vld [vmem:[%s7966_s1 + $0x66c] ss:$16 sps:$4 sm:$0xff]  }
 0x2ae   : > { %5500 = vmatpush2.bf16.msra.mxu0 %v7321_v18  ;;  %v9359_v20 = vpop.f32.mrf.mxu0  ;;  %5582 = vmatprep.subr.bf16.mxu1 %v7326_v32  ;;  %v7341_v32 = vld [vmem:[%s7966_s1 + $0x64c] ss:$16 sps:$4 sm:$0xff]  }
 0x2b0   : > { %v4845_v17 = vpop.f32.mrf.mxu0  ;;  %v4938_v30 = vpop.f32.mrf.mxu1  ;;  %5389 = vmatmul.mubr.bf16.vlgmr.msra.gmra.mxu1 %v8867_v27 }
 0x2b1   : > { %v9364_v57 = vadd.f32 %v4938_v30, %v4825_v1  ;;  %5502 = vmatmul.mubr.bf16.vlgmr.msra.gmra.mxu0 %v9086_v21  ;;  %5398 = vmatprep.mubr.bf16.mxu1 %v8901_v15 }
 0x2b2   : > { %5511 = vmatprep.mubr.bf16.mxu0 %v9097_v54  ;;  %5583 = vmatpush1.bf16.msra.mxu1 %v7324_v19  ;;  %v4847_v7 = vpop.f32.mrf.mxu0  ;;  %v4940_v28 = vpop.f32.mrf.mxu1  ;;  %v7330_v54 = vld [vmem:[%s7966_s1 + $0x6a8] ss:$16 sps:$4 sm:$0xff]  }
 0x2b3   : > { %v9370_v59 = vadd.f32 %v4940_v28, %v4827_v22  ;;  %5584 = vmatprep.subr.bf16.mxu1 %v7329_v44  ;;  %v7339_v28 = vld [vmem:[%s7966_s1 + $0x648] ss:$16 sps:$4 sm:$0xff]  }
 0x2b4   : > { %v4849_v38 = vpop.f32.mrf.mxu0  ;;  %v4942_v27 = vpop.f32.mrf.mxu1 }
 0x2b5   : > { %v9373_v1 = vadd.f32 %v4942_v27, %v4829_v0 }
 0x2b6   : > { %5585 = vmatpush1.bf16.msra.mxu1 %v7327_v35  ;;  %v9375_v21 = vpop.f32.mrf.mxu0  ;;  %v9377_v15 = vpop.f32.mrf.mxu1 }
 0x2b7   : > { %5586 = vmatprep.subr.bf16.mxu1 %v7332_v50  ;;  %v7344_v50 = vld [vmem:[%s7966_s1 + $0x62c] ss:$16 sps:$4 sm:$0xff]  }
 0x2b8   : > { %v4855_v62 = vpop.f32.mrf.mxu0  ;;  %v4948_v25 = vpop.f32.mrf.mxu1  ;;  %5399 = vmatmul.mubr.bf16.gmra.mxu1 %v8905_v52 }
 0x2b9   : > { %v9382_v22 = vadd.f32 %v4948_v25, %v4835_v26  ;;  %5512 = vmatmul.mubr.bf16.gmra.mxu0 %v9100_v24  ;;  %5408 = vmatprep.mubr.bf16.mxu1 %v8936_v5 }
 0x2ba   : > { %5521 = vmatprep.mubr.bf16.mxu0 %v9111_v60  ;;  %5587 = vmatpush1.bf16.msra.mxu1 %v7330_v54  ;;  %v4857_v0 = vpop.f32.mrf.mxu0  ;;  %v4950_v34 = vpop.f32.mrf.mxu1  ;;  %v7336_v60 = vld [vmem:[%s7966_s1 + $0x668] ss:$16 sps:$4 sm:$0xff]  }
 0x2bb   : > { %v9388_v29 = vadd.f32 %v4950_v34, %v4837_v48  ;;  %5588 = vmatprep.subr.bf16.mxu1 %v7335_v33 }
 0x2bc   : > { %v4859_v18 = vpop.f32.mrf.mxu0  ;;  %v4952_v52 = vpop.f32.mrf.mxu1 }
 0x2bd   : > { %v9391_v26 = vadd.f32 %v4952_v52, %v4839_v13  ;;  %v7350_v52 = vld [vmem:[%s7966_s1 + $0x7ec] ss:$16 sps:$4 sm:$0xff]  }
 0x2be   : > { %5589 = vmatpush1.bf16.msra.mxu1 %v7333_v41  ;;  %v9393_v24 = vpop.f32.mrf.mxu0  ;;  %v9395_v5 = vpop.f32.mrf.mxu1  ;;  %v7345_v41 = vld [vmem:[%s7966_s1 + $0x608] ss:$16 sps:$4 sm:$0xff]  }
 0x2bf   : > { %5590 = vmatprep.subr.bf16.mxu1 %v7338_v4 }
 0x2c0   : > { %v4865_v19 = vpop.f32.mrf.mxu0  ;;  %v4958_v44 = vpop.f32.mrf.mxu1  ;;  %5409 = vmatmul.mubr.bf16.gmra.mxu1 %v8940_v14 }
 0x2c1   : > { %v9400_v48 = vadd.f32 %v4958_v44, %v4845_v17  ;;  %5522 = vmatmul.mubr.bf16.gmra.mxu0 %v9114_v42  ;;  %5418 = vmatprep.mubr.bf16.mxu1 %v8972_v46  ;;  %v7342_v46 = vld [vmem:[%s7966_s1 + $0x628] ss:$16 sps:$4 sm:$0xff]  }
 0x2c2   : > { %5531 = vmatprep.mubr.bf16.mxu0 %v9125_v63  ;;  %5591 = vmatpush1.bf16.msra.mxu1 %v7336_v60  ;;  %v4867_v13 = vpop.f32.mrf.mxu0  ;;  %v4960_v30 = vpop.f32.mrf.mxu1  ;;  %v7347_v63 = vld [vmem:[%s7966_s1 + $0x60c] ss:$16 sps:$4 sm:$0xff]  }
 0x2c3   : > { %v9406_v35 = vadd.f32 %v4960_v30, %v4847_v7  ;;  %5592 = vmatprep.subr.bf16.mxu1 %v7341_v32 }
 0x2c4   : > { %v4869_v27 = vpop.f32.mrf.mxu0  ;;  %v4962_v14 = vpop.f32.mrf.mxu1 }
 0x2c5   : > { %v9409_v17 = vadd.f32 %v4962_v14, %v4849_v38  ;;  %v7356_v14 = vld [vmem:[%s7966_s1 + $0x7ac] ss:$16 sps:$4 sm:$0xff]  }
 0x2c6   : > { %5593 = vmatpush1.bf16.msra.mxu1 %v7339_v28  ;;  %v4871_v42 = vpop.f32.mrf.mxu0  ;;  %v9411_v54 = vpop.f32.mrf.mxu1  ;;  %v7351_v28 = vld [vmem:[%s7966_s1 + $0x7c8] ss:$16 sps:$4 sm:$0xff]  }
 0x2c7   : > { %5594 = vmatprep.subr.bf16.mxu1 %v7344_v50 }
 0x2c8   : > { %v4875_v33 = vpop.f32.mrf.mxu0  ;;  %v4968_v25 = vpop.f32.mrf.mxu1  ;;  %5419 = vmatmul.mubr.bf16.gmra.mxu1 %v8976_v55 }
 0x2c9   : > { %v9416_v7 = vadd.f32 %v4968_v25, %v4855_v62  ;;  %5532 = vmatmul.mubr.bf16.gmra.mxu0 %v9128_v12  ;;  %5428 = vmatprep.mubr.bf16.mxu1 %v9002_v16  ;;  %v7348_v16 = vld [vmem:[%s7966_s1 + $0x7e8] ss:$16 sps:$4 sm:$0xff]  }
 0x2ca   : > { %5541 = vmatprep.mubr.bf16.mxu0 %v9139_v45  ;;  %5595 = vmatpush1.bf16.msra.mxu1 %v7342_v46  ;;  %v4877_v38 = vpop.f32.mrf.mxu0  ;;  %v4970_v34 = vpop.f32.mrf.mxu1  ;;  %v7353_v45 = vld [vmem:[%s7966_s1 + $0x7cc] ss:$16 sps:$4 sm:$0xff]  }
 0x2cb   : > { %v9422_v4 = vadd.f32 %v4970_v34, %v4857_v0  ;;  %5596 = vmatprep.subr.bf16.mxu1 %v7347_v63  ;;  %v7354_v63 = vld [vmem:[%s7966_s1 + $0x7a8] ss:$16 sps:$4 sm:$0xff]  }
 0x2cc   : > { %v4879_v60 = vpop.f32.mrf.mxu0  ;;  %v4972_v55 = vpop.f32.mrf.mxu1 }
 0x2cd   : > { %v9425_v62 = vadd.f32 %v4972_v55, %v4859_v18 }
 0x2ce   : > { %5597 = vmatpush1.bf16.msra.mxu1 %v7345_v41  ;;  %v4881_v12 = vpop.f32.mrf.mxu0  ;;  %v9427_v32 = vpop.f32.mrf.mxu1  ;;  %v10575_v41 = vld [vmem:[#allocation29_spill] sm:$0xff] }
 0x2cf   : > { %5598 = vmatprep.subr.bf16.mxu1 %v7350_v52 }
 0x2d0   : > { %v4978_v44 = vpop.f32.mrf.mxu1  ;;  %5429 = vmatmul.mubr.bf16.gmra.mxu1 %v9006_v43  ;;  %v4885_v18 = vpop.f32.mrf.mxu0 }
 0x2d1   : > { %v9432_v0 = vadd.f32 %v4978_v44, %v4865_v19  ;;  %5542 = vmatmul.mubr.bf16.gmra.mxu0 %v9142_v61  ;;  %5438 = vmatprep.mubr.bf16.mxu1 %v9026_v53  ;;  %v7360_v44 = vld [vmem:[%s7966_s1 + $0x768] ss:$16 sps:$4 sm:$0xff]  }
 0x2d2   : > { %5551 = vmatprep.mubr.bf16.mxu0 %v9153_v8  ;;  %5599 = vmatpush2.bf16.msra.mxu1 %v7348_v16  ;;  %v4980_v30 = vpop.f32.mrf.mxu1  ;;  %v4887_v19 = vpop.f32.mrf.mxu0  ;;  %v7359_v8 = vld [vmem:[%s7966_s1 + $0x78c] ss:$16 sps:$4 sm:$0xff]  }
 0x2d3   : > { %v9438_v50 = vadd.f32 %v4980_v30, %v4867_v13  ;;  %5600 = vmatprep.subr.bf16.mxu1 %v7353_v45  ;;  %v7362_v16 = vld [vmem:[%s7966_s1 + $0x76c] ss:$16 sps:$4 sm:$0xff]  }
 0x2d4   : > { %v4982_v46 = vpop.f32.mrf.mxu1  ;;  %v4889_v34 = vpop.f32.mrf.mxu0 }
 0x2d5   : > { %v9441_v43 = vadd.f32 %v4982_v46, %v4869_v27  ;;  %v10574_v27 = vld [vmem:[#allocation32_spill] sm:$0xff]  ;;  %v10576_v46 = vld [vmem:[#allocation30_spill] sm:$0xff] }
 0x2d6   : > { %5601 = vmatpush2.bf16.msra.mxu1 %v7351_v28  ;;  %v4984_v61 = vpop.f32.mrf.mxu1  ;;  %v7365_v28 = vld [vmem:[%s7966_s1 + $0x74c] ss:$16 sps:$4 sm:$0xff]  }
 0x2d7   : > { %v9444_v53 = vadd.f32 %v4984_v61, %v4871_v42  ;;  %5602 = vmatprep.subr.bf16.mxu1 %v7356_v14  ;;  %v7357_v42 = vld [vmem:[%s7966_s1 + $0x788] ss:$16 sps:$4 sm:$0xff]   ;;  %v10577_v61 = vld [vmem:[#allocation34_spill] sm:$0xff] }
 0x2d8   : > { %v4988_v25 = vpop.f32.mrf.mxu1  ;;  %5439 = vmatmul.mubr.bf16.gmra.mxu1 %v9031_v2 }
 0x2d9   : > { %v9448_v13 = vadd.f32 %v4988_v25, %v4875_v33  ;;  %5552 = vmatmul.mubr.bf16.gmra.mxu0 %v9156_v9  ;;  %5448 = vmatprep.mubr.bf16.mxu1 %v10574_v27  ;;  %v4891_v33 = vpop.f32.mrf.mxu0 }
 0x2da   : > { %5561 = vmatprep.mubr.bf16.mxu0 %v10575_v41  ;;  %5603 = vmatpush2.bf16.msra.mxu1 %v7354_v63  ;;  %v4990_v52 = vpop.f32.mrf.mxu1  ;;  %v7368_v41 = vld [vmem:[%s7966_s1 + $0x72c] ss:$16 sps:$4 sm:$0xff]  }
 0x2db   : > { %v9454_v55 = vadd.f32 %v4990_v52, %v4877_v38  ;;  %5604 = vmatprep.subr.bf16.mxu1 %v7359_v8  ;;  %v4895_v63 = vpop.f32.mrf.mxu0  ;;  %v10579_v8 = vld [vmem:[#allocation33_spill] sm:$0xff] }
 0x2dc   : > { %v4992_v45 = vpop.f32.mrf.mxu1 }
 0x2dd   : > { %v9457_v2 = vadd.f32 %v4992_v45, %v4879_v60  ;;  %v10578_v60 = vld [vmem:[#allocation28_spill] sm:$0xff]  ;;  %v7366_v45 = vld [vmem:[%s7966_s1 + $0x728] ss:$16 sps:$4 sm:$0xff]  }
 0x2de   : > { %5605 = vmatpush2.bf16.msra.mxu1 %v7357_v42  ;;  %v4994_v9 = vpop.f32.mrf.mxu1 }
 0x2df   : > { %v9460_v30 = vadd.f32 %v4994_v9, %v4881_v12  ;;  %5606 = vmatprep.subr.bf16.mxu1 %v7362_v16  ;;  %v7363_v12 = vld [vmem:[%s7966_s1 + $0x748] ss:$16 sps:$4 sm:$0xff]  }
 0x2e0   : > { %v4998_v14 = vpop.f32.mrf.mxu1  ;;  %5449 = vmatmul.mubr.bf16.gmra.mxu1 %v10576_v46 }
 0x2e1   : > { %v9464_v38 = vadd.f32 %v4998_v14, %v4885_v18  ;;  %5562 = vmatmul.mubr.bf16.gmra.mxu0 %v10577_v61  ;;  %5458 = vmatprep.mubr.bf16.mxu1 %v10578_v60  ;;  %v4897_v18 = vpop.f32.mrf.mxu0  ;;  %v7371_v14 = vld [vmem:[%s7966_s1 + $0x70c] ss:$16 sps:$4 sm:$0xff]  }
 0x2e2   : > { %5571 = vmatprep.mubr.bf16.mxu0 %v10579_v8  ;;  %5607 = vmatpush2.bf16.msra.mxu1 %v7360_v44  ;;  %v5000_v25 = vpop.f32.mrf.mxu1  ;;  %v10580_v44 = vld [vmem:[#allocation31_spill] sm:$0xff] }
 0x2e3   : > { %v9470_v27 = vadd.f32 %v5000_v25, %v4887_v19  ;;  %5608 = vmatprep.subr.bf16.mxu1 %v7365_v28  ;;  %v10581_v19 = vld [vmem:[#allocation35_spill] sm:$0xff]  ;;  %v10582_v28 = vld [vmem:[#allocation36_spill] sm:$0xff] }
 0x2e4   : > { %v5002_v52 = vpop.f32.mrf.mxu1  ;;  %v7369_v8 = vld [vmem:[%s7966_s1 + $0x708] ss:$16 sps:$4 sm:$0xff]  }
 0x2e5   : > { %v9473_v42 = vadd.f32 %v5002_v52, %v4889_v34  ;;  %v4899_v34 = vpop.f32.mrf.mxu0 }
 0x2e6   : > { %5609 = vmatpush2.bf16.msra.mxu1 %v7363_v12  ;;  %v5004_v16 = vpop.f32.mrf.mxu1 }
 0x2e7   : > { %v9476_v9 = vadd.f32 %v5004_v16, %v4891_v33  ;;  %5610 = vmatprep.subr.bf16.mxu1 %v7368_v41  ;;  %v9489_v41 = vpop.f32.mrf.mxu0  ;;  %v10583_v16 = vld [vmem:[#allocation39_spill] sm:$0xff] }
 0x2e8   : > { %v5008_v46 = vpop.f32.mrf.mxu1  ;;  %5459 = vmatmul.mubr.bf16.gmra.mxu1 %v10580_v44 }
 0x2e9   : > { %v9480_v61 = vadd.f32 %v5008_v46, %v4895_v63  ;;  %5572 = vmatmul.mubr.bf16.gmra.mxu0 %v10581_v19  ;;  %5614 = vmatprep.mubr.bf16.mxu1 %v10582_v28 }
 0x2ea   : > { %5611 = vmatpush2.bf16.msra.mxu1 %v7366_v45  ;;  %v5010_v60 = vpop.f32.mrf.mxu1 }
 0x2eb   : > { %v9485_v25 = vadd.f32 %v5010_v60, %v4897_v18  ;;  %5612 = vmatprep.subr.bf16.mxu1 %v7371_v14  ;;  %v4945_v14 = vadd.f32 %v9377_v15, %v9346_v3  ;;  %v4955_v3 = vadd.f32 %v9395_v5, %v9359_v20  ;;  %v4965_v20 = vadd.f32 %v9411_v54, %v9375_v21 }
 0x2ec   : > { %v5012_v33 = vpop.f32.mrf.mxu1  ;;  %v4975_v21 = vadd.f32 %v9427_v32, %v9393_v24 }
 0x2ed   : > { %v9487_v12 = vadd.f32 %v5012_v33, %v4899_v34 }
 0x2ee   : > { %5613 = vmatpush2.bf16.msra.mxu1 %v7369_v8 }
 0x2f0   : > { %v5051_v52 = vpop.f32.mrf.mxu0 }
 0x2f1   : > { %v9492_v63 = vadd.f32 %v5051_v52, %v9364_v57  ;;  %5615 = vmatmul.mubr.bf16.vlgmr.msra.gmra.mxu1 %v10583_v16 }
 0x2f2   : > { %5624 = vmatprep.mubr.bf16.mxu1 %v9224_v56  ;;  %v5053_v45 = vpop.f32.mrf.mxu0 }
 0x2f3   : > { %v9497_v46 = vadd.f32 %v5053_v45, %v9370_v59 }
 0x2f4   : > { %v5055_v18 = vpop.f32.mrf.mxu0 }
 0x2f5   : > { %v9502_v44 = vadd.f32 %v5055_v18, %v9373_v1 }
 0x2f6   : > { %v5057_v19 = vpop.f32.mrf.mxu0 }
 0x2f7   : > { %v9504_v28 = vadd.f32 %v5057_v19, %v4945_v14 }
 0x2f8   : > { %v5061_v57 = vpop.f32.mrf.mxu0 }
 0x2f9   : > { %v9507_v34 = vadd.f32 %v5061_v57, %v9382_v22  ;;  %5625 = vmatmul.mubr.bf16.gmra.mxu1 %v9227_v31 }
 0x2fa   : > { %5634 = vmatprep.mubr.bf16.mxu1 %v9244_v47  ;;  %v5063_v56 = vpop.f32.mrf.mxu0 }
 0x2fb   : > { %v9512_v59 = vadd.f32 %v5063_v56, %v9388_v29 }
 0x2fc   : > { %v5065_v60 = vpop.f32.mrf.mxu0 }
 0x2fd   : > { %v9517_v1 = vadd.f32 %v5065_v60, %v9391_v26 }
 0x2fe   : > { %v5067_v15 = vpop.f32.mrf.mxu0 }
 0x2ff   : > { %v9519_v8 = vadd.f32 %v5067_v15, %v4955_v3 }
 0x300   : > { %v5071_v22 = vpop.f32.mrf.mxu0 }
 0x301   : > { %v9522_v33 = vadd.f32 %v5071_v22, %v9400_v48  ;;  %5635 = vmatmul.mubr.bf16.gmra.mxu1 %v9247_v51 }
 0x302   : > { %5644 = vmatprep.mubr.bf16.mxu1 %v9264_v58  ;;  %v5073_v31 = vpop.f32.mrf.mxu0 }
 0x303   : > { %v9527_v47 = vadd.f32 %v5073_v31, %v9406_v35 }
 0x304   : > { %v5075_v29 = vpop.f32.mrf.mxu0 }
 0x305   : > { %v9532_v26 = vadd.f32 %v5075_v29, %v9409_v17 }
 0x306   : > { %v5077_v5 = vpop.f32.mrf.mxu0 }
 0x307   : > { %v9534_v52 = vadd.f32 %v5077_v5, %v4965_v20 }
 0x308   : > { %v5081_v48 = vpop.f32.mrf.mxu0 }
 0x309   : > { %v9537_v16 = vadd.f32 %v5081_v48, %v9416_v7  ;;  %5645 = vmatmul.mubr.bf16.gmra.mxu1 %v9267_v11 }
 0x30a   : > { %5654 = vmatprep.mubr.bf16.mxu1 %v9284_v6  ;;  %v5083_v51 = vpop.f32.mrf.mxu0 }
 0x30b   : > { %v9542_v58 = vadd.f32 %v5083_v51, %v9422_v4 }
 0x30c   : > { %v5085_v35 = vpop.f32.mrf.mxu0 }
 0x30d   : > { %v9547_v17 = vadd.f32 %v5085_v35, %v9425_v62 }
 0x30e   : > { %v5087_v54 = vpop.f32.mrf.mxu0 }
 0x30f   : > { %v9549_v45 = vadd.f32 %v5087_v54, %v4975_v21 }
 0x310   : > { %v5091_v7 = vpop.f32.mrf.mxu0 }
 0x311   : > { %v9552_v18 = vadd.f32 %v5091_v7, %v9432_v0  ;;  %5655 = vmatmul.mubr.bf16.gmra.mxu1 %v9287_v37 }
 0x312   : > { %5664 = vmatprep.mubr.bf16.mxu1 %v9304_v40  ;;  %v5093_v11 = vpop.f32.mrf.mxu0 }
 0x313   : > { %v9557_v6 = vadd.f32 %v5093_v11, %v9438_v50 }
 0x314   : > { %v5095_v4 = vpop.f32.mrf.mxu0 }
 0x315   : > { %v9560_v24 = vadd.f32 %v5095_v4, %v9441_v43 }
 0x316   : > { %v5097_v62 = vpop.f32.mrf.mxu0 }
 0x317   : > { %v9563_v32 = vadd.f32 %v5097_v62, %v9444_v53 }
 0x318   : > { %v5101_v14 = vpop.f32.mrf.mxu0 }
 0x319   : > { %v9566_v0 = vadd.f32 %v5101_v14, %v9448_v13  ;;  %5665 = vmatmul.mubr.bf16.gmra.mxu1 %v9307_v36 }
 0x31a   : > { %5674 = vmatprep.mubr.bf16.mxu1 %v9324_v10  ;;  %v5103_v37 = vpop.f32.mrf.mxu0 }
 0x31b   : > { %v9571_v40 = vadd.f32 %v5103_v37, %v9454_v55 }
 0x31c   : > { %v5105_v50 = vpop.f32.mrf.mxu0 }
 0x31d   : > { %v9574_v43 = vadd.f32 %v5105_v50, %v9457_v2 }
 0x31e   : > { %v5107_v19 = vpop.f32.mrf.mxu0 }
 0x31f   : > { %v9577_v53 = vadd.f32 %v5107_v19, %v9460_v30 }
 0x320   : > { %v5111_v57 = vpop.f32.mrf.mxu0 }
 0x321   : > { %v9580_v13 = vadd.f32 %v5111_v57, %v9464_v38  ;;  %5675 = vmatmul.mubr.bf16.gmra.mxu1 %v9327_v49  ;;  %v5014_v49 = vpop.f32.mrf.mxu1 }
 0x322   : > { %5684 = vmatprep.mubr.bf16.mxu1 %v9341_v23  ;;  %v5113_v36 = vpop.f32.mrf.mxu0  ;;  %v5015_v15 = vadd.f32 %v5014_v49, %v9489_v41 }
 0x323   : > { %v9585_v10 = vadd.f32 %v5113_v36, %v9470_v27 }
 0x324   : > { %v5115_v55 = vpop.f32.mrf.mxu0 }
 0x325   : > { %v9588_v2 = vadd.f32 %v5115_v55, %v9473_v42 }
 0x326   : > { %v5117_v56 = vpop.f32.mrf.mxu0 }
 0x327   : > { %v9591_v30 = vadd.f32 %v5117_v56, %v9476_v9 }
 0x328   : > { %v5121_v60 = vpop.f32.mrf.mxu0 }
 0x329   : > { %v9594_v38 = vadd.f32 %v5121_v60, %v9480_v61  ;;  %5685 = vmatmul.mubr.bf16.gmra.mxu1 %v9344_v39 }
 0x32a   : > { %v5123_v23 = vpop.f32.mrf.mxu0 }
 0x32b   : > { %v9598_v3 = vadd.f32 %v5123_v23, %v9485_v25 }
 0x32c   : > { %v5125_v27 = vpop.f32.mrf.mxu0 }
 0x32d   : > { %v9602_v42 = vadd.f32 %v5125_v27, %v9487_v12 }
 0x32e   : > { %v5127_v22 = vpop.f32.mrf.mxu0 }
 0x32f   : > { %v9604_v9 = vadd.f32 %v5127_v22, %v5015_v15 }
 0x330   : > { %v5164_v31 = vpop.f32.mrf.mxu1  ;;  %v9606_v29 = vpop.f32.mrf.mxu0 }
 0x331   : > { %v9609_v61 = vadd.f32 %v5164_v31, %v9492_v63 }
 0x332   : > { %v5166_v39 = vpop.f32.mrf.mxu1  ;;  %v9611_v20 = vpop.f32.mrf.mxu0 }
 0x333   : > { %v9614_v25 = vadd.f32 %v5166_v39, %v9497_v46 }
 0x334   : > { %v5168_v5 = vpop.f32.mrf.mxu1  ;;  %v9616_v41 = vpop.f32.mrf.mxu0 }
 0x335   : > { %v9619_v12 = vadd.f32 %v5168_v5, %v9502_v44 }
 0x336   : > { %v5170_v48 = vpop.f32.mrf.mxu1  ;;  %v9621_v51 = vpop.f32.mrf.mxu0 }
 0x337   : > { %10584 = vst [vmem:[#allocation37_spill] sm:$0xff] %v9619_v12  ;;  %v9624_v35 = vadd.f32 %v5170_v48, %v9504_v28 }
 0x338   : > { %v5174_v63 = vpop.f32.mrf.mxu1  ;;  %v9626_v21 = vpop.f32.mrf.mxu0 }
 0x339   : > { %10585 = vst [vmem:[#allocation38_spill] sm:$0xff] %v9624_v35  ;;  %v9629_v54 = vadd.f32 %v5174_v63, %v9507_v34 }
 0x33a   : > { %v5176_v46 = vpop.f32.mrf.mxu1  ;;  %v9631_v7 = vpop.f32.mrf.mxu0 }
 0x33b   : > { %10586 = vst [vmem:[#allocation32_spill] sm:$0xff] %v9629_v54  ;;  %v9634_v11 = vadd.f32 %v5176_v46, %v9512_v59 }
 0x33c   : > { %v5178_v44 = vpop.f32.mrf.mxu1  ;;  %v9636_v4 = vpop.f32.mrf.mxu0 }
 0x33d   : > { %10587 = vst [vmem:[#allocation29_spill] sm:$0xff] %v9634_v11  ;;  %v9639_v62 = vadd.f32 %v5178_v44, %v9517_v1 }
 0x33e   : > { %v5180_v28 = vpop.f32.mrf.mxu1  ;;  %v9641_v14 = vpop.f32.mrf.mxu0 }
 0x33f   : > { %10588 = vst [vmem:[#allocation30_spill] sm:$0xff] %v9639_v62  ;;  %v9644_v37 = vadd.f32 %v5180_v28, %v9519_v8 }
 0x340   : > { %v5184_v34 = vpop.f32.mrf.mxu1  ;;  %v9646_v50 = vpop.f32.mrf.mxu0 }
 0x341   : > { %10589 = vst [vmem:[#allocation34_spill] sm:$0xff] %v9644_v37  ;;  %v9649_v19 = vadd.f32 %v5184_v34, %v9522_v33 }
 0x342   : > { %v5186_v59 = vpop.f32.mrf.mxu1  ;;  %v9651_v57 = vpop.f32.mrf.mxu0 }
 0x343   : > { %10590 = vst [vmem:[#allocation28_spill] sm:$0xff] %v9649_v19  ;;  %v9654_v36 = vadd.f32 %v5186_v59, %v9527_v47 }
 0x344   : > { %v5188_v1 = vpop.f32.mrf.mxu1  ;;  %v9656_v55 = vpop.f32.mrf.mxu0 }
 0x345   : > { %10591 = vst [vmem:[#allocation33_spill] sm:$0xff] %v9654_v36  ;;  %v9659_v56 = vadd.f32 %v5188_v1, %v9532_v26 }
 0x346   : > { %v5190_v8 = vpop.f32.mrf.mxu1  ;;  %v9661_v60 = vpop.f32.mrf.mxu0 }
 0x347   : > { %10592 = vst [vmem:[#allocation31_spill] sm:$0xff] %v9659_v56  ;;  %v9664_v49 = vadd.f32 %v5190_v8, %v9534_v52 }
 0x348   : > { %v5194_v33 = vpop.f32.mrf.mxu1  ;;  %v9666_v23 = vpop.f32.mrf.mxu0 }
 0x349   : > { %10593 = vst [vmem:[#allocation35_spill] sm:$0xff] %v9664_v49  ;;  %v9669_v27 = vadd.f32 %v5194_v33, %v9537_v16 }
 0x34a   : > { %v5196_v47 = vpop.f32.mrf.mxu1  ;;  %v9671_v15 = vpop.f32.mrf.mxu0 }
 0x34b   : > { %10594 = vst [vmem:[#allocation36_spill] sm:$0xff] %v9669_v27  ;;  %v9674_v22 = vadd.f32 %v5196_v47, %v9542_v58 }
 0x34c   : > { %v5198_v26 = vpop.f32.mrf.mxu1  ;;  %v9676_v31 = vpop.f32.mrf.mxu0 }
 0x34d   : > { %10595 = vst [vmem:[#allocation39_spill] sm:$0xff] %v9674_v22  ;;  %v9679_v39 = vadd.f32 %v5198_v26, %v9547_v17 }
 0x34e   : > { %v5200_v52 = vpop.f32.mrf.mxu1  ;;  %v9681_v5 = vpop.f32.mrf.mxu0 }
 0x34f   : > { %10596 = vst [vmem:[#allocation40_spill] sm:$0xff] %v9679_v39  ;;  %v9684_v48 = vadd.f32 %v5200_v52, %v9549_v45 }
 0x350   : > { %v5204_v16 = vpop.f32.mrf.mxu1  ;;  %v9686_v63 = vpop.f32.mrf.mxu0 }
 0x351   : > { %10597 = vst [vmem:[#allocation41_spill] sm:$0xff] %v9684_v48  ;;  %v9689_v46 = vadd.f32 %v5204_v16, %v9552_v18 }
 0x352   : > { %v5206_v58 = vpop.f32.mrf.mxu1  ;;  %v9691_v44 = vpop.f32.mrf.mxu0 }
 0x353   : > { %10598 = vst [vmem:[#allocation42_spill] sm:$0xff] %v9689_v46  ;;  %v9694_v28 = vadd.f32 %v5206_v58, %v9557_v6 }
 0x354   : > { %v5208_v17 = vpop.f32.mrf.mxu1  ;;  %v9696_v34 = vpop.f32.mrf.mxu0 }
 0x355   : > { %10599 = vst [vmem:[#allocation43_spill] sm:$0xff] %v9694_v28  ;;  %v9699_v59 = vadd.f32 %v5208_v17, %v9560_v24 }
 0x356   : > { %v5210_v45 = vpop.f32.mrf.mxu1  ;;  %v9701_v1 = vpop.f32.mrf.mxu0 }
 0x357   : > { %10600 = vst [vmem:[#allocation44_spill] sm:$0xff] %v9699_v59  ;;  %v9704_v8 = vadd.f32 %v5210_v45, %v9563_v32 }
 0x358   : > { %v5214_v18 = vpop.f32.mrf.mxu1  ;;  %v9706_v33 = vpop.f32.mrf.mxu0 }
 0x359   : > { %10601 = vst [vmem:[#allocation45_spill] sm:$0xff] %v9704_v8  ;;  %v9709_v47 = vadd.f32 %v5214_v18, %v9566_v0 }
 0x35a   : > { %v5216_v6 = vpop.f32.mrf.mxu1  ;;  %v9711_v26 = vpop.f32.mrf.mxu0 }
 0x35b   : > { %10602 = vst [vmem:[#allocation46_spill] sm:$0xff] %v9709_v47  ;;  %v9714_v52 = vadd.f32 %v5216_v6, %v9571_v40 }
 0x35c   : > { %v5218_v24 = vpop.f32.mrf.mxu1  ;;  %v9716_v16 = vpop.f32.mrf.mxu0 }
 0x35d   : > { %10603 = vst [vmem:[#allocation47_spill] sm:$0xff] %v9714_v52  ;;  %v9719_v58 = vadd.f32 %v5218_v24, %v9574_v43 }
 0x35e   : > { %v5220_v32 = vpop.f32.mrf.mxu1  ;;  %v9721_v17 = vpop.f32.mrf.mxu0 }
 0x35f   : > { %10604 = vst [vmem:[#allocation48_spill] sm:$0xff] %v9719_v58  ;;  %v9724_v45 = vadd.f32 %v5220_v32, %v9577_v53 }
 0x360   : > { %v5224_v0 = vpop.f32.mrf.mxu1  ;;  %v9726_v18 = vpop.f32.mrf.mxu0 }
 0x361   : > { %10605 = vst [vmem:[#allocation49_spill] sm:$0xff] %v9724_v45  ;;  %v9729_v47 = vadd.f32 %v5224_v0, %v9580_v13 }
 0x362   : > { %v5226_v40 = vpop.f32.mrf.mxu1  ;;  %v9731_v6 = vpop.f32.mrf.mxu0 }
 0x363   : > { %10606 = vst [vmem:[#allocation50_spill] sm:$0xff] %v9729_v47  ;;  %v9734_v52 = vadd.f32 %v5226_v40, %v9585_v10 }
 0x364   : > { %v5228_v43 = vpop.f32.mrf.mxu1  ;;  %v9736_v24 = vpop.f32.mrf.mxu0 }
 0x365   : > { %10607 = vst [vmem:[#allocation51_spill] sm:$0xff] %v9734_v52  ;;  %v9739_v58 = vadd.f32 %v5228_v43, %v9588_v2 }
 0x366   : > { %v5230_v53 = vpop.f32.mrf.mxu1  ;;  %v9741_v32 = vpop.f32.mrf.mxu0 }
 0x367   : > { %10608 = vst [vmem:[#allocation52_spill] sm:$0xff] %v9739_v58  ;;  %v9744_v45 = vadd.f32 %v5230_v53, %v9591_v30 }
 0x368   : > { %v5234_v13 = vpop.f32.mrf.mxu1  ;;  %v9746_v0 = vpop.f32.mrf.mxu0 }
 0x369   : > { %10609 = vst [vmem:[#allocation53_spill] sm:$0xff] %v9744_v45  ;;  %v9749_v47 = vadd.f32 %v5234_v13, %v9594_v38 }
 0x36a   : > { %v5236_v10 = vpop.f32.mrf.mxu1  ;;  %v9751_v40 = vpop.f32.mrf.mxu0 }
 0x36b   : > { %10610 = vst [vmem:[#allocation54_spill] sm:$0xff] %v9749_v47  ;;  %v9754_v52 = vadd.f32 %v5236_v10, %v9598_v3 }
 0x36c   : > { %v5238_v2 = vpop.f32.mrf.mxu1  ;;  %v9756_v43 = vpop.f32.mrf.mxu0 }
 0x36d   : > { %10611 = vst [vmem:[#allocation55_spill] sm:$0xff] %v9754_v52  ;;  %v9759_v58 = vadd.f32 %v5238_v2, %v9602_v42 }
 0x36e   : > { %v5240_v30 = vpop.f32.mrf.mxu1  ;;  %v9761_v53 = vpop.f32.mrf.mxu0 }
 0x36f   : > { %10612 = vst [vmem:[#allocation56_spill] sm:$0xff] %v9759_v58  ;;  %v9764_v45 = vadd.f32 %v5240_v30, %v9604_v9 }
 0x370   : > { %v5390_v38 = vpop.f32.mrf.mxu1 }
 0x371   : > { %10613 = vst [vmem:[#allocation57_spill] sm:$0xff] %v9764_v45  ;;  %v9767_v13 = vadd.f32 %v5390_v38, %v9606_v29  ;;  %v9769_v47 = vpop.f32.mrf.mxu0 }
 0x372   : > { %v5392_v3 = vpop.f32.mrf.mxu1 }
 0x373   : > { %v9772_v10 = vadd.f32 %v5392_v3, %v9611_v20  ;;  %v9774_v8 = vpop.f32.mrf.mxu0 }
 0x374   : > { %v5394_v52 = vpop.f32.mrf.mxu1 }
 0x375   : > { %v9777_v42 = vadd.f32 %v5394_v52, %v9616_v41  ;;  %v9782_v45 = vpop.f32.mrf.mxu0 }
 0x376   : > { %v5396_v2 = vpop.f32.mrf.mxu1 }
 0x377   : > { %v9780_v9 = vadd.f32 %v5396_v2, %v9621_v51  ;;  %v9790_v58 = vpop.f32.mrf.mxu0 }
 0x378   : > { %v5400_v30 = vpop.f32.mrf.mxu1 }
 0x379   : > { %v9785_v29 = vadd.f32 %v5400_v30, %v9626_v21  ;;  %v9798_v59 = vpop.f32.mrf.mxu0  ;;  %v5510_v35 = vadd.f32 %v9790_v58, %v9780_v9 }
 0x37a   : > { %v5402_v38 = vpop.f32.mrf.mxu1 }
 0x37b   : > { %v9788_v20 = vadd.f32 %v5402_v38, %v9631_v7  ;;  %v9806_v28 = vpop.f32.mrf.mxu0 }
 0x37c   : > { %v5404_v3 = vpop.f32.mrf.mxu1 }
 0x37d   : > { %v9793_v41 = vadd.f32 %v5404_v3, %v9636_v4  ;;  %v9814_v46 = vpop.f32.mrf.mxu0 }
 0x37e   : > { %v5406_v52 = vpop.f32.mrf.mxu1 }
 0x37f   : > { %v9796_v51 = vadd.f32 %v5406_v52, %v9641_v14  ;;  %v9822_v48 = vpop.f32.mrf.mxu0 }
 0x380   : > { %v5410_v2 = vpop.f32.mrf.mxu1 }
 0x381   : > { %v9801_v21 = vadd.f32 %v5410_v2, %v9646_v50  ;;  %v9830_v39 = vpop.f32.mrf.mxu0 }
 0x382   : > { %v5412_v30 = vpop.f32.mrf.mxu1 }
 0x383   : > { %v9804_v7 = vadd.f32 %v5412_v30, %v9651_v57  ;;  %v9838_v22 = vpop.f32.mrf.mxu0 }
 0x384   : > { %v5414_v38 = vpop.f32.mrf.mxu1 }
 0x385   : > { %v9809_v4 = vadd.f32 %v5414_v38, %v9656_v55  ;;  %v5527_v27 = vpop.f32.mrf.mxu0 }
 0x386   : > { %v5416_v3 = vpop.f32.mrf.mxu1 }
 0x387   : > { %v9812_v14 = vadd.f32 %v5416_v3, %v9661_v60 }
 0x388   : > { %v5420_v52 = vpop.f32.mrf.mxu1 }
 0x389   : > { %v9817_v50 = vadd.f32 %v5420_v52, %v9666_v23 }
 0x38a   : > { %v5422_v2 = vpop.f32.mrf.mxu1 }
 0x38b   : > { %v9820_v57 = vadd.f32 %v5422_v2, %v9671_v15 }
 0x38c   : > { %v5424_v30 = vpop.f32.mrf.mxu1 }
 0x38d   : > { %v9825_v55 = vadd.f32 %v5424_v30, %v9676_v31 }
 0x38e   : > { %v5426_v38 = vpop.f32.mrf.mxu1 }
 0x38f   : > { %v9828_v60 = vadd.f32 %v5426_v38, %v9681_v5 }
 0x390   : > { %v5430_v3 = vpop.f32.mrf.mxu1 }
 0x391   : > { %v9833_v23 = vadd.f32 %v5430_v3, %v9686_v63 }
 0x392   : > { %v5432_v52 = vpop.f32.mrf.mxu1 }
 0x393   : > { %v9836_v15 = vadd.f32 %v5432_v52, %v9691_v44  ;;  %v5529_v52 = vpop.f32.mrf.mxu0 }
 0x394   : > { %v5434_v2 = vpop.f32.mrf.mxu1 }
 0x395   : > { %v9841_v31 = vadd.f32 %v5434_v2, %v9696_v34 }
 0x396   : > { %v5436_v30 = vpop.f32.mrf.mxu1 }
 0x397   : > { %v9844_v5 = vadd.f32 %v5436_v30, %v9701_v1  ;;  %v5533_v30 = vpop.f32.mrf.mxu0 }
 0x398   : > { %v5440_v38 = vpop.f32.mrf.mxu1 }
 0x399   : > { %v9847_v49 = vadd.f32 %v5440_v38, %v9706_v33 }
 0x39a   : > { %v5442_v63 = vpop.f32.mrf.mxu1 }
 0x39b   : > { %v9850_v3 = vadd.f32 %v5442_v63, %v9711_v26  ;;  %v5535_v63 = vpop.f32.mrf.mxu0 }
 0x39c   : > { %v5444_v44 = vpop.f32.mrf.mxu1 }
 0x39d   : > { %v9853_v56 = vadd.f32 %v5444_v44, %v9716_v16 }
 0x39e   : > { %v5446_v34 = vpop.f32.mrf.mxu1 }
 0x39f   : > { %v9856_v2 = vadd.f32 %v5446_v34, %v9721_v17  ;;  %v5537_v34 = vpop.f32.mrf.mxu0 }
 0x3a0   : > { %v5450_v1 = vpop.f32.mrf.mxu1 }
 0x3a1   : > { %v9859_v36 = vadd.f32 %v5450_v1, %v9726_v18 }
 0x3a2   : > { %v5452_v33 = vpop.f32.mrf.mxu1 }
 0x3a3   : > { %v9862_v38 = vadd.f32 %v5452_v33, %v9731_v6  ;;  %v5539_v33 = vpop.f32.mrf.mxu0 }
 0x3a4   : > { %v5454_v26 = vpop.f32.mrf.mxu1 }
 0x3a5   : > { %v9865_v19 = vadd.f32 %v5454_v26, %v9736_v24  ;;  %v5504_v24 = vadd.f32 %v9769_v47, %v9767_v13  ;;  %v5543_v26 = vpop.f32.mrf.mxu0  ;;  %v5514_v13 = vadd.f32 %v9798_v59, %v9785_v29  ;;  %v5520_v59 = vadd.f32 %v9822_v48, %v9796_v51 }
 0x3a6   : > { %v5456_v16 = vpop.f32.mrf.mxu1 }
 0x3a7   : > { %v9868_v44 = vadd.f32 %v5456_v16, %v9741_v32  ;;  %v5506_v16 = vadd.f32 %v9774_v8, %v9772_v10 }
 0x3a8   : > { %v5460_v17 = vpop.f32.mrf.mxu1 }
 0x3a9   : > { %v9871_v37 = vadd.f32 %v5460_v17, %v9746_v0 }
 0x3aa   : > { %v5462_v18 = vpop.f32.mrf.mxu1 }
 0x3ab   : > { %v9874_v1 = vadd.f32 %v5462_v18, %v9751_v40  ;;  %v5508_v40 = vadd.f32 %v9782_v45, %v9777_v42  ;;  %v5545_v18 = vpop.f32.mrf.mxu0  ;;  %v5516_v45 = vadd.f32 %v9806_v28, %v9788_v20 }
 0x3ac   : > { %v9876_v6 = vpop.f32.mrf.mxu1 }
 0x3ad   : > { %v5547_v10 = vpop.f32.mrf.mxu0 }
 0x3ae   : > { %v9878_v62 = vpop.f32.mrf.mxu1 }
 0x3b1   : > { %v5616_v32 = vpop.f32.mrf.mxu1 }
 0x3b2   : > { %v9884_v11 = vadd.f32 %v5616_v32, %v5504_v24 }
 0x3b3   : > { %v5618_v0 = vpop.f32.mrf.mxu1 }
 0x3b4   : > { %v9888_v17 = vadd.f32 %v5618_v0, %v5506_v16  ;;  %v5518_v16 = vadd.f32 %v9814_v46, %v9793_v41  ;;  %v5524_v0 = vadd.f32 %v9830_v39, %v9801_v21  ;;  %v5526_v46 = vadd.f32 %v9838_v22, %v9804_v7 }
 0x3b5   : > { %v5620_v54 = vpop.f32.mrf.mxu1  ;;  %v5534_v21 = vadd.f32 %v5533_v30, %v9817_v50  ;;  %v5536_v7 = vadd.f32 %v5535_v63, %v9820_v57  ;;  %v5544_v30 = vadd.f32 %v5543_v26, %v9833_v23  ;;  %v5546_v63 = vadd.f32 %v5545_v18, %v9836_v15 }
 0x3b6   : > { %v9892_v12 = vadd.f32 %v5620_v54, %v5508_v40  ;;  %v5549_v54 = vpop.f32.mrf.mxu0 }
 0x3b7   : > { %v5622_v47 = vpop.f32.mrf.mxu1 }
 0x3b8   : > { %v9896_v8 = vadd.f32 %v5622_v47, %v5510_v35  ;;  %v5553_v20 = vpop.f32.mrf.mxu0 }
 0x3b9   : > { %v5626_v24 = vpop.f32.mrf.mxu1  ;;  %v5554_v26 = vadd.f32 %v5553_v20, %v9847_v49 }
 0x3ba   : > { %v9900_v42 = vadd.f32 %v5626_v24, %v5514_v13  ;;  %v5528_v13 = vadd.f32 %v5527_v27, %v9809_v4  ;;  %v5555_v48 = vpop.f32.mrf.mxu0  ;;  %v5538_v4 = vadd.f32 %v5537_v34, %v9825_v55  ;;  %v5548_v34 = vadd.f32 %v5547_v10, %v9841_v31 }
 0x3bb   : > { %v5628_v32 = vpop.f32.mrf.mxu1  ;;  %v5556_v18 = vadd.f32 %v5555_v48, %v9850_v3 }
 0x3bc   : > { %v9904_v58 = vadd.f32 %v5628_v32, %v5516_v45  ;;  %v5530_v45 = vadd.f32 %v5529_v52, %v9812_v14  ;;  %v5540_v52 = vadd.f32 %v5539_v33, %v9828_v60  ;;  %v5550_v33 = vadd.f32 %v5549_v54, %v9844_v5 }
 0x3bd   : > { %v5630_v9 = vpop.f32.mrf.mxu1 }
 0x3be   : > { %v9908_v35 = vadd.f32 %v5630_v9, %v5518_v16  ;;  %v5557_v9 = vpop.f32.mrf.mxu0 }
 0x3bf   : > { %v5632_v29 = vpop.f32.mrf.mxu1  ;;  %v5558_v10 = vadd.f32 %v5557_v9, %v9853_v56 }
 0x3c0   : > { %v9912_v28 = vadd.f32 %v5632_v29, %v5520_v59 }
 0x3c1   : > { %v5636_v40 = vpop.f32.mrf.mxu1 }
 0x3c2   : > { %v9916_v41 = vadd.f32 %v5636_v40, %v5524_v0  ;;  %v5559_v0 = vpop.f32.mrf.mxu0 }
 0x3c3   : > { %v5638_v47 = vpop.f32.mrf.mxu1  ;;  %v5560_v54 = vadd.f32 %v5559_v0, %v9856_v2 }
 0x3c4   : > { %v9919_v24 = vadd.f32 %v5638_v47, %v5526_v46  ;;  %v5563_v47 = vpop.f32.mrf.mxu0 }
 0x3c5   : > { %v5640_v51 = vpop.f32.mrf.mxu1  ;;  %v5564_v20 = vadd.f32 %v5563_v47, %v9859_v36 }
 0x3c6   : > { %v9922_v32 = vadd.f32 %v5640_v51, %v5528_v13 }
 0x3c7   : > { %v5642_v39 = vpop.f32.mrf.mxu1 }
 0x3c8   : > { %v9925_v16 = vadd.f32 %v5642_v39, %v5530_v45  ;;  %v5565_v45 = vpop.f32.mrf.mxu0 }
 0x3c9   : > { %v5646_v22 = vpop.f32.mrf.mxu1  ;;  %v5566_v48 = vadd.f32 %v5565_v45, %v9862_v38 }
 0x3ca   : > { %v9928_v59 = vadd.f32 %v5646_v22, %v5534_v21  ;;  %v5567_v22 = vpop.f32.mrf.mxu0 }
 0x3cb   : > { %v5648_v27 = vpop.f32.mrf.mxu1  ;;  %v5568_v9 = vadd.f32 %v5567_v22, %v9865_v19 }
 0x3cc   : > { %v9931_v29 = vadd.f32 %v5648_v27, %v5536_v7 }
 0x3cd   : > { %v5650_v14 = vpop.f32.mrf.mxu1 }
 0x3ce   : > { %v9934_v40 = vadd.f32 %v5650_v14, %v5538_v4  ;;  %v5569_v4 = vpop.f32.mrf.mxu0 }
 0x3cf   : > { %v5652_v50 = vpop.f32.mrf.mxu1  ;;  %v5570_v0 = vadd.f32 %v5569_v4, %v9868_v44 }
 0x3d0   : > { %v9937_v46 = vadd.f32 %v5652_v50, %v5540_v52  ;;  %v5573_v50 = vpop.f32.mrf.mxu0 }
 0x3d1   : > { %v5656_v57 = vpop.f32.mrf.mxu1  ;;  %v5574_v47 = vadd.f32 %v5573_v50, %v9871_v37 }
 0x3d2   : > { %v9940_v13 = vadd.f32 %v5656_v57, %v5544_v30 }
 0x3d3   : > { %v5658_v55 = vpop.f32.mrf.mxu1 }
 0x3d4   : > { %v9943_v51 = vadd.f32 %v5658_v55, %v5546_v63  ;;  %v5575_v63 = vpop.f32.mrf.mxu0 }
 0x3d5   : > { %v5660_v60 = vpop.f32.mrf.mxu1  ;;  %v5576_v19 = vadd.f32 %v5575_v63, %v9874_v1 }
 0x3d6   : > { %v9946_v39 = vadd.f32 %v5660_v60, %v5548_v34  ;;  %v5465_v34 = vadd.f32 %v9876_v6, %v9756_v43  ;;  %v5577_v45 = vpop.f32.mrf.mxu0 }
 0x3d7   : > { %v5662_v23 = vpop.f32.mrf.mxu1 }
 0x3d8   : > { %v9949_v21 = vadd.f32 %v5662_v23, %v5550_v33  ;;  %v5467_v33 = vadd.f32 %v9878_v62, %v9761_v53  ;;  %v5579_v37 = vpop.f32.mrf.mxu0 }
 0x3d9   : > { %v5666_v15 = vpop.f32.mrf.mxu1 }
 0x3da   : > { %v9952_v7 = vadd.f32 %v5666_v15, %v5554_v26  ;;  %v5578_v26 = vadd.f32 %v5577_v45, %v5465_v34 }
 0x3db   : > { %v5668_v31 = vpop.f32.mrf.mxu1 }
 0x3dc   : > { %v9955_v27 = vadd.f32 %v5668_v31, %v5556_v18  ;;  %v5580_v18 = vadd.f32 %v5579_v37, %v5467_v33 }
 0x3dd   : > { %v5670_v5 = vpop.f32.mrf.mxu1 }
 0x3de   : > { %v9958_v14 = vadd.f32 %v5670_v5, %v5558_v10 }
 0x3df   : > { %v5672_v49 = vpop.f32.mrf.mxu1 }
 0x3e0   : > { %v9961_v52 = vadd.f32 %v5672_v49, %v5560_v54 }
 0x3e1   : > { %v5676_v3 = vpop.f32.mrf.mxu1 }
 0x3e2   : > { %v9964_v30 = vadd.f32 %v5676_v3, %v5564_v20 }
 0x3e3   : > { %v5678_v56 = vpop.f32.mrf.mxu1 }
 0x3e4   : > { %v9967_v57 = vadd.f32 %v5678_v56, %v5566_v48 }
 0x3e5   : > { %v5680_v2 = vpop.f32.mrf.mxu1 }
 0x3e6   : > { %v9970_v55 = vadd.f32 %v5680_v2, %v5568_v9 }
 0x3e7   : > { %v5682_v36 = vpop.f32.mrf.mxu1 }
 0x3e8   : > { %v9975_v38 = vadd.f32 %v5682_v36, %v5570_v0 }
 0x3e9   : > { %v5686_v60 = vpop.f32.mrf.mxu1 }
 0x3ea   : > { %v9980_v23 = vadd.f32 %v5686_v60, %v5574_v47 }
 0x3eb   : > { %v5688_v44 = vpop.f32.mrf.mxu1 }
 0x3ec   : > { %v9982_v22 = vadd.f32 %v5688_v44, %v5576_v19  ;;  %5698 = sbr.rel (%p6789_p3) target bundleno = 1048 (0x418), region = 64 }
 0x3ed   : > { %v5690_v15 = vpop.f32.mrf.mxu1 }
 0x3ee   : > { %v9984_v43 = vadd.f32 %v5690_v15, %v5578_v26 }
 0x3ef   : > { %v5692_v6 = vpop.f32.mrf.mxu1 }
 0x3f0   : > { %v9986_v31 = vadd.f32 %v5692_v6, %v5580_v18 }
 0x3f1   : > { %v5699_v62 = vld [vmem:[#allocation10] sm:$0xf]  ;;  %v10615_v53 = vld [vmem:[#allocation27_spill] sm:$0xff]  ;;  %v10620_v63 = vld [vmem:[#allocation37_spill] sm:$0xff] }
 0x3f2   : > { %v10616_v1 = vsub.s32 0, %v10615_v53  ;;  %v10617_v4 = vsub.s32 1, %v10615_v53  ;;  %v10618_v54 = vsub.s32 2, %v10615_v53  ;;  %v10619_v20 = vsub.s32 3, %v10615_v53  ;;  %v10621_v0 = vld [vmem:[#allocation38_spill] sm:$0xff]  ;;  %v10622_v45 = vld [vmem:[#allocation32_spill] sm:$0xff] }
 0x3f3   : > { %v10623_v19 = vld [vmem:[#allocation29_spill] sm:$0xff]  ;;  %v10624_v37 = vld [vmem:[#allocation30_spill] sm:$0xff] }
 0x3f4   : > { %v9995_v10 = vrot.slane %v5699_v62, %v10616_v1  ;;  %v9999_v5 = vrot.slane %v5699_v62, %v10617_v4  ;;  %v10003_v49 = vrot.slane %v5699_v62, %v10618_v54  ;;  %v10007_v50 = vrot.slane %v5699_v62, %v10619_v20  ;;  %v10625_v18 = vld [vmem:[#allocation34_spill] sm:$0xff]  ;;  %v10626_v1 = vld [vmem:[#allocation28_spill] sm:$0xff]  ;;  %v10627_v54 = vld [vmem:[#allocation33_spill] sm:$0xff] }
 0x3f6   : > { %v5721_v3 = vadd.f32 %v9995_v10, %v9609_v61  ;;  %v5722_v48 = vadd.f32 %v9999_v5, %v9614_v25  ;;  %v5723_v56 = vadd.f32 %v10003_v49, %v9884_v11  ;;  %v5724_v9 = vadd.f32 %v10007_v50, %v9888_v17 }
 0x3f7   : > { %v5725_v2 = vadd.f32 %v9995_v10, %v10620_v63  ;;  %v5726_v36 = vadd.f32 %v9999_v5, %v10621_v0  ;;  %v5727_v47 = vadd.f32 %v10003_v49, %v9892_v12  ;;  %v5728_v34 = vadd.f32 %v10007_v50, %v9896_v8  ;;  %v10629_v63 = vld [vmem:[#allocation35_spill] sm:$0xff] }
 0x3f8   : > { %5785 = vst [vmem:[%s9990_s29] sm:$0xff] %v5721_v3  ;;  %5786 = vst [vmem:[%s9990_s29 + $0x8] sm:$0xff] %v5722_v48  ;;  %v5729_v60 = vadd.f32 %v9995_v10, %v10622_v45  ;;  %v5730_v33 = vadd.f32 %v9999_v5, %v10623_v19  ;;  %v5731_v44 = vadd.f32 %v10003_v49, %v9900_v42  ;;  %v10631_v45 = vld [vmem:[#allocation39_spill] sm:$0xff] }
 0x3f9   : > { %5787 = vst [vmem:[%s9990_s29 + $0x10] sm:$0xff] %v5723_v56  ;;  %5788 = vst [vmem:[%s9990_s29 + $0x18] sm:$0xff] %v5724_v9  ;;  %v5732_v26 = vadd.f32 %v10007_v50, %v9904_v58  ;;  %v5733_v15 = vadd.f32 %v9995_v10, %v10624_v37  ;;  %v5734_v6 = vadd.f32 %v9999_v5, %v10625_v18  ;;  %v10628_v56 = vld [vmem:[#allocation31_spill] sm:$0xff]  ;;  %v10633_v37 = vld [vmem:[#allocation41_spill] sm:$0xff] }
 0x3fa   : > { %5789 = vst [vmem:[%s9990_s29 + $0x20] sm:$0xff] %v5725_v2  ;;  %5790 = vst [vmem:[%s9990_s29 + $0x28] sm:$0xff] %v5726_v36  ;;  %v5735_v62 = vadd.f32 %v10003_v49, %v9908_v35  ;;  %v5736_v53 = vadd.f32 %v10007_v50, %v9912_v28  ;;  %v5737_v4 = vadd.f32 %v9995_v10, %v10626_v1  ;;  %v10635_v1 = vld [vmem:[#allocation43_spill] sm:$0xff] }
 0x3fb   : > { %5791 = vst [vmem:[%s9990_s29 + $0x30] sm:$0xff] %v5727_v47  ;;  %5792 = vst [vmem:[%s9990_s29 + $0x38] sm:$0xff] %v5728_v34  ;;  %v5738_v20 = vadd.f32 %v9999_v5, %v10627_v54  ;;  %v5739_v3 = vadd.f32 %v10003_v49, %v9916_v41  ;;  %v5740_v48 = vadd.f32 %v10007_v50, %v9919_v24  ;;  %v10630_v47 = vld [vmem:[#allocation36_spill] sm:$0xff] }
 0x3fc   : > { %5793 = vst [vmem:[%s9990_s29 + $0x40] sm:$0xff] %v5729_v60  ;;  %5794 = vst [vmem:[%s9990_s29 + $0x48] sm:$0xff] %v5730_v33  ;;  %v5741_v9 = vadd.f32 %v9995_v10, %v10628_v56  ;;  %v5742_v2 = vadd.f32 %v9999_v5, %v10629_v63  ;;  %v5743_v0 = vadd.f32 %v10003_v49, %v9922_v32  ;;  %v10637_v56 = vld [vmem:[#allocation45_spill] sm:$0xff] }
 0x3fd   : > { %5795 = vst [vmem:[%s9990_s29 + $0x50] sm:$0xff] %v5731_v44  ;;  %5796 = vst [vmem:[%s9990_s29 + $0x58] sm:$0xff] %v5732_v26  ;;  %v5744_v36 = vadd.f32 %v10007_v50, %v9925_v16  ;;  %v5745_v34 = vadd.f32 %v9995_v10, %v10630_v47  ;;  %v5746_v60 = vadd.f32 %v9999_v5, %v10631_v45  ;;  %v10632_v44 = vld [vmem:[#allocation40_spill] sm:$0xff]  ;;  %v10639_v47 = vld [vmem:[#allocation47_spill] sm:$0xff] }
 0x3fe   : > { %5797 = vst [vmem:[%s9990_s29 + $0x60] sm:$0xff] %v5733_v15  ;;  %5798 = vst [vmem:[%s9990_s29 + $0x68] sm:$0xff] %v5734_v6  ;;  %v5747_v19 = vadd.f32 %v10003_v49, %v9928_v59  ;;  %v5748_v33 = vadd.f32 %v10007_v50, %v9931_v29  ;;  %v5749_v26 = vadd.f32 %v9995_v10, %v10632_v44  ;;  %v10641_v44 = vld [vmem:[#allocation49_spill] sm:$0xff] }
 0x3ff   : > { %5799 = vst [vmem:[%s9990_s29 + $0x70] sm:$0xff] %v5735_v62  ;;  %5800 = vst [vmem:[%s9990_s29 + $0x78] sm:$0xff] %v5736_v53  ;;  %v5750_v15 = vadd.f32 %v9999_v5, %v10633_v37  ;;  %v5751_v18 = vadd.f32 %v10003_v49, %v9934_v40  ;;  %v5752_v6 = vadd.f32 %v10007_v50, %v9937_v46  ;;  %v10634_v62 = vld [vmem:[#allocation42_spill] sm:$0xff] }
 0x400   : > { %5801 = vst [vmem:[%s9990_s29 + $0x80] sm:$0xff] %v5737_v4  ;;  %5802 = vst [vmem:[%s9990_s29 + $0x88] sm:$0xff] %v5738_v20  ;;  %v5753_v53 = vadd.f32 %v9995_v10, %v10634_v62  ;;  %v5754_v4 = vadd.f32 %v9999_v5, %v10635_v1  ;;  %v5755_v54 = vadd.f32 %v10003_v49, %v9940_v13  ;;  %v10643_v62 = vld [vmem:[#allocation51_spill] sm:$0xff] }
 0x401   : > { %5803 = vst [vmem:[%s9990_s29 + $0x90] sm:$0xff] %v5739_v3  ;;  %5804 = vst [vmem:[%s9990_s29 + $0x98] sm:$0xff] %v5740_v48  ;;  %v5756_v20 = vadd.f32 %v10007_v50, %v9943_v51  ;;  %v10636_v3 = vld [vmem:[#allocation44_spill] sm:$0xff]  ;;  %v5759_v63 = vadd.f32 %v10003_v49, %v9946_v39  ;;  %v5763_v45 = vadd.f32 %v10003_v49, %v9952_v7 }
 0x402   : > { %5805 = vst [vmem:[%s9990_s29 + $0xa0] sm:$0xff] %v5741_v9  ;;  %5806 = vst [vmem:[%s9990_s29 + $0xa8] sm:$0xff] %v5742_v2  ;;  %v5757_v48 = vadd.f32 %v9995_v10, %v10636_v3  ;;  %v5758_v9 = vadd.f32 %v9999_v5, %v10637_v56  ;;  %v5760_v2 = vadd.f32 %v10007_v50, %v9949_v21  ;;  %v10645_v3 = vld [vmem:[#allocation53_spill] sm:$0xff] }
 0x403   : > { %5807 = vst [vmem:[%s9990_s29 + $0xb0] sm:$0xff] %v5743_v0  ;;  %5808 = vst [vmem:[%s9990_s29 + $0xb8] sm:$0xff] %v5744_v36  ;;  %v10638_v0 = vld [vmem:[#allocation46_spill] sm:$0xff]  ;;  %v5767_v37 = vadd.f32 %v10003_v49, %v9958_v14  ;;  %v5771_v1 = vadd.f32 %v10003_v49, %v9964_v30  ;;  %v5775_v56 = vadd.f32 %v10003_v49, %v9970_v55 }
 0x404   : > { %5809 = vst [vmem:[%s9990_s29 + $0xc0] sm:$0xff] %v5745_v34  ;;  %5810 = vst [vmem:[%s9990_s29 + $0xc8] sm:$0xff] %v5746_v60  ;;  %v5761_v36 = vadd.f32 %v9995_v10, %v10638_v0  ;;  %v5762_v34 = vadd.f32 %v9999_v5, %v10639_v47  ;;  %v5764_v60 = vadd.f32 %v10007_v50, %v9955_v27  ;;  %v10647_v0 = vld [vmem:[#allocation55_spill] sm:$0xff] }
 0x405   : > { %5811 = vst [vmem:[%s9990_s29 + $0xd0] sm:$0xff] %v5747_v19  ;;  %5812 = vst [vmem:[%s9990_s29 + $0xd8] sm:$0xff] %v5748_v33  ;;  %v10640_v19 = vld [vmem:[#allocation48_spill] sm:$0xff]  ;;  %v5779_v47 = vadd.f32 %v10003_v49, %v9980_v23 }
 0x406   : > { %5813 = vst [vmem:[%s9990_s29 + $0xe0] sm:$0xff] %v5749_v26  ;;  %5814 = vst [vmem:[%s9990_s29 + $0xe8] sm:$0xff] %v5750_v15  ;;  %v5765_v33 = vadd.f32 %v9995_v10, %v10640_v19  ;;  %v5766_v26 = vadd.f32 %v9999_v5, %v10641_v44  ;;  %v5768_v15 = vadd.f32 %v10007_v50, %v9961_v52  ;;  %v10649_v19 = vld [vmem:[#allocation57_spill] sm:$0xff] }
 0x407   : > { %5815 = vst [vmem:[%s9990_s29 + $0xf0] sm:$0xff] %v5751_v18  ;;  %5816 = vst [vmem:[%s9990_s29 + $0xf8] sm:$0xff] %v5752_v6  ;;  %v10642_v18 = vld [vmem:[#allocation50_spill] sm:$0xff]  ;;  %v5783_v44 = vadd.f32 %v10003_v49, %v9984_v43 }
 0x408   : > { %5817 = vst [vmem:[%s9990_s29 + $0x100] sm:$0xff] %v5753_v53  ;;  %5818 = vst [vmem:[%s9990_s29 + $0x108] sm:$0xff] %v5754_v4  ;;  %v5769_v6 = vadd.f32 %v9995_v10, %v10642_v18  ;;  %v5770_v53 = vadd.f32 %v9999_v5, %v10643_v62  ;;  %v5772_v4 = vadd.f32 %v10007_v50, %v9967_v57 }
 0x409   : > { %5819 = vst [vmem:[%s9990_s29 + $0x110] sm:$0xff] %v5755_v54  ;;  %5820 = vst [vmem:[%s9990_s29 + $0x118] sm:$0xff] %v5756_v20  ;;  %v10644_v54 = vld [vmem:[#allocation52_spill] sm:$0xff] }
 0x40a   : > { %5821 = vst [vmem:[%s9990_s29 + $0x120] sm:$0xff] %v5757_v48  ;;  %5822 = vst [vmem:[%s9990_s29 + $0x128] sm:$0xff] %v5758_v9  ;;  %v5773_v20 = vadd.f32 %v9995_v10, %v10644_v54  ;;  %v5774_v48 = vadd.f32 %v9999_v5, %v10645_v3  ;;  %v5776_v9 = vadd.f32 %v10007_v50, %v9975_v38 }
 0x40b   : > { %5823 = vst [vmem:[%s9990_s29 + $0x130] sm:$0xff] %v5759_v63  ;;  %5824 = vst [vmem:[%s9990_s29 + $0x138] sm:$0xff] %v5760_v2  ;;  %v10646_v63 = vld [vmem:[#allocation54_spill] sm:$0xff] }
 0x40c   : > { %5825 = vst [vmem:[%s9990_s29 + $0x140] sm:$0xff] %v5761_v36  ;;  %5826 = vst [vmem:[%s9990_s29 + $0x148] sm:$0xff] %v5762_v34  ;;  %v5777_v2 = vadd.f32 %v9995_v10, %v10646_v63  ;;  %v5778_v36 = vadd.f32 %v9999_v5, %v10647_v0  ;;  %v5780_v34 = vadd.f32 %v10007_v50, %v9982_v22 }
 0x40d   : > { %5827 = vst [vmem:[%s9990_s29 + $0x150] sm:$0xff] %v5763_v45  ;;  %5828 = vst [vmem:[%s9990_s29 + $0x158] sm:$0xff] %v5764_v60  ;;  %v10648_v45 = vld [vmem:[#allocation56_spill] sm:$0xff] }
 0x40e   : > { %5829 = vst [vmem:[%s9990_s29 + $0x160] sm:$0xff] %v5765_v33  ;;  %5830 = vst [vmem:[%s9990_s29 + $0x168] sm:$0xff] %v5766_v26  ;;  %v5781_v60 = vadd.f32 %v9995_v10, %v10648_v45  ;;  %v5782_v33 = vadd.f32 %v9999_v5, %v10649_v19  ;;  %v5784_v26 = vadd.f32 %v10007_v50, %v9986_v31 }
 0x40f   : > { %5831 = vst [vmem:[%s9990_s29 + $0x170] sm:$0xff] %v5767_v37  ;;  %5832 = vst [vmem:[%s9990_s29 + $0x178] sm:$0xff] %v5768_v15 }
 0x410   : > { %5833 = vst [vmem:[%s9990_s29 + $0x180] sm:$0xff] %v5769_v6  ;;  %5834 = vst [vmem:[%s9990_s29 + $0x188] sm:$0xff] %v5770_v53 }
 0x411   : > { %5835 = vst [vmem:[%s9990_s29 + $0x190] sm:$0xff] %v5771_v1  ;;  %5836 = vst [vmem:[%s9990_s29 + $0x198] sm:$0xff] %v5772_v4 }
 0x412   : > { %5837 = vst [vmem:[%s9990_s29 + $0x1a0] sm:$0xff] %v5773_v20  ;;  %5838 = vst [vmem:[%s9990_s29 + $0x1a8] sm:$0xff] %v5774_v48 }
 0x413   : > { %5839 = vst [vmem:[%s9990_s29 + $0x1b0] sm:$0xff] %v5775_v56  ;;  %5840 = vst [vmem:[%s9990_s29 + $0x1b8] sm:$0xff] %v5776_v9 }
 0x414   : > { %5841 = vst [vmem:[%s9990_s29 + $0x1c0] sm:$0xff] %v5777_v2  ;;  %5842 = vst [vmem:[%s9990_s29 + $0x1c8] sm:$0xff] %v5778_v36 }
 0x415   : > { %5843 = vst [vmem:[%s9990_s29 + $0x1d0] sm:$0xff] %v5779_v47  ;;  %5844 = vst [vmem:[%s9990_s29 + $0x1d8] sm:$0xff] %v5780_v34 }
 0x416   : > { %5845 = vst [vmem:[%s9990_s29 + $0x1e0] sm:$0xff] %v5781_v60  ;;  %5846 = vst [vmem:[%s9990_s29 + $0x1e8] sm:$0xff] %v5782_v33 }
 0x417   : > { %5847 = vst [vmem:[%s9990_s29 + $0x1f0] sm:$0xff] %v5783_v44  ;;  %5848 = vst [vmem:[%s9990_s29 + $0x1f8] sm:$0xff] %v5784_v26 }
 0x418 PF: > { %s10650_s24 = sld [smem:[#allocation19_spill]] }
 0x41e   : > { %p6790_p1 = scmp.le.s32.totalorder %s10650_s24, 0 }
 0x420   : > { %5852 = sbr.rel (%p6790_p1) target bundleno = 1103 (0x44f), region = 68 }
 0x425   : > { %v5853_v10 = vld [vmem:[%s9990_s29] sm:$0xff]  ;;  %v5854_v5 = vld [vmem:[%s9990_s29 + $0x8] sm:$0xff]  ;;  %v5855_v49 = vld [vmem:[%s9990_s29 + $0x10] sm:$0xff] }
 0x426   : > { %v5917_v50 = vadd.f32 %v5853_v10, %v9609_v61  ;;  %v5918_v37 = vadd.f32 %v5854_v5, %v9614_v25  ;;  %v5919_v15 = vadd.f32 %v5855_v49, %v9884_v11  ;;  %v5856_v18 = vld [vmem:[%s9990_s29 + $0x18] sm:$0xff]  ;;  %v5857_v6 = vld [vmem:[%s9990_s29 + $0x20] sm:$0xff]  ;;  %v5858_v62 = vld [vmem:[%s9990_s29 + $0x28] sm:$0xff] }
 0x427   : > { %v5920_v53 = vadd.f32 %v5856_v18, %v9888_v17  ;;  %v10651_v1 = vld [vmem:[#allocation37_spill] sm:$0xff]  ;;  %v10652_v54 = vld [vmem:[#allocation38_spill] sm:$0xff]  ;;  %v5861_v25 = vld [vmem:[%s9990_s29 + $0x40] sm:$0xff] }
 0x428   : > { %v5921_v4 = vadd.f32 %v5857_v6, %v10651_v1  ;;  %v5922_v20 = vadd.f32 %v5858_v62, %v10652_v54  ;;  %v5859_v61 = vld [vmem:[%s9990_s29 + $0x30] sm:$0xff]  ;;  %v5860_v3 = vld [vmem:[%s9990_s29 + $0x38] sm:$0xff]  ;;  %5981 = vst [vmem:[%s9990_s29] sm:$0xff] %v5917_v50  ;;  %5982 = vst [vmem:[%s9990_s29 + $0x8] sm:$0xff] %v5918_v37 }
 0x429   : > { %5983 = vst [vmem:[%s9990_s29 + $0x10] sm:$0xff] %v5919_v15  ;;  %v5923_v11 = vadd.f32 %v5859_v61, %v9892_v12  ;;  %v5924_v17 = vadd.f32 %v5860_v3, %v9896_v8  ;;  %v10653_v48 = vld [vmem:[#allocation32_spill] sm:$0xff]  ;;  %v5863_v63 = vld [vmem:[%s9990_s29 + $0x50] sm:$0xff]  ;;  %v5864_v2 = vld [vmem:[%s9990_s29 + $0x58] sm:$0xff] }
 0x42a   : > { %v5925_v56 = vadd.f32 %v5861_v25, %v10653_v48  ;;  %v5862_v9 = vld [vmem:[%s9990_s29 + $0x48] sm:$0xff]  ;;  %5984 = vst [vmem:[%s9990_s29 + $0x18] sm:$0xff] %v5920_v53  ;;  %5985 = vst [vmem:[%s9990_s29 + $0x20] sm:$0xff] %v5921_v4  ;;  %v10654_v0 = vld [vmem:[#allocation29_spill] sm:$0xff]  ;;  %v5927_v12 = vadd.f32 %v5863_v63, %v9900_v42  ;;  %v5928_v8 = vadd.f32 %v5864_v2, %v9904_v58 }
 0x42b   : > { %5986 = vst [vmem:[%s9990_s29 + $0x28] sm:$0xff] %v5922_v20  ;;  %v5926_v36 = vadd.f32 %v5862_v9, %v10654_v0  ;;  %v5865_v47 = vld [vmem:[%s9990_s29 + $0x60] sm:$0xff]  ;;  %v5866_v34 = vld [vmem:[%s9990_s29 + $0x68] sm:$0xff]  ;;  %v5867_v45 = vld [vmem:[%s9990_s29 + $0x70] sm:$0xff] }
 0x42c   : > { %5987 = vst [vmem:[%s9990_s29 + $0x30] sm:$0xff] %v5923_v11  ;;  %5988 = vst [vmem:[%s9990_s29 + $0x38] sm:$0xff] %v5924_v17  ;;  %v10655_v60 = vld [vmem:[#allocation30_spill] sm:$0xff]  ;;  %v5931_v42 = vadd.f32 %v5867_v45, %v9908_v35  ;;  %v5869_v58 = vld [vmem:[%s9990_s29 + $0x80] sm:$0xff] }
 0x42d   : > { %5989 = vst [vmem:[%s9990_s29 + $0x40] sm:$0xff] %v5925_v56  ;;  %v5929_v19 = vadd.f32 %v5865_v47, %v10655_v60  ;;  %v10656_v33 = vld [vmem:[#allocation34_spill] sm:$0xff]  ;;  %v5870_v10 = vld [vmem:[%s9990_s29 + $0x88] sm:$0xff]  ;;  %5990 = vst [vmem:[%s9990_s29 + $0x48] sm:$0xff] %v5926_v36 }
 0x42e   : > { %v5930_v44 = vadd.f32 %v5866_v34, %v10656_v33  ;;  %v5868_v26 = vld [vmem:[%s9990_s29 + $0x78] sm:$0xff]  ;;  %5991 = vst [vmem:[%s9990_s29 + $0x50] sm:$0xff] %v5927_v12  ;;  %5992 = vst [vmem:[%s9990_s29 + $0x58] sm:$0xff] %v5928_v8  ;;  %v10657_v49 = vld [vmem:[#allocation28_spill] sm:$0xff] }
 0x42f   : > { %v5932_v5 = vadd.f32 %v5868_v26, %v9912_v28  ;;  %v5933_v50 = vadd.f32 %v5869_v58, %v10657_v49  ;;  %v10658_v37 = vld [vmem:[#allocation33_spill] sm:$0xff]  ;;  %v5872_v35 = vld [vmem:[%s9990_s29 + $0x98] sm:$0xff]  ;;  %v5873_v6 = vld [vmem:[%s9990_s29 + $0xa0] sm:$0xff]  ;;  %5993 = vst [vmem:[%s9990_s29 + $0x60] sm:$0xff] %v5929_v19 }
 0x430   : > { %v5934_v15 = vadd.f32 %v5870_v10, %v10658_v37  ;;  %v5871_v18 = vld [vmem:[%s9990_s29 + $0x90] sm:$0xff]  ;;  %5994 = vst [vmem:[%s9990_s29 + $0x68] sm:$0xff] %v5930_v44  ;;  %5995 = vst [vmem:[%s9990_s29 + $0x70] sm:$0xff] %v5931_v42  ;;  %v5936_v28 = vadd.f32 %v5872_v35, %v9919_v24  ;;  %v10659_v53 = vld [vmem:[#allocation31_spill] sm:$0xff] }
 0x431   : > { %v5935_v62 = vadd.f32 %v5871_v18, %v9916_v41  ;;  %v5937_v1 = vadd.f32 %v5873_v6, %v10659_v53  ;;  %v5874_v4 = vld [vmem:[%s9990_s29 + $0xa8] sm:$0xff]  ;;  %v5875_v54 = vld [vmem:[%s9990_s29 + $0xb0] sm:$0xff]  ;;  %v5876_v20 = vld [vmem:[%s9990_s29 + $0xb8] sm:$0xff]  ;;  %5996 = vst [vmem:[%s9990_s29 + $0x78] sm:$0xff] %v5932_v5 }
 0x432   : > { %5997 = vst [vmem:[%s9990_s29 + $0x80] sm:$0xff] %v5933_v50  ;;  %5998 = vst [vmem:[%s9990_s29 + $0x88] sm:$0xff] %v5934_v15  ;;  %v10660_v61 = vld [vmem:[#allocation35_spill] sm:$0xff]  ;;  %v5939_v41 = vadd.f32 %v5875_v54, %v9922_v32  ;;  %v5940_v24 = vadd.f32 %v5876_v20, %v9925_v16  ;;  %v5878_v11 = vld [vmem:[%s9990_s29 + $0xc8] sm:$0xff] }
 0x433   : > { %v5938_v3 = vadd.f32 %v5874_v4, %v10660_v61  ;;  %v5877_v25 = vld [vmem:[%s9990_s29 + $0xc0] sm:$0xff]  ;;  %v5879_v17 = vld [vmem:[%s9990_s29 + $0xd0] sm:$0xff]  ;;  %5999 = vst [vmem:[%s9990_s29 + $0x90] sm:$0xff] %v5935_v62  ;;  %6000 = vst [vmem:[%s9990_s29 + $0x98] sm:$0xff] %v5936_v28 }
 0x434   : > { %6001 = vst [vmem:[%s9990_s29 + $0xa0] sm:$0xff] %v5937_v1  ;;  %v10661_v48 = vld [vmem:[#allocation36_spill] sm:$0xff]  ;;  %v10662_v9 = vld [vmem:[#allocation39_spill] sm:$0xff]  ;;  %v5943_v32 = vadd.f32 %v5879_v17, %v9928_v59  ;;  %v5880_v2 = vld [vmem:[%s9990_s29 + $0xd8] sm:$0xff] }
 0x435   : > { %v5941_v56 = vadd.f32 %v5877_v25, %v10661_v48  ;;  %v5942_v63 = vadd.f32 %v5878_v11, %v10662_v9  ;;  %v5881_v16 = vld [vmem:[%s9990_s29 + $0xe0] sm:$0xff]  ;;  %v5882_v0 = vld [vmem:[%s9990_s29 + $0xe8] sm:$0xff]  ;;  %6002 = vst [vmem:[%s9990_s29 + $0xa8] sm:$0xff] %v5938_v3  ;;  %6003 = vst [vmem:[%s9990_s29 + $0xb0] sm:$0xff] %v5939_v41  ;;  %v5944_v36 = vadd.f32 %v5880_v2, %v9931_v29 }
 0x436   : > { %6004 = vst [vmem:[%s9990_s29 + $0xb8] sm:$0xff] %v5940_v24  ;;  %v10663_v12 = vld [vmem:[#allocation40_spill] sm:$0xff]  ;;  %v10664_v47 = vld [vmem:[#allocation41_spill] sm:$0xff]  ;;  %v5884_v59 = vld [vmem:[%s9990_s29 + $0xf8] sm:$0xff] }
 0x437   : > { %v5945_v8 = vadd.f32 %v5881_v16, %v10663_v12  ;;  %v5946_v34 = vadd.f32 %v5882_v0, %v10664_v47  ;;  %v5883_v45 = vld [vmem:[%s9990_s29 + $0xf0] sm:$0xff]  ;;  %v5885_v60 = vld [vmem:[%s9990_s29 + $0x100] sm:$0xff]  ;;  %6005 = vst [vmem:[%s9990_s29 + $0xc0] sm:$0xff] %v5941_v56  ;;  %6006 = vst [vmem:[%s9990_s29 + $0xc8] sm:$0xff] %v5942_v63  ;;  %v5948_v29 = vadd.f32 %v5884_v59, %v9937_v46 }
 0x438   : > { %6007 = vst [vmem:[%s9990_s29 + $0xd0] sm:$0xff] %v5943_v32  ;;  %v5947_v19 = vadd.f32 %v5883_v45, %v9934_v40  ;;  %v10665_v33 = vld [vmem:[#allocation42_spill] sm:$0xff]  ;;  %v5886_v42 = vld [vmem:[%s9990_s29 + $0x108] sm:$0xff]  ;;  %v5887_v26 = vld [vmem:[%s9990_s29 + $0x110] sm:$0xff] }
 0x439   : > { %v5949_v44 = vadd.f32 %v5885_v60, %v10665_v33  ;;  %v5888_v58 = vld [vmem:[%s9990_s29 + $0x118] sm:$0xff]  ;;  %6008 = vst [vmem:[%s9990_s29 + $0xd8] sm:$0xff] %v5944_v36  ;;  %6009 = vst [vmem:[%s9990_s29 + $0xe0] sm:$0xff] %v5945_v8  ;;  %v10666_v10 = vld [vmem:[#allocation43_spill] sm:$0xff]  ;;  %v5951_v40 = vadd.f32 %v5887_v26, %v9940_v13 }
 0x43a   : > { %6010 = vst [vmem:[%s9990_s29 + $0xe8] sm:$0xff] %v5946_v34  ;;  %v5950_v5 = vadd.f32 %v5886_v42, %v10666_v10  ;;  %v5952_v46 = vadd.f32 %v5888_v58, %v9943_v51  ;;  %v5889_v49 = vld [vmem:[%s9990_s29 + $0x120] sm:$0xff]  ;;  %v5890_v50 = vld [vmem:[%s9990_s29 + $0x128] sm:$0xff]  ;;  %v5891_v37 = vld [vmem:[%s9990_s29 + $0x130] sm:$0xff] }
 0x43b   : > { %6011 = vst [vmem:[%s9990_s29 + $0xf0] sm:$0xff] %v5947_v19  ;;  %6012 = vst [vmem:[%s9990_s29 + $0xf8] sm:$0xff] %v5948_v29  ;;  %v10667_v15 = vld [vmem:[#allocation44_spill] sm:$0xff]  ;;  %v10668_v35 = vld [vmem:[#allocation45_spill] sm:$0xff]  ;;  %v5955_v13 = vadd.f32 %v5891_v37, %v9946_v39 }
 0x43c   : > { %6013 = vst [vmem:[%s9990_s29 + $0x100] sm:$0xff] %v5949_v44  ;;  %v5953_v18 = vadd.f32 %v5889_v49, %v10667_v15  ;;  %v5954_v6 = vadd.f32 %v5890_v50, %v10668_v35  ;;  %v5892_v62 = vld [vmem:[%s9990_s29 + $0x138] sm:$0xff]  ;;  %v5893_v51 = vld [vmem:[%s9990_s29 + $0x140] sm:$0xff]  ;;  %v5894_v28 = vld [vmem:[%s9990_s29 + $0x148] sm:$0xff] }
 0x43d   : > { %6014 = vst [vmem:[%s9990_s29 + $0x108] sm:$0xff] %v5950_v5  ;;  %6015 = vst [vmem:[%s9990_s29 + $0x110] sm:$0xff] %v5951_v40  ;;  %v5956_v53 = vadd.f32 %v5892_v62, %v9949_v21  ;;  %v10669_v1 = vld [vmem:[#allocation46_spill] sm:$0xff]  ;;  %v10670_v54 = vld [vmem:[#allocation47_spill] sm:$0xff] }
 0x43e   : > { %6016 = vst [vmem:[%s9990_s29 + $0x118] sm:$0xff] %v5952_v46  ;;  %v5957_v4 = vadd.f32 %v5893_v51, %v10669_v1  ;;  %v5958_v20 = vadd.f32 %v5894_v28, %v10670_v54  ;;  %v5895_v61 = vld [vmem:[%s9990_s29 + $0x150] sm:$0xff]  ;;  %v5896_v39 = vld [vmem:[%s9990_s29 + $0x158] sm:$0xff]  ;;  %v5897_v3 = vld [vmem:[%s9990_s29 + $0x160] sm:$0xff] }
 0x43f   : > { %6017 = vst [vmem:[%s9990_s29 + $0x120] sm:$0xff] %v5953_v18  ;;  %6018 = vst [vmem:[%s9990_s29 + $0x128] sm:$0xff] %v5954_v6  ;;  %v5959_v41 = vadd.f32 %v5895_v61, %v9952_v7  ;;  %v5960_v21 = vadd.f32 %v5896_v39, %v9955_v27  ;;  %v10671_v24 = vld [vmem:[#allocation48_spill] sm:$0xff]  ;;  %v5899_v17 = vld [vmem:[%s9990_s29 + $0x170] sm:$0xff] }
 0x440   : > { %6019 = vst [vmem:[%s9990_s29 + $0x130] sm:$0xff] %v5955_v13  ;;  %v5961_v25 = vadd.f32 %v5897_v3, %v10671_v24  ;;  %v5898_v11 = vld [vmem:[%s9990_s29 + $0x168] sm:$0xff]  ;;  %v5900_v48 = vld [vmem:[%s9990_s29 + $0x178] sm:$0xff]  ;;  %6020 = vst [vmem:[%s9990_s29 + $0x138] sm:$0xff] %v5956_v53  ;;  %v5963_v7 = vadd.f32 %v5899_v17, %v9958_v14 }
 0x441   : > { %6021 = vst [vmem:[%s9990_s29 + $0x140] sm:$0xff] %v5957_v4  ;;  %6022 = vst [vmem:[%s9990_s29 + $0x148] sm:$0xff] %v5958_v20  ;;  %v10672_v56 = vld [vmem:[#allocation49_spill] sm:$0xff]  ;;  %v5964_v27 = vadd.f32 %v5900_v48, %v9961_v52  ;;  %v5901_v63 = vld [vmem:[%s9990_s29 + $0x180] sm:$0xff] }
 0x442   : > { %v5962_v9 = vadd.f32 %v5898_v11, %v10672_v56  ;;  %v5902_v32 = vld [vmem:[%s9990_s29 + $0x188] sm:$0xff]  ;;  %v5903_v2 = vld [vmem:[%s9990_s29 + $0x190] sm:$0xff]  ;;  %6023 = vst [vmem:[%s9990_s29 + $0x150] sm:$0xff] %v5959_v41  ;;  %6024 = vst [vmem:[%s9990_s29 + $0x158] sm:$0xff] %v5960_v21 }
 0x443   : > { %6025 = vst [vmem:[%s9990_s29 + $0x160] sm:$0xff] %v5961_v25  ;;  %v10673_v16 = vld [vmem:[#allocation50_spill] sm:$0xff]  ;;  %v10674_v36 = vld [vmem:[#allocation51_spill] sm:$0xff]  ;;  %v5967_v14 = vadd.f32 %v5903_v2, %v9964_v30  ;;  %v5906_v47 = vld [vmem:[%s9990_s29 + $0x1a8] sm:$0xff] }
 0x444   : > { %v5965_v0 = vadd.f32 %v5901_v63, %v10673_v16  ;;  %v5966_v12 = vadd.f32 %v5902_v32, %v10674_v36  ;;  %v5904_v8 = vld [vmem:[%s9990_s29 + $0x198] sm:$0xff]  ;;  %v5905_v52 = vld [vmem:[%s9990_s29 + $0x1a0] sm:$0xff]  ;;  %6026 = vst [vmem:[%s9990_s29 + $0x168] sm:$0xff] %v5962_v9  ;;  %6027 = vst [vmem:[%s9990_s29 + $0x170] sm:$0xff] %v5963_v7 }
 0x445   : > { %6028 = vst [vmem:[%s9990_s29 + $0x178] sm:$0xff] %v5964_v27  ;;  %v5968_v34 = vadd.f32 %v5904_v8, %v9967_v57  ;;  %v10675_v45 = vld [vmem:[#allocation52_spill] sm:$0xff]  ;;  %v10676_v60 = vld [vmem:[#allocation53_spill] sm:$0xff]  ;;  %v5908_v30 = vld [vmem:[%s9990_s29 + $0x1b8] sm:$0xff] }
 0x446   : > { %v5969_v59 = vadd.f32 %v5905_v52, %v10675_v45  ;;  %v5970_v19 = vadd.f32 %v5906_v47, %v10676_v60  ;;  %v5907_v29 = vld [vmem:[%s9990_s29 + $0x1b0] sm:$0xff]  ;;  %v5909_v33 = vld [vmem:[%s9990_s29 + $0x1c0] sm:$0xff]  ;;  %6029 = vst [vmem:[%s9990_s29 + $0x180] sm:$0xff] %v5965_v0  ;;  %6030 = vst [vmem:[%s9990_s29 + $0x188] sm:$0xff] %v5966_v12  ;;  %v5972_v57 = vadd.f32 %v5908_v30, %v9975_v38 }
 0x447   : > { %6031 = vst [vmem:[%s9990_s29 + $0x190] sm:$0xff] %v5967_v14  ;;  %v5971_v44 = vadd.f32 %v5907_v29, %v9970_v55  ;;  %v10677_v42 = vld [vmem:[#allocation54_spill] sm:$0xff]  ;;  %v5910_v58 = vld [vmem:[%s9990_s29 + $0x1c8] sm:$0xff]  ;;  %v5911_v10 = vld [vmem:[%s9990_s29 + $0x1d0] sm:$0xff] }
 0x448   : > { %v5973_v26 = vadd.f32 %v5909_v33, %v10677_v42  ;;  %v5912_v5 = vld [vmem:[%s9990_s29 + $0x1d8] sm:$0xff]  ;;  %6032 = vst [vmem:[%s9990_s29 + $0x198] sm:$0xff] %v5968_v34  ;;  %6033 = vst [vmem:[%s9990_s29 + $0x1a0] sm:$0xff] %v5969_v59  ;;  %v10678_v40 = vld [vmem:[#allocation55_spill] sm:$0xff]  ;;  %v5975_v55 = vadd.f32 %v5911_v10, %v9980_v23 }
 0x449   : > { %6034 = vst [vmem:[%s9990_s29 + $0x1a8] sm:$0xff] %v5970_v19  ;;  %v5974_v46 = vadd.f32 %v5910_v58, %v10678_v40  ;;  %v5976_v38 = vadd.f32 %v5912_v5, %v9982_v22  ;;  %v5913_v49 = vld [vmem:[%s9990_s29 + $0x1e0] sm:$0xff]  ;;  %v5914_v50 = vld [vmem:[%s9990_s29 + $0x1e8] sm:$0xff]  ;;  %v5915_v37 = vld [vmem:[%s9990_s29 + $0x1f0] sm:$0xff] }
 0x44a   : > { %6035 = vst [vmem:[%s9990_s29 + $0x1b0] sm:$0xff] %v5971_v44  ;;  %6036 = vst [vmem:[%s9990_s29 + $0x1b8] sm:$0xff] %v5972_v57  ;;  %v10679_v15 = vld [vmem:[#allocation56_spill] sm:$0xff]  ;;  %v10680_v35 = vld [vmem:[#allocation57_spill] sm:$0xff]  ;;  %v5979_v13 = vadd.f32 %v5915_v37, %v9984_v43 }
 0x44b   : > { %6037 = vst [vmem:[%s9990_s29 + $0x1c0] sm:$0xff] %v5973_v26  ;;  %v5977_v18 = vadd.f32 %v5913_v49, %v10679_v15  ;;  %v5978_v6 = vadd.f32 %v5914_v50, %v10680_v35  ;;  %v5916_v62 = vld [vmem:[%s9990_s29 + $0x1f8] sm:$0xff]  ;;  %6038 = vst [vmem:[%s9990_s29 + $0x1c8] sm:$0xff] %v5974_v46 }
 0x44c   : > { %6039 = vst [vmem:[%s9990_s29 + $0x1d0] sm:$0xff] %v5975_v55  ;;  %6040 = vst [vmem:[%s9990_s29 + $0x1d8] sm:$0xff] %v5976_v38  ;;  %v5980_v23 = vadd.f32 %v5916_v62, %v9986_v31 }
 0x44d   : > { %6041 = vst [vmem:[%s9990_s29 + $0x1e0] sm:$0xff] %v5977_v18  ;;  %6042 = vst [vmem:[%s9990_s29 + $0x1e8] sm:$0xff] %v5978_v6 }
 0x44e   : > { %6043 = vst [vmem:[%s9990_s29 + $0x1f0] sm:$0xff] %v5979_v13  ;;  %6044 = vst [vmem:[%s9990_s29 + $0x1f8] sm:$0xff] %v5980_v23 }
 0x44f PF: > { %s10681_s8 = sld [smem:[#allocation20_spill]]  ;;  %s6060_s13 = sshll.u32 %s9990_s29, 4  ;;  %s10401_s13 = int_to_ptr.vmem [resolvable:$true] %s6060_s13 }
 0x450   : > { %s10682_s16 = sld [smem:[#allocation23_spill]]  ;;  %s6046_s14 = scalar_lea.sflag [#allocation4], %s7945_s17 }
 0x451   : > { %s10683_s4 = sld [smem:[#allocation61_spill]]  ;;  %s7543_s25 = scalar_lea.vmem %s10401_s13, 8192 }
 0x452   : > { %p7544_p0 = scmp.ne.s32.totalorder %s10401_s13, %s7543_s25  ;;  %s7687_s11 = smov [#allocation11]  }
 0x453   : > { %s7547_s21 = sshll.u32 %s7687_s11, 4  ;;  %s7548_s21 = int_to_ptr.vmem [resolvable:$false] %s7547_s21 }
 0x454   : > { %s7549_s6 = scalar_lea.vmem %s7548_s21, 16384  ;;  %p7550_p13 = scmp.lt.s32.totalorder %s10401_s13, %s7548_s21 }
 0x455   : > { %s6804_s0 = sshll.u32 %s10681_s8, 13  ;;  %p7551_p5 = scmp.lt.s32.totalorder %s7549_s6, %s7543_s25 }
 0x456   : > { %p10684_p9 = scmp.ne.s32.totalorder %s10682_s16, 0 }
 0x457   : > { %s10398_s18 = scalar_lea.hbm %s10683_s4, %s6804_s0  ;;  %p7552_p6 = por %p7551_p5, %p7550_p13 }
 0x458   : > { %p7545_p7 = pnand %p7544_p0, %p10684_p9 }
 0x45a   : > { %p7546_p11 = pneg %p7545_p7 }
 0x45c   : > { %p7553_p8 = pnand %p7552_p6, %p7546_p11 }
 0x45e   : > { %7556 = shalt.err (!%p7553_p8)
}
 0x45f   : > { %s7557_s7 = scalar_lea.hbm %s10398_s18, 8192  ;;  %s7561_s1 = scalar_lea.hbm %s10683_s4, 16384 }
 0x460   : > { %p7558_p12 = scmp.ne.s32.totalorder %s10398_s18, %s7557_s7  ;;  %p7562_p2 = scmp.lt.s32.totalorder %s10398_s18, %s10683_s4 }
 0x461   : > { %p7563_p3 = scmp.lt.s32.totalorder %s7561_s1, %s7557_s7 }
 0x462   : > { %p7559_p10 = pnand %p7558_p12, %p10684_p9 }
 0x463   : > { %p7564_p1 = por %p7563_p3, %p7562_p2 }
 0x464   : > { %p7560_p4 = pneg %p7559_p10 }
 0x466   : > { %p7565_p0 = pnand %p7564_p1, %p7560_p4 }
 0x468   : > { %7568 = shalt.err (!%p7565_p0)
}
 0x469   : > { %s7688_s10 = smov 512   ;;  %s7689_s24 = smov 32  }
 0x46a   : > { %6817 = dma.vmem_to_hbm [thread:$0]  (%p10684_p9), %s10401_s13, 8192, %s10398_s18, %s6046_s14, %s7688_s10, %s7688_s10, %s7689_s24  }
 0x46b PF: > { %s10685_s8 = sld [smem:[#allocation18_spill]]  ;;  %p6843_p7 = scmp.ge.s32.totalorder %s7675_s28, 2 }
 0x46c   : > { %s10686_s0 = sld [smem:[#allocation24_spill]] }
 0x471   : > { %s6075_s15 = sand.u32 1, %s10685_s8  }
 0x472   : > { %p10687_p11 = scmp.ne.s32.totalorder %s10686_s0, 0  ;;  %s6076_s5 = scalar_lea.sflag [#allocation4], %s6075_s15 }
 0x474   : > { %p6837_p13 = pnand %p6843_p7, %p10687_p11 }
 0x476   : > { %p6838_p5 = pneg %p6837_p13 }
 0x478   : > { %7630 = dma.done.wait (%p6838_p5), %s6076_s5, 8192  }
 0x479   : > { %7632 = vsyncadd (%p6838_p5), %s6076_s5, 4294959104  ;;  %s27_s28 = sadd.s32 1, %s7675_s28   ;;  %s10688_s18 = sld [smem:[#allocation17_spill]] }
 0x47a   : > { %p24_p6 = scmp.ge.s32.totalorder %s27_s28, 6   ;;  %s10689_s17 = smov %s7906_s19 }
 0x47b   : > { %s10690_s25 = sld [smem:[#allocation21_spill]]  ;;  %s10693_s19 = smov %s7643_s20 }
 0x47c   : > { %s10691_s16 = sld [smem:[#allocation25_spill]]  ;;  %s10694_s20 = smov %s7888_s12 }
 0x47d   : > { %s10692_s27 = sld [smem:[#allocation26_spill]]  ;;  %s10695_s21 = smov %s7651_s22 }
 0x47e   : > { %s10696_s22 = smov %s7655_s23  ;;  %s10697_s23 = smov %s10689_s17 }
 0x47f   : > { %s10698_s24 = smov %s7667_s26  ;;  %26 = sbr.rel (!%p24_p6) target bundleno = 18 (0x12), region = 134 }
 0x482   : > { %s10699_s26 = smov %s10691_s16 }
 0x484   :  { %6081 = vsyncpa [#allocation3], 1 }
 0x485   :  { %6083 = vsyncpa [#allocation3 + $0x1], 1 }
 0x486   :  { %6084 = vsyncpa [#allocation6], 1 }
 0x487   :  { %6086 = vsyncpa [#allocation6 + $0x1], 1 }
 0x488   :  { %6087 = vsyncpa [#allocation9], 1 }
 0x489   :  { %6089 = vsyncpa [#allocation9 + $0x1], 1 }
 0x48a   :  { %6090 = vsyncpa [#allocation4], 1 }
 0x48b   :  { %6092 = vsyncpa [#allocation4 + $0x1], 1 }

</bundles_post_ra>
